<compile_context>
chip_gen: v6e
topology: v6e:2x2x1
jax: 0.10.0
libtpu: 0.0.40
codegen_flags: <defaults>
</compile_context>

<pallas_src>
import math
import functools

import jax
import jax.numpy as jnp
from jax.experimental import pallas as pl
from jax.experimental.pallas import tpu as pltpu

BN_EPS = 1e-5


# --------------------------------------------------------------------------- utils
def _apply_act(y, act):
    if act == "swish":
        return y * jax.nn.sigmoid(y)
    if act == "relu":
        return jnp.maximum(y, 0.0)
    return y


def split_channels(total, n):
    split = [int(math.ceil(total / n)) for _ in range(n)]
    split[-1] += total - sum(split)
    return split


def bn_fold(bn, bias=None):
    scale = bn["gamma"] / jnp.sqrt(bn["var"] + BN_EPS)
    shift = bn["beta"] - bn["mean"] * scale
    if bias is not None:
        shift = shift + bias * scale
    return scale, shift


def block_diag(weights):
    """Grouped 1x1 conv == matmul with a block-diagonal (Cin_total, Cout_total) weight."""
    ci_tot = sum(int(w.shape[0]) for w in weights)
    co_tot = sum(int(w.shape[1]) for w in weights)
    full = jnp.zeros((ci_tot, co_tot), jnp.float32)
    ri = co = 0
    for w in weights:
        ci, cw = int(w.shape[0]), int(w.shape[1])
        full = full.at[ri:ri + ci, co:co + cw].set(w.astype(jnp.float32))
        ri += ci
        co += cw
    return full


def pack_mdconv(weights):
    """Center-pad every chunk's (k,k,cg) depthwise kernel to kmax.

    Exactly equivalent to per-chunk 'same'-padded convs because all kernel sizes are odd.
    """
    kmax = max(int(w.shape[0]) for w in weights)
    mid = sum(int(w.shape[-1]) for w in weights)
    wmd = jnp.zeros((kmax, kmax, mid), jnp.float32)
    off = 0
    for w in weights:
        k = int(w.shape[0])
        cg = int(w.shape[-1])
        o = (kmax - k) // 2
        wmd = wmd.at[o:o + k, o:o + k, off:off + cg].set(w.astype(jnp.float32))
        off += cg
    return wmd, kmax


def _vmem_limit_bytes():
    # Generation-aware scoped-VMEM limit: 75% of per-core VMEM, capped at 100 MiB
    # (v7x: ~48 MiB, v5e/v6e: ~96 MiB).  Falls back to 64 MiB if the query fails.
    try:
        cap = int(pltpu.get_tpu_info().vmem_capacity_bytes)
        if cap <= 0:
            raise ValueError
        return int(min(cap * 3 // 4, 100 * 1024 * 1024))
    except Exception:
        return 64 * 1024 * 1024


# ------------------------------------------------------------- fused MixBlock kernel
def _mixblock_kernel(*refs, act, stride, shifts, Ho, Wo,
                     has_expand, has_se, has_res, mxu_dtype):
    f32 = jnp.float32
    o_ref = refs[-1]                      # (1, Cout, Ho*Wo)
    bn_ref = refs[-2]                     # (Cmax, n_vec) packed BN scale/shift columns
    it = iter(refs[:-2])

    x_ref = next(it)
    x32 = x_ref[0].astype(f32)            # (Cin, H*W)  lane-dense

    bn_col = iter(range(bn_ref.shape[1]))

    def bn2(width):
        i = next(bn_col)
        j = next(bn_col)
        return bn_ref[:width, i:i + 1], bn_ref[:width, j:j + 1]   # (width,1) columns

    def mx(a):
        return a.astype(mxu_dtype)

    # ---- grouped 1x1 expand (block-diagonal weight on the MXU) + BN + act
    if has_expand:
        w_e = next(it)                                            # (Mid, Cin)
        s_e, t_e = bn2(w_e.shape[0])
        h = jnp.dot(w_e[...], mx(x32), preferred_element_type=f32)
        h = _apply_act(h * s_e + t_e, act)                        # (Mid, H*W) f32
    else:
        h = x32

    # ---- fused MDConv: per tap = one static lane roll (XLU) + mask + per-channel FMA
    w_md = next(it)                                               # (Mid, kmax*kmax) f32
    mask_ref = next(it)                                           # (kmax*kmax, H*W) {0,1}
    mid = w_md.shape[0]
    HW = h.shape[1]
    s_md, t_md = bn2(mid)
    acc = jnp.zeros((mid, HW), f32)
    for tap, shift in enumerate(shifts):
        src = h if shift == 0 else pltpu.roll(h, shift, 1)
        acc = acc + (src * mask_ref[tap:tap + 1, :]) * w_md[:, tap:tap + 1]
    y = _apply_act(acc * s_md + t_md, act)                        # (Mid, H*W), dense spatial

    if stride > 1:
        decmask_ref = next(it)            # (1, H*W)  {0,1}: positions surviving the stride
        dec_ref = next(it)                # (H*W, Ho*Wo) 0/1 selection matrix

    # ---- squeeze & excitation (global pool over kept positions + 2 tiny matmuls + gate)
    if has_se:
        w_r = next(it)                                            # (red, Mid)
        s_r, t_r = bn2(w_r.shape[0])
        w_x = next(it)                                            # (Mid, red)
        s_x, t_x = bn2(mid)
        if stride > 1:
            pooled = jnp.sum(y * decmask_ref[...], axis=1, keepdims=True)
        else:
            pooled = jnp.sum(y, axis=1, keepdims=True)
        pooled = pooled * (1.0 / float(Ho * Wo))                  # (Mid, 1)
        r = jnp.dot(w_r[...], mx(pooled), preferred_element_type=f32)
        r = _apply_act(r * s_r + t_r, act)
        e = jnp.dot(w_x[...], mx(r), preferred_element_type=f32)
        e = e * s_x + t_x
        y = y * jax.nn.sigmoid(e)

    # ---- grouped 1x1 project (block-diagonal, MXU) + stride decimation + BN (+ residual)
    w_p = next(it)                                                # (Cout, Mid)
    s_p, t_p = bn2(w_p.shape[0])
    out = jnp.dot(w_p[...], mx(y), preferred_element_type=f32)    # (Cout, H*W)
    if stride > 1:
        # per-channel BN/act/SE-gate all commute with spatial decimation, so the
        # strided-conv output is recovered exactly by one 0/1 selection matmul (f32).
        out = jnp.dot(out, dec_ref[...], preferred_element_type=f32)   # (Cout, Ho*Wo)
    out = out * s_p + t_p
    if has_res:
        out = out + x32
    o_ref[0] = out.astype(o_ref.dtype)


# ----------------------------------------------------------------------- wrapper
def mix_block_forward(x, params, cfg, *, mxu_dtype=jnp.float32):
    """x: (N, Cin, H, W) NCHW (PyTorch layout). Returns (N, Cout, Ho, Wo)."""
    N, Cin, H, W = x.shape
    act = "swish" if cfg["swish"] else "relu"
    stride = int(cfg["stride"])
    Cout = int(cfg["out_channels"])
    has_expand = cfg["expand_ratio"] != 1
    has_se = params["se"] is not None
    has_res = (stride == 1 and cfg["in_channels"] == cfg["out_channels"])

    Ho = (H - 1) // stride + 1
    Wo = (W - 1) // stride + 1
    HW = H * W

    args = [x.reshape(N, Cin, HW)]                       # channels-first, lane-dense
    in_specs = [pl.BlockSpec((1, Cin, HW), lambda n: (n, 0, 0))]

    def add_full(arr, dtype):
        arr = jnp.asarray(arr).astype(dtype)
        args.append(arr)
        in_specs.append(pl.BlockSpec(arr.shape, lambda n, _nd=arr.ndim: (0,) * _nd))

    bn_cols = []

    def add_bn(bn, bias=None):
        s, t = bn_fold(bn, bias)
        bn_cols.append(s)
        bn_cols.append(t)

    if has_expand:
        add_full(block_diag(params["expand_w"]).T, mxu_dtype)     # (Mid, Cin)
        add_bn(params["expand_bn"])

    wmd, kmax = pack_mdconv(params["md_w"])                       # (kmax, kmax, Mid)
    mid = int(wmd.shape[-1])
    pad = (kmax - 1) // 2
    add_full(wmd.reshape(kmax * kmax, mid).T, jnp.float32)        # (Mid, kmax*kmax)
    add_bn(params["md_bn"])

    # Per-tap static lane shift + 0/1 boundary mask, precomputed wrapper-side so the
    # kernel's depthwise loop is pure roll+mask+FMA with zero misaligned accesses.
    idx = jnp.arange(HW)
    hh, ww = idx // W, idx % W
    masks, shifts = [], []
    for kh in range(kmax):
        for kw in range(kmax):
            sh, sw = hh + (kh - pad), ww + (kw - pad)
            masks.append((sh >= 0) & (sh < H) & (sw >= 0) & (sw < W))
            shifts.append(int((-((kh - pad) * W + (kw - pad))) % HW))
    add_full(jnp.stack(masks), jnp.float32)                       # (kmax*kmax, HW)

    if stride > 1:
        ho, wo = jnp.arange(Ho), jnp.arange(Wo)
        src = (ho[:, None] * (stride * W) + wo[None, :] * stride).reshape(-1)
        dec = (jnp.arange(HW)[:, None] == src[None, :])
        add_full(dec.sum(axis=1).reshape(1, HW), jnp.float32)     # kept-position lane mask
        add_full(dec, jnp.float32)                                # (HW, Ho*Wo) selection

    if has_se:
        se = params["se"]
        add_full(jnp.asarray(se["reduce_w"]).T, mxu_dtype)        # (red, Mid)
        add_bn(se["reduce_bn"], se["reduce_b"])
        add_full(jnp.asarray(se["expand_w"]).T, mxu_dtype)        # (Mid, red)
        add_bn(se["expand_bn"], se["expand_b"])

    add_full(block_diag(params["project_w"]).T, mxu_dtype)        # (Cout, Mid)
    add_bn(params["project_bn"])

    # Pack all BN scale/shift (+ folded SE biases) columns into one array.
    cmax = max(int(v.shape[0]) for v in bn_cols)
    bnp = jnp.zeros((cmax, len(bn_cols)), jnp.float32)
    for i, v in enumerate(bn_cols):
        bnp = bnp.at[: int(v.shape[0]), i].set(v.astype(jnp.float32))
    add_full(bnp, jnp.float32)

    kernel = functools.partial(
        _mixblock_kernel, act=act, stride=stride, shifts=tuple(shifts),
        Ho=Ho, Wo=Wo, has_expand=has_expand, has_se=has_se, has_res=has_res,
        mxu_dtype=mxu_dtype)

    out_flat = pl.pallas_call(
        kernel,
        out_shape=jax.ShapeDtypeStruct((N, Cout, Ho * Wo), x.dtype),
        grid=(N,),
        in_specs=in_specs,
        out_specs=pl.BlockSpec((1, Cout, Ho * Wo), lambda n: (n, 0, 0)),
        compiler_params=pltpu.CompilerParams(
            dimension_semantics=("parallel",),
            vmem_limit_bytes=_vmem_limit_bytes()),
    )(*args)
    return out_flat.reshape(N, Cout, Ho, Wo)


# ------------------------------------------------------------- pure-JAX reference
def _bn_ref(y, bn):
    return (y - bn["mean"]) / jnp.sqrt(bn["var"] + BN_EPS) * bn["gamma"] + bn["beta"]


def _grouped_pw_ref(x, weights):
    outs, off = [], 0
    for w in weights:
        ci = int(w.shape[0])
        outs.append(jnp.einsum("nhwc,cd->nhwd", x[..., off:off + ci], w,
                               precision=jax.lax.Precision.HIGHEST))
        off += ci
    return jnp.concatenate(outs, axis=-1)


def _mdconv_ref(x, weights, stride):
    outs, off = [], 0
    for w in weights:
        k = int(w.shape[0])
        cg = int(w.shape[-1])
        p = (k - 1) // 2
        xg = x[..., off:off + cg]
        rhs = w.reshape(k, k, 1, cg)
        outs.append(jax.lax.conv_general_dilated(
            xg, rhs, window_strides=(stride, stride), padding=((p, p), (p, p)),
            dimension_numbers=("NHWC", "HWIO", "NHWC"),
            feature_group_count=cg, precision=jax.lax.Precision.HIGHEST))
        off += cg
    return jnp.concatenate(outs, axis=-1)


def mix_block_reference(x, params, cfg):
    act = "swish" if cfg["swish"] else "relu"
    out = x
    if cfg["expand_ratio"] != 1:
        out = _apply_act(_bn_ref(_grouped_pw_ref(out, params["expand_w"]),
                                 params["expand_bn"]), act)
    out = _apply_act(_bn_ref(_mdconv_ref(out, params["md_w"], cfg["stride"]),
                             params["md_bn"]), act)
    if params["se"] is not None:
        se = params["se"]
        pooled = jnp.mean(out, axis=(1, 2), keepdims=True)
        r = jnp.einsum("nhwc,cd->nhwd", pooled, se["reduce_w"],
                       precision=jax.lax.Precision.HIGHEST) + se["reduce_b"]
        r = _apply_act(_bn_ref(r, se["reduce_bn"]), act)
        e = jnp.einsum("nhwc,cd->nhwd", r, se["expand_w"],
                       precision=jax.lax.Precision.HIGHEST) + se["expand_b"]
        e = _bn_ref(e, se["expand_bn"])
        out = jax.nn.sigmoid(e) * out
    out = _bn_ref(_grouped_pw_ref(out, params["project_w"]), params["project_bn"])
    if cfg["stride"] == 1 and cfg["in_channels"] == cfg["out_channels"]:
        out = out + x
    return out


# --------------------------------------------------------------------------- params
def init_bn(key, c):
    k1, k2, k3, k4 = jax.random.split(key, 4)
    return dict(
        gamma=jax.random.uniform(k1, (c,), jnp.float32, 0.8, 1.2),
        beta=jax.random.normal(k2, (c,), jnp.float32) * 0.1,
        mean=jax.random.normal(k3, (c,), jnp.float32) * 0.1,
        var=jax.random.uniform(k4, (c,), jnp.float32, 0.5, 1.5),
    )


def init_params(key, cfg):
    cin, cout, e = cfg["in_channels"], cfg["out_channels"], cfg["expand_ratio"]
    mid = cin * e if e != 1 else cin
    keys = iter(jax.random.split(key, 64))
    p = {}
    if e != 1:
        in_sp = split_channels(cin, cfg["expand_ksize"])
        out_sp = split_channels(mid, cfg["expand_ksize"])
        p["expand_w"] = [jax.random.normal(next(keys), (ci, co), jnp.float32) * 0.1
                         for ci, co in zip(in_sp, out_sp)]
        p["expand_bn"] = init_bn(next(keys), mid)
    md_sp = split_channels(mid, cfg["n_chunks"])
    p["md_w"] = []
    for i, cg in enumerate(md_sp):
        k = 3 + 2 * i
        p["md_w"].append(jax.random.normal(next(keys), (k, k, cg), jnp.float32) * 0.1)
    p["md_bn"] = init_bn(next(keys), mid)
    se_ratio = cfg["se_ratio"]
    has_se = se_ratio is not None and 0 < se_ratio <= 1
    if has_se:
        red = max(1, int(cin * se_ratio))
        p["se"] = dict(
            reduce_w=jax.random.normal(next(keys), (mid, red), jnp.float32) * 0.1,
            reduce_b=jax.random.normal(next(keys), (red,), jnp.float32) * 0.1,
            reduce_bn=init_bn(next(keys), red),
            expand_w=jax.random.normal(next(keys), (red, mid), jnp.float32) * 0.1,
            expand_b=jax.random.normal(next(keys), (mid,), jnp.float32) * 0.1,
            expand_bn=init_bn(next(keys), mid),
        )
    else:
        p["se"] = None
    in_sp = split_channels(mid, cfg["project_ksize"])
    out_sp = split_channels(cout, cfg["project_ksize"])
    p["project_w"] = [jax.random.normal(next(keys), (ci, co), jnp.float32) * 0.1
                      for ci, co in zip(in_sp, out_sp)]
    p["project_bn"] = init_bn(next(keys), cout)
    return p


# ----------------------------------------------------------------------------- main
if __name__ == "__main__":
    key = jax.random.PRNGKey(0)

    cfgs = [
        # stride-1 block: expansion, SE, swish, 2-group project, residual
        dict(in_channels=16, out_channels=16, n_chunks=2, stride=1,
             expand_ratio=2, se_ratio=0.25, swish=True,
             expand_ksize=1, project_ksize=2),
        # stride-2 downsampling block: no expansion, ReLU, no residual
        dict(in_channels=16, out_channels=24, n_chunks=2, stride=2,
             expand_ratio=1, se_ratio=0.25, swish=False,
             expand_ksize=1, project_ksize=1),
    ]

    for cfg in cfgs:
        key, kx, kp = jax.random.split(key, 3)
        # NCHW input (PyTorch layout): (N, C, H, W)
        x = jax.random.normal(kx, (2, cfg["in_channels"], 16, 16), jnp.float32)
        params = init_params(kp, cfg)

        fwd = jax.jit(functools.partial(mix_block_forward, cfg=cfg))
        out = jax.block_until_ready(fwd(x, params))
        Ho = (16 - 1) // cfg["stride"] + 1
        assert out.shape == (2, cfg["out_channels"], Ho, Ho), out.shape
        assert bool(jnp.all(jnp.isfinite(out)))

        x_nhwc = jnp.transpose(x, (0, 2, 3, 1))
        ref = jnp.transpose(mix_block_reference(x_nhwc, params, cfg), (0, 3, 1, 2))
        err = float(jnp.max(jnp.abs(out - ref)))
        assert err < 5e-3, f"f32 max abs error vs reference: {err}"

    # bf16-MXU-operand variant (v6e/v7x fast path): f32 accumulation + f32 epilogue,
    # checked loosely against the f32 reference (operand rounding only).
    cfg = cfgs[0]
    key, kx, kp = jax.random.split(key, 3)
    x = jax.random.normal(kx, (2, cfg["in_channels"], 16, 16), jnp.float32)
    params = init_params(kp, cfg)
    fwd_bf16 = jax.jit(functools.partial(mix_block_forward, cfg=cfg,
                                         mxu_dtype=jnp.bfloat16))
    out_bf16 = jax.block_until_ready(fwd_bf16(x, params))
    assert out_bf16.shape == (2, cfg["out_channels"], 16, 16)
    assert bool(jnp.all(jnp.isfinite(out_bf16)))
    x_nhwc = jnp.transpose(x, (0, 2, 3, 1))
    ref = jnp.transpose(mix_block_reference(x_nhwc, params, cfg), (0, 3, 1, 2))
    assert float(jnp.max(jnp.abs(out_bf16 - ref))) < 0.5

    print("KERNEL_OK")
</pallas_src>

<mosaic_0001>
module attributes {stable_mosaic.version = 11 : i64} {
  func.func @_mixblock_kernel(%arg0: i32, %arg1: memref<1x16x256xf32, #tpu.memory_space<vmem>>, %arg2: memref<32x16xf32, #tpu.memory_space<vmem>>, %arg3: memref<32x25xf32, #tpu.memory_space<vmem>>, %arg4: memref<25x256xf32, #tpu.memory_space<vmem>>, %arg5: memref<4x32xf32, #tpu.memory_space<vmem>>, %arg6: memref<32x4xf32, #tpu.memory_space<vmem>>, %arg7: memref<16x32xf32, #tpu.memory_space<vmem>>, %arg8: memref<32x10xf32, #tpu.memory_space<vmem>>, %arg9: memref<1x16x256xf32, #tpu.memory_space<vmem>>) attributes {dimension_semantics = [#tpu.dimension_semantics<parallel>], iteration_bounds = array<i64: 2>, scalar_prefetch = 0 : i64, scratch_operands = 0 : i64, tpu.core_type = #tpu.core_type<tc>, window_params = [{transform_indices = @transform_0, window_bounds = array<i64: 1, 16, 256>}, {pipeline_mode = #tpu.pipeline_mode<synchronous>, transform_indices = @transform_1, window_bounds = array<i64: 32, 16>}, {pipeline_mode = #tpu.pipeline_mode<synchronous>, transform_indices = @transform_2, window_bounds = array<i64: 32, 25>}, {pipeline_mode = #tpu.pipeline_mode<synchronous>, transform_indices = @transform_3, window_bounds = array<i64: 25, 256>}, {pipeline_mode = #tpu.pipeline_mode<synchronous>, transform_indices = @transform_4, window_bounds = array<i64: 4, 32>}, {pipeline_mode = #tpu.pipeline_mode<synchronous>, transform_indices = @transform_5, window_bounds = array<i64: 32, 4>}, {pipeline_mode = #tpu.pipeline_mode<synchronous>, transform_indices = @transform_6, window_bounds = array<i64: 16, 32>}, {pipeline_mode = #tpu.pipeline_mode<synchronous>, transform_indices = @transform_7, window_bounds = array<i64: 32, 10>}, {transform_indices = @transform_8, window_bounds = array<i64: 1, 16, 256>}]} {
    %c0 = arith.constant 0 : index
    %c0_0 = arith.constant 0 : index
    %c0_1 = arith.constant 0 : index
    %0 = vector.load %arg1[%c0, %c0_0, %c0_1] : memref<1x16x256xf32, #tpu.memory_space<vmem>>, vector<1x16x256xf32>
    %1 = vector.shape_cast %0 : vector<1x16x256xf32> to vector<16x256xf32>
    %c0_2 = arith.constant 0 : index
    %c0_3 = arith.constant 0 : index
    %2 = vector.load %arg8[%c0_2, %c0_3] : memref<32x10xf32, #tpu.memory_space<vmem>>, vector<32x1xf32>
    %c0_4 = arith.constant 0 : index
    %c1 = arith.constant 1 : index
    %3 = vector.load %arg8[%c0_4, %c1] : memref<32x10xf32, #tpu.memory_space<vmem>>, vector<32x1xf32>
    %c0_5 = arith.constant 0 : index
    %c0_6 = arith.constant 0 : index
    %4 = vector.load %arg2[%c0_5, %c0_6] : memref<32x16xf32, #tpu.memory_space<vmem>>, vector<32x16xf32>
    %cst = arith.constant dense<0.000000e+00> : vector<32x256xf32>
    %5 = tpu.matmul %4, %1, %cst {dimension_numbers = #tpu.dot_dimension_numbers<[1], [0], [0], [1], [0, 0, 1, 1], [], []>} : vector<32x16xf32>, vector<16x256xf32>, vector<32x256xf32> -> vector<32x256xf32>
    %6 = vector.broadcast %2 : vector<32x1xf32> to vector<32x256xf32>
    %7 = arith.mulf %5, %6 : vector<32x256xf32>
    %8 = vector.broadcast %3 : vector<32x1xf32> to vector<32x256xf32>
    %9 = arith.addf %7, %8 : vector<32x256xf32>
    %10 = arith.negf %9 : vector<32x256xf32>
    %11 = math.exp %10 : vector<32x256xf32>
    %cst_7 = arith.constant 1.000000e+00 : f32
    %12 = vector.broadcast %cst_7 : f32 to vector<32x256xf32>
    %13 = arith.addf %12, %11 : vector<32x256xf32>
    %14 = arith.divf %12, %13 : vector<32x256xf32>
    %15 = arith.mulf %9, %14 : vector<32x256xf32>
    %c0_8 = arith.constant 0 : index
    %c2 = arith.constant 2 : index
    %16 = vector.load %arg8[%c0_8, %c2] : memref<32x10xf32, #tpu.memory_space<vmem>>, vector<32x1xf32>
    %c0_9 = arith.constant 0 : index
    %c3 = arith.constant 3 : index
    %17 = vector.load %arg8[%c0_9, %c3] : memref<32x10xf32, #tpu.memory_space<vmem>>, vector<32x1xf32>
    %cst_10 = arith.constant 0.000000e+00 : f32
    %18 = vector.broadcast %cst_10 : f32 to vector<32x256xf32>
    %c34_i32 = arith.constant 34 : i32
    %19 = tpu.dynamic_rotate %15 by %c34_i32 dim 1 : vector<32x256xf32>, i32 -> vector<32x256xf32>
    %c0_11 = arith.constant 0 : index
    %c0_12 = arith.constant 0 : index
    %20 = vector.load %arg4[%c0_11, %c0_12] : memref<25x256xf32, #tpu.memory_space<vmem>>, vector<1x256xf32>
    %21 = vector.broadcast %20 : vector<1x256xf32> to vector<32x256xf32>
    %22 = arith.mulf %19, %21 : vector<32x256xf32>
    %c0_13 = arith.constant 0 : index
    %c0_14 = arith.constant 0 : index
    %23 = vector.load %arg3[%c0_13, %c0_14] : memref<32x25xf32, #tpu.memory_space<vmem>>, vector<32x1xf32>
    %24 = vector.broadcast %23 : vector<32x1xf32> to vector<32x256xf32>
    %25 = arith.mulf %22, %24 : vector<32x256xf32>
    %26 = arith.addf %18, %25 : vector<32x256xf32>
    %c33_i32 = arith.constant 33 : i32
    %27 = tpu.dynamic_rotate %15 by %c33_i32 dim 1 : vector<32x256xf32>, i32 -> vector<32x256xf32>
    %c1_15 = arith.constant 1 : index
    %c0_16 = arith.constant 0 : index
    %28 = vector.load %arg4[%c1_15, %c0_16] : memref<25x256xf32, #tpu.memory_space<vmem>>, vector<1x256xf32>
    %29 = vector.broadcast %28 : vector<1x256xf32> to vector<32x256xf32>
    %30 = arith.mulf %27, %29 : vector<32x256xf32>
    %c0_17 = arith.constant 0 : index
    %c1_18 = arith.constant 1 : index
    %31 = vector.load %arg3[%c0_17, %c1_18] : memref<32x25xf32, #tpu.memory_space<vmem>>, vector<32x1xf32>
    %32 = vector.broadcast %31 : vector<32x1xf32> to vector<32x256xf32>
    %33 = arith.mulf %30, %32 : vector<32x256xf32>
    %34 = arith.addf %26, %33 : vector<32x256xf32>
    %c32_i32 = arith.constant 32 : i32
    %35 = tpu.dynamic_rotate %15 by %c32_i32 dim 1 : vector<32x256xf32>, i32 -> vector<32x256xf32>
    %c2_19 = arith.constant 2 : index
    %c0_20 = arith.constant 0 : index
    %36 = vector.load %arg4[%c2_19, %c0_20] : memref<25x256xf32, #tpu.memory_space<vmem>>, vector<1x256xf32>
    %37 = vector.broadcast %36 : vector<1x256xf32> to vector<32x256xf32>
    %38 = arith.mulf %35, %37 : vector<32x256xf32>
    %c0_21 = arith.constant 0 : index
    %c2_22 = arith.constant 2 : index
    %39 = vector.load %arg3[%c0_21, %c2_22] : memref<32x25xf32, #tpu.memory_space<vmem>>, vector<32x1xf32>
    %40 = vector.broadcast %39 : vector<32x1xf32> to vector<32x256xf32>
    %41 = arith.mulf %38, %40 : vector<32x256xf32>
    %42 = arith.addf %34, %41 : vector<32x256xf32>
    %c31_i32 = arith.constant 31 : i32
    %43 = tpu.dynamic_rotate %15 by %c31_i32 dim 1 : vector<32x256xf32>, i32 -> vector<32x256xf32>
    %c3_23 = arith.constant 3 : index
    %c0_24 = arith.constant 0 : index
    %44 = vector.load %arg4[%c3_23, %c0_24] : memref<25x256xf32, #tpu.memory_space<vmem>>, vector<1x256xf32>
    %45 = vector.broadcast %44 : vector<1x256xf32> to vector<32x256xf32>
    %46 = arith.mulf %43, %45 : vector<32x256xf32>
    %c0_25 = arith.constant 0 : index
    %c3_26 = arith.constant 3 : index
    %47 = vector.load %arg3[%c0_25, %c3_26] : memref<32x25xf32, #tpu.memory_space<vmem>>, vector<32x1xf32>
    %48 = vector.broadcast %47 : vector<32x1xf32> to vector<32x256xf32>
    %49 = arith.mulf %46, %48 : vector<32x256xf32>
    %50 = arith.addf %42, %49 : vector<32x256xf32>
    %c30_i32 = arith.constant 30 : i32
    %51 = tpu.dynamic_rotate %15 by %c30_i32 dim 1 : vector<32x256xf32>, i32 -> vector<32x256xf32>
    %c4 = arith.constant 4 : index
    %c0_27 = arith.constant 0 : index
    %52 = vector.load %arg4[%c4, %c0_27] : memref<25x256xf32, #tpu.memory_space<vmem>>, vector<1x256xf32>
    %53 = vector.broadcast %52 : vector<1x256xf32> to vector<32x256xf32>
    %54 = arith.mulf %51, %53 : vector<32x256xf32>
    %c0_28 = arith.constant 0 : index
    %c4_29 = arith.constant 4 : index
    %55 = vector.load %arg3[%c0_28, %c4_29] : memref<32x25xf32, #tpu.memory_space<vmem>>, vector<32x1xf32>
    %56 = vector.broadcast %55 : vector<32x1xf32> to vector<32x256xf32>
    %57 = arith.mulf %54, %56 : vector<32x256xf32>
    %58 = arith.addf %50, %57 : vector<32x256xf32>
    %c18_i32 = arith.constant 18 : i32
    %59 = tpu.dynamic_rotate %15 by %c18_i32 dim 1 : vector<32x256xf32>, i32 -> vector<32x256xf32>
    %c5 = arith.constant 5 : index
    %c0_30 = arith.constant 0 : index
    %60 = vector.load %arg4[%c5, %c0_30] : memref<25x256xf32, #tpu.memory_space<vmem>>, vector<1x256xf32>
    %61 = vector.broadcast %60 : vector<1x256xf32> to vector<32x256xf32>
    %62 = arith.mulf %59, %61 : vector<32x256xf32>
    %c0_31 = arith.constant 0 : index
    %c5_32 = arith.constant 5 : index
    %63 = vector.load %arg3[%c0_31, %c5_32] : memref<32x25xf32, #tpu.memory_space<vmem>>, vector<32x1xf32>
    %64 = vector.broadcast %63 : vector<32x1xf32> to vector<32x256xf32>
    %65 = arith.mulf %62, %64 : vector<32x256xf32>
    %66 = arith.addf %58, %65 : vector<32x256xf32>
    %c17_i32 = arith.constant 17 : i32
    %67 = tpu.dynamic_rotate %15 by %c17_i32 dim 1 : vector<32x256xf32>, i32 -> vector<32x256xf32>
    %c6 = arith.constant 6 : index
    %c0_33 = arith.constant 0 : index
    %68 = vector.load %arg4[%c6, %c0_33] : memref<25x256xf32, #tpu.memory_space<vmem>>, vector<1x256xf32>
    %69 = vector.broadcast %68 : vector<1x256xf32> to vector<32x256xf32>
    %70 = arith.mulf %67, %69 : vector<32x256xf32>
    %c0_34 = arith.constant 0 : index
    %c6_35 = arith.constant 6 : index
    %71 = vector.load %arg3[%c0_34, %c6_35] : memref<32x25xf32, #tpu.memory_space<vmem>>, vector<32x1xf32>
    %72 = vector.broadcast %71 : vector<32x1xf32> to vector<32x256xf32>
    %73 = arith.mulf %70, %72 : vector<32x256xf32>
    %74 = arith.addf %66, %73 : vector<32x256xf32>
    %c16_i32 = arith.constant 16 : i32
    %75 = tpu.dynamic_rotate %15 by %c16_i32 dim 1 : vector<32x256xf32>, i32 -> vector<32x256xf32>
    %c7 = arith.constant 7 : index
    %c0_36 = arith.constant 0 : index
    %76 = vector.load %arg4[%c7, %c0_36] : memref<25x256xf32, #tpu.memory_space<vmem>>, vector<1x256xf32>
    %77 = vector.broadcast %76 : vector<1x256xf32> to vector<32x256xf32>
    %78 = arith.mulf %75, %77 : vector<32x256xf32>
    %c0_37 = arith.constant 0 : index
    %c7_38 = arith.constant 7 : index
    %79 = vector.load %arg3[%c0_37, %c7_38] : memref<32x25xf32, #tpu.memory_space<vmem>>, vector<32x1xf32>
    %80 = vector.broadcast %79 : vector<32x1xf32> to vector<32x256xf32>
    %81 = arith.mulf %78, %80 : vector<32x256xf32>
    %82 = arith.addf %74, %81 : vector<32x256xf32>
    %c15_i32 = arith.constant 15 : i32
    %83 = tpu.dynamic_rotate %15 by %c15_i32 dim 1 : vector<32x256xf32>, i32 -> vector<32x256xf32>
    %c8 = arith.constant 8 : index
    %c0_39 = arith.constant 0 : index
    %84 = vector.load %arg4[%c8, %c0_39] : memref<25x256xf32, #tpu.memory_space<vmem>>, vector<1x256xf32>
    %85 = vector.broadcast %84 : vector<1x256xf32> to vector<32x256xf32>
    %86 = arith.mulf %83, %85 : vector<32x256xf32>
    %c0_40 = arith.constant 0 : index
    %c8_41 = arith.constant 8 : index
    %87 = vector.load %arg3[%c0_40, %c8_41] : memref<32x25xf32, #tpu.memory_space<vmem>>, vector<32x1xf32>
    %88 = vector.broadcast %87 : vector<32x1xf32> to vector<32x256xf32>
    %89 = arith.mulf %86, %88 : vector<32x256xf32>
    %90 = arith.addf %82, %89 : vector<32x256xf32>
    %c14_i32 = arith.constant 14 : i32
    %91 = tpu.dynamic_rotate %15 by %c14_i32 dim 1 : vector<32x256xf32>, i32 -> vector<32x256xf32>
    %c9 = arith.constant 9 : index
    %c0_42 = arith.constant 0 : index
    %92 = vector.load %arg4[%c9, %c0_42] : memref<25x256xf32, #tpu.memory_space<vmem>>, vector<1x256xf32>
    %93 = vector.broadcast %92 : vector<1x256xf32> to vector<32x256xf32>
    %94 = arith.mulf %91, %93 : vector<32x256xf32>
    %c0_43 = arith.constant 0 : index
    %c9_44 = arith.constant 9 : index
    %95 = vector.load %arg3[%c0_43, %c9_44] : memref<32x25xf32, #tpu.memory_space<vmem>>, vector<32x1xf32>
    %96 = vector.broadcast %95 : vector<32x1xf32> to vector<32x256xf32>
    %97 = arith.mulf %94, %96 : vector<32x256xf32>
    %98 = arith.addf %90, %97 : vector<32x256xf32>
    %c2_i32 = arith.constant 2 : i32
    %99 = tpu.dynamic_rotate %15 by %c2_i32 dim 1 : vector<32x256xf32>, i32 -> vector<32x256xf32>
    %c10 = arith.constant 10 : index
    %c0_45 = arith.constant 0 : index
    %100 = vector.load %arg4[%c10, %c0_45] : memref<25x256xf32, #tpu.memory_space<vmem>>, vector<1x256xf32>
    %101 = vector.broadcast %100 : vector<1x256xf32> to vector<32x256xf32>
    %102 = arith.mulf %99, %101 : vector<32x256xf32>
    %c0_46 = arith.constant 0 : index
    %c10_47 = arith.constant 10 : index
    %103 = vector.load %arg3[%c0_46, %c10_47] : memref<32x25xf32, #tpu.memory_space<vmem>>, vector<32x1xf32>
    %104 = vector.broadcast %103 : vector<32x1xf32> to vector<32x256xf32>
    %105 = arith.mulf %102, %104 : vector<32x256xf32>
    %106 = arith.addf %98, %105 : vector<32x256xf32>
    %c1_i32 = arith.constant 1 : i32
    %107 = tpu.dynamic_rotate %15 by %c1_i32 dim 1 : vector<32x256xf32>, i32 -> vector<32x256xf32>
    %c11 = arith.constant 11 : index
    %c0_48 = arith.constant 0 : index
    %108 = vector.load %arg4[%c11, %c0_48] : memref<25x256xf32, #tpu.memory_space<vmem>>, vector<1x256xf32>
    %109 = vector.broadcast %108 : vector<1x256xf32> to vector<32x256xf32>
    %110 = arith.mulf %107, %109 : vector<32x256xf32>
    %c0_49 = arith.constant 0 : index
    %c11_50 = arith.constant 11 : index
    %111 = vector.load %arg3[%c0_49, %c11_50] : memref<32x25xf32, #tpu.memory_space<vmem>>, vector<32x1xf32>
    %112 = vector.broadcast %111 : vector<32x1xf32> to vector<32x256xf32>
    %113 = arith.mulf %110, %112 : vector<32x256xf32>
    %114 = arith.addf %106, %113 : vector<32x256xf32>
    %c12 = arith.constant 12 : index
    %c0_51 = arith.constant 0 : index
    %115 = vector.load %arg4[%c12, %c0_51] : memref<25x256xf32, #tpu.memory_space<vmem>>, vector<1x256xf32>
    %116 = vector.broadcast %115 : vector<1x256xf32> to vector<32x256xf32>
    %117 = arith.mulf %15, %116 : vector<32x256xf32>
    %c0_52 = arith.constant 0 : index
    %c12_53 = arith.constant 12 : index
    %118 = vector.load %arg3[%c0_52, %c12_53] : memref<32x25xf32, #tpu.memory_space<vmem>>, vector<32x1xf32>
    %119 = vector.broadcast %118 : vector<32x1xf32> to vector<32x256xf32>
    %120 = arith.mulf %117, %119 : vector<32x256xf32>
    %121 = arith.addf %114, %120 : vector<32x256xf32>
    %c255_i32 = arith.constant 255 : i32
    %122 = tpu.dynamic_rotate %15 by %c255_i32 dim 1 : vector<32x256xf32>, i32 -> vector<32x256xf32>
    %c13 = arith.constant 13 : index
    %c0_54 = arith.constant 0 : index
    %123 = vector.load %arg4[%c13, %c0_54] : memref<25x256xf32, #tpu.memory_space<vmem>>, vector<1x256xf32>
    %124 = vector.broadcast %123 : vector<1x256xf32> to vector<32x256xf32>
    %125 = arith.mulf %122, %124 : vector<32x256xf32>
    %c0_55 = arith.constant 0 : index
    %c13_56 = arith.constant 13 : index
    %126 = vector.load %arg3[%c0_55, %c13_56] : memref<32x25xf32, #tpu.memory_space<vmem>>, vector<32x1xf32>
    %127 = vector.broadcast %126 : vector<32x1xf32> to vector<32x256xf32>
    %128 = arith.mulf %125, %127 : vector<32x256xf32>
    %129 = arith.addf %121, %128 : vector<32x256xf32>
    %c254_i32 = arith.constant 254 : i32
    %130 = tpu.dynamic_rotate %15 by %c254_i32 dim 1 : vector<32x256xf32>, i32 -> vector<32x256xf32>
    %c14 = arith.constant 14 : index
    %c0_57 = arith.constant 0 : index
    %131 = vector.load %arg4[%c14, %c0_57] : memref<25x256xf32, #tpu.memory_space<vmem>>, vector<1x256xf32>
    %132 = vector.broadcast %131 : vector<1x256xf32> to vector<32x256xf32>
    %133 = arith.mulf %130, %132 : vector<32x256xf32>
    %c0_58 = arith.constant 0 : index
    %c14_59 = arith.constant 14 : index
    %134 = vector.load %arg3[%c0_58, %c14_59] : memref<32x25xf32, #tpu.memory_space<vmem>>, vector<32x1xf32>
    %135 = vector.broadcast %134 : vector<32x1xf32> to vector<32x256xf32>
    %136 = arith.mulf %133, %135 : vector<32x256xf32>
    %137 = arith.addf %129, %136 : vector<32x256xf32>
    %c242_i32 = arith.constant 242 : i32
    %138 = tpu.dynamic_rotate %15 by %c242_i32 dim 1 : vector<32x256xf32>, i32 -> vector<32x256xf32>
    %c15 = arith.constant 15 : index
    %c0_60 = arith.constant 0 : index
    %139 = vector.load %arg4[%c15, %c0_60] : memref<25x256xf32, #tpu.memory_space<vmem>>, vector<1x256xf32>
    %140 = vector.broadcast %139 : vector<1x256xf32> to vector<32x256xf32>
    %141 = arith.mulf %138, %140 : vector<32x256xf32>
    %c0_61 = arith.constant 0 : index
    %c15_62 = arith.constant 15 : index
    %142 = vector.load %arg3[%c0_61, %c15_62] : memref<32x25xf32, #tpu.memory_space<vmem>>, vector<32x1xf32>
    %143 = vector.broadcast %142 : vector<32x1xf32> to vector<32x256xf32>
    %144 = arith.mulf %141, %143 : vector<32x256xf32>
    %145 = arith.addf %137, %144 : vector<32x256xf32>
    %c241_i32 = arith.constant 241 : i32
    %146 = tpu.dynamic_rotate %15 by %c241_i32 dim 1 : vector<32x256xf32>, i32 -> vector<32x256xf32>
    %c16 = arith.constant 16 : index
    %c0_63 = arith.constant 0 : index
    %147 = vector.load %arg4[%c16, %c0_63] : memref<25x256xf32, #tpu.memory_space<vmem>>, vector<1x256xf32>
    %148 = vector.broadcast %147 : vector<1x256xf32> to vector<32x256xf32>
    %149 = arith.mulf %146, %148 : vector<32x256xf32>
    %c0_64 = arith.constant 0 : index
    %c16_65 = arith.constant 16 : index
    %150 = vector.load %arg3[%c0_64, %c16_65] : memref<32x25xf32, #tpu.memory_space<vmem>>, vector<32x1xf32>
    %151 = vector.broadcast %150 : vector<32x1xf32> to vector<32x256xf32>
    %152 = arith.mulf %149, %151 : vector<32x256xf32>
    %153 = arith.addf %145, %152 : vector<32x256xf32>
    %c240_i32 = arith.constant 240 : i32
    %154 = tpu.dynamic_rotate %15 by %c240_i32 dim 1 : vector<32x256xf32>, i32 -> vector<32x256xf32>
    %c17 = arith.constant 17 : index
    %c0_66 = arith.constant 0 : index
    %155 = vector.load %arg4[%c17, %c0_66] : memref<25x256xf32, #tpu.memory_space<vmem>>, vector<1x256xf32>
    %156 = vector.broadcast %155 : vector<1x256xf32> to vector<32x256xf32>
    %157 = arith.mulf %154, %156 : vector<32x256xf32>
    %c0_67 = arith.constant 0 : index
    %c17_68 = arith.constant 17 : index
    %158 = vector.load %arg3[%c0_67, %c17_68] : memref<32x25xf32, #tpu.memory_space<vmem>>, vector<32x1xf32>
    %159 = vector.broadcast %158 : vector<32x1xf32> to vector<32x256xf32>
    %160 = arith.mulf %157, %159 : vector<32x256xf32>
    %161 = arith.addf %153, %160 : vector<32x256xf32>
    %c239_i32 = arith.constant 239 : i32
    %162 = tpu.dynamic_rotate %15 by %c239_i32 dim 1 : vector<32x256xf32>, i32 -> vector<32x256xf32>
    %c18 = arith.constant 18 : index
    %c0_69 = arith.constant 0 : index
    %163 = vector.load %arg4[%c18, %c0_69] : memref<25x256xf32, #tpu.memory_space<vmem>>, vector<1x256xf32>
    %164 = vector.broadcast %163 : vector<1x256xf32> to vector<32x256xf32>
    %165 = arith.mulf %162, %164 : vector<32x256xf32>
    %c0_70 = arith.constant 0 : index
    %c18_71 = arith.constant 18 : index
    %166 = vector.load %arg3[%c0_70, %c18_71] : memref<32x25xf32, #tpu.memory_space<vmem>>, vector<32x1xf32>
    %167 = vector.broadcast %166 : vector<32x1xf32> to vector<32x256xf32>
    %168 = arith.mulf %165, %167 : vector<32x256xf32>
    %169 = arith.addf %161, %168 : vector<32x256xf32>
    %c238_i32 = arith.constant 238 : i32
    %170 = tpu.dynamic_rotate %15 by %c238_i32 dim 1 : vector<32x256xf32>, i32 -> vector<32x256xf32>
    %c19 = arith.constant 19 : index
    %c0_72 = arith.constant 0 : index
    %171 = vector.load %arg4[%c19, %c0_72] : memref<25x256xf32, #tpu.memory_space<vmem>>, vector<1x256xf32>
    %172 = vector.broadcast %171 : vector<1x256xf32> to vector<32x256xf32>
    %173 = arith.mulf %170, %172 : vector<32x256xf32>
    %c0_73 = arith.constant 0 : index
    %c19_74 = arith.constant 19 : index
    %174 = vector.load %arg3[%c0_73, %c19_74] : memref<32x25xf32, #tpu.memory_space<vmem>>, vector<32x1xf32>
    %175 = vector.broadcast %174 : vector<32x1xf32> to vector<32x256xf32>
    %176 = arith.mulf %173, %175 : vector<32x256xf32>
    %177 = arith.addf %169, %176 : vector<32x256xf32>
    %c226_i32 = arith.constant 226 : i32
    %178 = tpu.dynamic_rotate %15 by %c226_i32 dim 1 : vector<32x256xf32>, i32 -> vector<32x256xf32>
    %c20 = arith.constant 20 : index
    %c0_75 = arith.constant 0 : index
    %179 = vector.load %arg4[%c20, %c0_75] : memref<25x256xf32, #tpu.memory_space<vmem>>, vector<1x256xf32>
    %180 = vector.broadcast %179 : vector<1x256xf32> to vector<32x256xf32>
    %181 = arith.mulf %178, %180 : vector<32x256xf32>
    %c0_76 = arith.constant 0 : index
    %c20_77 = arith.constant 20 : index
    %182 = vector.load %arg3[%c0_76, %c20_77] : memref<32x25xf32, #tpu.memory_space<vmem>>, vector<32x1xf32>
    %183 = vector.broadcast %182 : vector<32x1xf32> to vector<32x256xf32>
    %184 = arith.mulf %181, %183 : vector<32x256xf32>
    %185 = arith.addf %177, %184 : vector<32x256xf32>
    %c225_i32 = arith.constant 225 : i32
    %186 = tpu.dynamic_rotate %15 by %c225_i32 dim 1 : vector<32x256xf32>, i32 -> vector<32x256xf32>
    %c21 = arith.constant 21 : index
    %c0_78 = arith.constant 0 : index
    %187 = vector.load %arg4[%c21, %c0_78] : memref<25x256xf32, #tpu.memory_space<vmem>>, vector<1x256xf32>
    %188 = vector.broadcast %187 : vector<1x256xf32> to vector<32x256xf32>
    %189 = arith.mulf %186, %188 : vector<32x256xf32>
    %c0_79 = arith.constant 0 : index
    %c21_80 = arith.constant 21 : index
    %190 = vector.load %arg3[%c0_79, %c21_80] : memref<32x25xf32, #tpu.memory_space<vmem>>, vector<32x1xf32>
    %191 = vector.broadcast %190 : vector<32x1xf32> to vector<32x256xf32>
    %192 = arith.mulf %189, %191 : vector<32x256xf32>
    %193 = arith.addf %185, %192 : vector<32x256xf32>
    %c224_i32 = arith.constant 224 : i32
    %194 = tpu.dynamic_rotate %15 by %c224_i32 dim 1 : vector<32x256xf32>, i32 -> vector<32x256xf32>
    %c22 = arith.constant 22 : index
    %c0_81 = arith.constant 0 : index
    %195 = vector.load %arg4[%c22, %c0_81] : memref<25x256xf32, #tpu.memory_space<vmem>>, vector<1x256xf32>
    %196 = vector.broadcast %195 : vector<1x256xf32> to vector<32x256xf32>
    %197 = arith.mulf %194, %196 : vector<32x256xf32>
    %c0_82 = arith.constant 0 : index
    %c22_83 = arith.constant 22 : index
    %198 = vector.load %arg3[%c0_82, %c22_83] : memref<32x25xf32, #tpu.memory_space<vmem>>, vector<32x1xf32>
    %199 = vector.broadcast %198 : vector<32x1xf32> to vector<32x256xf32>
    %200 = arith.mulf %197, %199 : vector<32x256xf32>
    %201 = arith.addf %193, %200 : vector<32x256xf32>
    %c223_i32 = arith.constant 223 : i32
    %202 = tpu.dynamic_rotate %15 by %c223_i32 dim 1 : vector<32x256xf32>, i32 -> vector<32x256xf32>
    %c23 = arith.constant 23 : index
    %c0_84 = arith.constant 0 : index
    %203 = vector.load %arg4[%c23, %c0_84] : memref<25x256xf32, #tpu.memory_space<vmem>>, vector<1x256xf32>
    %204 = vector.broadcast %203 : vector<1x256xf32> to vector<32x256xf32>
    %205 = arith.mulf %202, %204 : vector<32x256xf32>
    %c0_85 = arith.constant 0 : index
    %c23_86 = arith.constant 23 : index
    %206 = vector.load %arg3[%c0_85, %c23_86] : memref<32x25xf32, #tpu.memory_space<vmem>>, vector<32x1xf32>
    %207 = vector.broadcast %206 : vector<32x1xf32> to vector<32x256xf32>
    %208 = arith.mulf %205, %207 : vector<32x256xf32>
    %209 = arith.addf %201, %208 : vector<32x256xf32>
    %c222_i32 = arith.constant 222 : i32
    %210 = tpu.dynamic_rotate %15 by %c222_i32 dim 1 : vector<32x256xf32>, i32 -> vector<32x256xf32>
    %c24 = arith.constant 24 : index
    %c0_87 = arith.constant 0 : index
    %211 = vector.load %arg4[%c24, %c0_87] : memref<25x256xf32, #tpu.memory_space<vmem>>, vector<1x256xf32>
    %212 = vector.broadcast %211 : vector<1x256xf32> to vector<32x256xf32>
    %213 = arith.mulf %210, %212 : vector<32x256xf32>
    %c0_88 = arith.constant 0 : index
    %c24_89 = arith.constant 24 : index
    %214 = vector.load %arg3[%c0_88, %c24_89] : memref<32x25xf32, #tpu.memory_space<vmem>>, vector<32x1xf32>
    %215 = vector.broadcast %214 : vector<32x1xf32> to vector<32x256xf32>
    %216 = arith.mulf %213, %215 : vector<32x256xf32>
    %217 = arith.addf %209, %216 : vector<32x256xf32>
    %218 = vector.broadcast %16 : vector<32x1xf32> to vector<32x256xf32>
    %219 = arith.mulf %217, %218 : vector<32x256xf32>
    %220 = vector.broadcast %17 : vector<32x1xf32> to vector<32x256xf32>
    %221 = arith.addf %219, %220 : vector<32x256xf32>
    %222 = arith.negf %221 : vector<32x256xf32>
    %223 = math.exp %222 : vector<32x256xf32>
    %cst_90 = arith.constant 1.000000e+00 : f32
    %224 = vector.broadcast %cst_90 : f32 to vector<32x256xf32>
    %225 = arith.addf %224, %223 : vector<32x256xf32>
    %226 = arith.divf %224, %225 : vector<32x256xf32>
    %227 = arith.mulf %221, %226 : vector<32x256xf32>
    %c0_91 = arith.constant 0 : index
    %c4_92 = arith.constant 4 : index
    %228 = vector.load %arg8[%c0_91, %c4_92] : memref<32x10xf32, #tpu.memory_space<vmem>>, vector<4x1xf32>
    %c0_93 = arith.constant 0 : index
    %c5_94 = arith.constant 5 : index
    %229 = vector.load %arg8[%c0_93, %c5_94] : memref<32x10xf32, #tpu.memory_space<vmem>>, vector<4x1xf32>
    %c0_95 = arith.constant 0 : index
    %c6_96 = arith.constant 6 : index
    %230 = vector.load %arg8[%c0_95, %c6_96] : memref<32x10xf32, #tpu.memory_space<vmem>>, vector<32x1xf32>
    %c0_97 = arith.constant 0 : index
    %c7_98 = arith.constant 7 : index
    %231 = vector.load %arg8[%c0_97, %c7_98] : memref<32x10xf32, #tpu.memory_space<vmem>>, vector<32x1xf32>
    %cst_99 = arith.constant dense<0.000000e+00> : vector<32xf32>
    %232 = vector.multi_reduction <add>, %227, %cst_99 [1] : vector<32x256xf32> to vector<32xf32>
    %233 = vector.shape_cast %232 : vector<32xf32> to vector<32x1xf32>
    %cst_100 = arith.constant 3.906250e-03 : f32
    %234 = vector.broadcast %cst_100 : f32 to vector<32x1xf32>
    %235 = arith.mulf %233, %234 : vector<32x1xf32>
    %c0_101 = arith.constant 0 : index
    %c0_102 = arith.constant 0 : index
    %236 = vector.load %arg5[%c0_101, %c0_102] : memref<4x32xf32, #tpu.memory_space<vmem>>, vector<4x32xf32>
    %cst_103 = arith.constant dense<0.000000e+00> : vector<4x1xf32>
    %237 = tpu.matmul %236, %235, %cst_103 {dimension_numbers = #tpu.dot_dimension_numbers<[1], [0], [0], [1], [0, 0, 1, 1], [], []>} : vector<4x32xf32>, vector<32x1xf32>, vector<4x1xf32> -> vector<4x1xf32>
    %238 = arith.mulf %237, %228 : vector<4x1xf32>
    %239 = arith.addf %238, %229 : vector<4x1xf32>
    %240 = arith.negf %239 : vector<4x1xf32>
    %241 = math.exp %240 : vector<4x1xf32>
    %cst_104 = arith.constant 1.000000e+00 : f32
    %242 = vector.broadcast %cst_104 : f32 to vector<4x1xf32>
    %243 = arith.addf %242, %241 : vector<4x1xf32>
    %244 = arith.divf %242, %243 : vector<4x1xf32>
    %245 = arith.mulf %239, %244 : vector<4x1xf32>
    %c0_105 = arith.constant 0 : index
    %c0_106 = arith.constant 0 : index
    %246 = vector.load %arg6[%c0_105, %c0_106] : memref<32x4xf32, #tpu.memory_space<vmem>>, vector<32x4xf32>
    %cst_107 = arith.constant dense<0.000000e+00> : vector<32x1xf32>
    %247 = tpu.matmul %246, %245, %cst_107 {dimension_numbers = #tpu.dot_dimension_numbers<[1], [0], [0], [1], [0, 0, 1, 1], [], []>} : vector<32x4xf32>, vector<4x1xf32>, vector<32x1xf32> -> vector<32x1xf32>
    %248 = arith.mulf %247, %230 : vector<32x1xf32>
    %249 = arith.addf %248, %231 : vector<32x1xf32>
    %250 = arith.negf %249 : vector<32x1xf32>
    %251 = math.exp %250 : vector<32x1xf32>
    %cst_108 = arith.constant 1.000000e+00 : f32
    %252 = vector.broadcast %cst_108 : f32 to vector<32x1xf32>
    %253 = arith.addf %252, %251 : vector<32x1xf32>
    %254 = arith.divf %252, %253 : vector<32x1xf32>
    %255 = vector.broadcast %254 : vector<32x1xf32> to vector<32x256xf32>
    %256 = arith.mulf %227, %255 : vector<32x256xf32>
    %c0_109 = arith.constant 0 : index
    %c8_110 = arith.constant 8 : index
    %257 = vector.load %arg8[%c0_109, %c8_110] : memref<32x10xf32, #tpu.memory_space<vmem>>, vector<16x1xf32>
    %c0_111 = arith.constant 0 : index
    %c9_112 = arith.constant 9 : index
    %258 = vector.load %arg8[%c0_111, %c9_112] : memref<32x10xf32, #tpu.memory_space<vmem>>, vector<16x1xf32>
    %c0_113 = arith.constant 0 : index
    %c0_114 = arith.constant 0 : index
    %259 = vector.load %arg7[%c0_113, %c0_114] : memref<16x32xf32, #tpu.memory_space<vmem>>, vector<16x32xf32>
    %cst_115 = arith.constant dense<0.000000e+00> : vector<16x256xf32>
    %260 = tpu.matmul %259, %256, %cst_115 {dimension_numbers = #tpu.dot_dimension_numbers<[1], [0], [0], [1], [0, 0, 1, 1], [], []>} : vector<16x32xf32>, vector<32x256xf32>, vector<16x256xf32> -> vector<16x256xf32>
    %261 = vector.broadcast %257 : vector<16x1xf32> to vector<16x256xf32>
    %262 = arith.mulf %260, %261 : vector<16x256xf32>
    %263 = vector.broadcast %258 : vector<16x1xf32> to vector<16x256xf32>
    %264 = arith.addf %262, %263 : vector<16x256xf32>
    %265 = arith.addf %264, %1 : vector<16x256xf32>
    %c0_116 = arith.constant 0 : index
    %c0_117 = arith.constant 0 : index
    %c0_118 = arith.constant 0 : index
    %266 = vector.load %arg9[%c0_116, %c0_117, %c0_118] : memref<1x16x256xf32, #tpu.memory_space<vmem>>, vector<1x16x256xf32>
    %267 = vector.shape_cast %266 : vector<1x16x256xf32> to vector<16x256xf32>
    %268 = vector.shape_cast %265 : vector<16x256xf32> to vector<1x16x256xf32>
    tpu.vector_store %arg9[%c0_116, %c0_117, %c0_118], %268 {strides = array<i32>} : memref<1x16x256xf32, #tpu.memory_space<vmem>>, vector<1x16x256xf32>,
    return
  }
  func.func @transform_0(%arg0: i32) -> (i32, i32, i32) {
    %c0_i32 = arith.constant 0 : i32
    %c0_i32_0 = arith.constant 0 : i32
    %c0_i32_1 = arith.constant 0 : i32
    return %arg0, %c0_i32, %c0_i32_0 : i32, i32, i32
  }
  func.func @transform_1(%arg0: i32) -> (i32, i32) {
    %c0_i32 = arith.constant 0 : i32
    %c0_i32_0 = arith.constant 0 : i32
    %c0_i32_1 = arith.constant 0 : i32
    return %c0_i32, %c0_i32_0 : i32, i32
  }
  func.func @transform_2(%arg0: i32) -> (i32, i32) {
    %c0_i32 = arith.constant 0 : i32
    %c0_i32_0 = arith.constant 0 : i32
    %c0_i32_1 = arith.constant 0 : i32
    return %c0_i32, %c0_i32_0 : i32, i32
  }
  func.func @transform_3(%arg0: i32) -> (i32, i32) {
    %c0_i32 = arith.constant 0 : i32
    %c0_i32_0 = arith.constant 0 : i32
    %c0_i32_1 = arith.constant 0 : i32
    return %c0_i32, %c0_i32_0 : i32, i32
  }
  func.func @transform_4(%arg0: i32) -> (i32, i32) {
    %c0_i32 = arith.constant 0 : i32
    %c0_i32_0 = arith.constant 0 : i32
    %c0_i32_1 = arith.constant 0 : i32
    return %c0_i32, %c0_i32_0 : i32, i32
  }
  func.func @transform_5(%arg0: i32) -> (i32, i32) {
    %c0_i32 = arith.constant 0 : i32
    %c0_i32_0 = arith.constant 0 : i32
    %c0_i32_1 = arith.constant 0 : i32
    return %c0_i32, %c0_i32_0 : i32, i32
  }
  func.func @transform_6(%arg0: i32) -> (i32, i32) {
    %c0_i32 = arith.constant 0 : i32
    %c0_i32_0 = arith.constant 0 : i32
    %c0_i32_1 = arith.constant 0 : i32
    return %c0_i32, %c0_i32_0 : i32, i32
  }
  func.func @transform_7(%arg0: i32) -> (i32, i32) {
    %c0_i32 = arith.constant 0 : i32
    %c0_i32_0 = arith.constant 0 : i32
    %c0_i32_1 = arith.constant 0 : i32
    return %c0_i32, %c0_i32_0 : i32, i32
  }
  func.func @transform_8(%arg0: i32) -> (i32, i32, i32) {
    %c0_i32 = arith.constant 0 : i32
    %c0_i32_0 = arith.constant 0 : i32
    %c0_i32_1 = arith.constant 0 : i32
    return %arg0, %c0_i32, %c0_i32_0 : i32, i32, i32
  }
}

</mosaic_0001>

<bundles_post_ra>
// kernel: mix_block_forward.1
= control target key start
LH: loop header
LB: loop body
LE: loop exit
PB: predicated region body
PF: predicated region fallthrough
CT: control target
= control target key end

     0   :  { %s3492_s27 = smov 0   ;;  %s6373_s0 = inlined_call_operand.vmem [shape: f32[2,16,256], index: 0, kind: input, shape index: {}]   ;;  %s6374_s1 = inlined_call_operand.vmem [shape: f32[32,16], index: 1, kind: input, shape index: {}]   ;;  %s6375_s2 = inlined_call_operand.vmem [shape: f32[32,25], index: 2, kind: input, shape index: {}]   ;;  %s6376_s3 = inlined_call_operand.vmem [shape: f32[25,256], index: 3, kind: input, shape index: {}]   ;;  %s6377_s4 = inlined_call_operand.vmem [shape: f32[4,32], index: 4, kind: input, shape index: {}]   ;;  %s6378_s5 = inlined_call_operand.vmem [shape: f32[32,4], index: 5, kind: input, shape index: {}]   ;;  %s6379_s6 = inlined_call_operand.vmem [shape: f32[16,32], index: 6, kind: input, shape index: {}]   ;;  %s6380_s7 = inlined_call_operand.vmem [shape: f32[32,10], index: 7, kind: input, shape index: {}]   ;;  %s6381_s8 = inlined_call_operand.vmem [shape: f32[2,16,256], index: 8, kind: output, shape index: {}]  }
   0x1 LB: > { %s3040_s28 = sadd.s32 4294967295, %s3390_s27   ;;  %p3044_p0 = scmp.ge.s32.totalorder %s3390_s27, 1  ;;  %s3390_s27 = sphi %s3492_s27, %s18_s27  }
   0x2   : > { %p262_p1 = scmp.lt.s32.totalorder %s3390_s27, 3 }
   0x4   : > { %p263_p2 = pnand %p3044_p0, %p262_p1 }
   0x6   : > { %266 = sbr.rel (%p263_p2) target bundleno = 2015 (0x7df), region = 52 }
   0xb   : > { %p296_p3 = scmp.lt.s32.totalorder %s3040_s28, 1  ;;  %v6384_v0 = vmov 0.0   ;;  %v313_v1 = vld [vmem:[%s6380_s7 + $0x18] sm:$0xff]  ;;  %v6386_v2 = vmov 0   ;;  %v3394_v3 = vmov 1   ;;  %v314_v8 = vld [vmem:[%s6374_s1] sm:$0xff] }
   0xc   : > { %395 = vmatprep.mubr.f32.mxu0 %v6384_v0  ;;  %407 = vmatprep.mubr.f32.mxu1 %v6384_v0  ;;  %vm318_vm0 = vcmask 130048   ;;  %v316_v9 = vld [vmem:[%s6374_s1 + $0x10] sm:$0xff]  ;;  %v311_v11 = vld [vmem:[%s6380_s7 + $0x8] sm:$0xff]  ;;  %v317_v13 = vld [vmem:[%s6374_s1 + $0x18] sm:$0xff]  ;;  %v6390_v18 = vmov 2   ;;  %v6388_v20 = vmov 3  }
   0xd   : > { %s7179_s28 = smov (!%p296_p3, %s3040_s28), 1  ;;  %3206 = vset.pattern.permute.xlu0 %v6386_v2  ;;  %3207 = vset.pattern.permute.xlu1 %v3394_v3  ;;  %v312_v10 = vld [vmem:[%s6380_s7 + $0x10] sm:$0xff]  ;;  %v315_v12 = vld [vmem:[%s6374_s1 + $0x8] sm:$0xff]  ;;  %v310_v15 = vld [vmem:[%s6380_s7] sm:$0xff]  ;;  %v3397_v21 = vmov 4   ;;  %v3398_v22 = vmov 6  }
   0xe   : > { %437 = vperm.xlu0 %3206, %v313_v1   ;;  %461 = vperm.xlu1 %3207, %v313_v1   ;;  %s3108_s9 = sshll.u32 %s7179_s28, 5  ;;  %v3546_v14 = vld [vmem:[%s6375_s2 + $0x8] sm:$0xff]  ;;  %v3559_v16 = vld [vmem:[%s6375_s2 + $0x18] sm:$0xff]  ;;  %v3567_v17 = vld [vmem:[%s6375_s2 + $0x10] sm:$0xff]  ;;  %v3399_v23 = vmov 5   ;;  %v6394_v24 = vmov 8  }
   0xf   : > { %s3514_s12 = scalar_lea.vmem %s6373_s0, %s3108_s9  ;;  %v3577_v19 = vld [vmem:[%s6375_s2] sm:$0xff]  ;;  %v3401_v25 = vmov 7   ;;  %v6382_v31 = vmov 9   ;;  %v6392_v62 = vmov 10   ;;  %s3404_s17 = smov 33  }
  0x10   : > { %v309_v4 = vld [vmem:[%s3514_s12 + $0x18] sm:$0xff]  ;;  %v308_v5 = vld [vmem:[%s3514_s12 + $0x10] sm:$0xff]  ;;  %v307_v6 = vld [vmem:[%s3514_s12 + $0x8] sm:$0xff]  ;;  %s3405_s18 = smov 34   ;;  %s3406_s19 = smov 32  }
  0x11   : > { %359 = vmatprep.subr.mxu0 %v309_v4  ;;  %3139 = vmatprep.subr.mxu1 %v309_v4  ;;  %v306_v7 = vld [vmem:[%s3514_s12] sm:$0xff]  ;;  %s3407_s20 = smov 31   ;;  %s3408_s21 = smov 18  }
  0x12   : > { %360 = vmatpush1.msra.mxu0 %v308_v5  ;;  %3141 = vmatpush1.msra.mxu1 %v308_v5  ;;  %s3409_s22 = smov 16   ;;  %s3410_s23 = smov 30  }
  0x13   : > { %361 = vmatprep.subr.mxu0 %v307_v6  ;;  %3140 = vmatprep.subr.mxu1 %v307_v6  ;;  %s3411_s24 = smov 17   ;;  %s3412_s25 = smov 15  }
  0x14   : > { %362 = vmatpush1.msra.mxu0 %v306_v7  ;;  %3142 = vmatpush1.msra.mxu1 %v306_v7  ;;  %s3413_s26 = smov 14   ;;  %s3414_s29 = smov 2  }
  0x15   : > { %3049 = vmatmul.mubr.msk.f32.vlgmr.msra.gmra.mxu0 %vm318_vm0, %v314_v8  ;;  %3051 = vmatmul.mubr.msk.f32.vlgmr.msra.gmra.mxu1 %vm318_vm0, %v316_v9  ;;  %s3416_s30 = smov 1   ;;  %s3417_s10 = smov 127  }
  0x16   : > { %401 = vmatprep.mubr.f32.mxu0 %v6384_v0  ;;  %413 = vmatprep.mubr.f32.mxu1 %v6384_v0  ;;  %s3421_s11 = smov 126   ;;  %s3422_s13 = smov 114  }
  0x17   : > { %432 = vperm.xlu0 %3206, %v312_v10   ;;  %3208 = vset.pattern.permute.xlu1 %v6386_v2  ;;  %s3425_s14 = smov 113   ;;  %s3426_s15 = smov 112  }
  0x18   : > { %427 = vperm.xlu1 %3208, %v311_v11   ;;  %3120 = vmatprep.subr.mxu1 %v6384_v0  ;;  %s3429_s16 = smov 111  }
  0x19   : > { %3050 = vmatmul.mubr.msk.f32.gmra.mxu0 %vm318_vm0, %v315_v12  ;;  %3052 = vmatmul.mubr.msk.f32.gmra.mxu1 %vm318_vm0, %v317_v13 }
  0x1a   : > { %2938 = vmatprep.mubr.f32.mxu0 %v6384_v0 }
  0x1b   : > { %586 = vperm.xlu0 %3206, %v3546_v14  }
  0x1c   : > { %422 = vperm.xlu1 %3208, %v310_v15  }
  0x1f   : > { %3212 = vset.pattern.permute.xlu0 %v3394_v3 }
  0x20   : > { %457 = vperm.xlu0 %3212, %v312_v10   ;;  %3209 = vset.pattern.permute.xlu1 %v3394_v3 }
  0x21   : > { %453 = vperm.xlu1 %3209, %v311_v11  }
  0x24   : > { %449 = vperm.xlu0 %3212, %v310_v15  }
  0x25   : > { %3210 = vset.pattern.permute.xlu1 %v6386_v2 }
  0x26   : > { %596 = vperm.xlu1 %3210, %v3559_v16  }
  0x28   : > { %674 = vperm.xlu0 %3212, %v3559_v16  }
  0x2a   : > { %591 = vperm.xlu1 %3210, %v3567_v17  }
  0x2c   : > { %670 = vperm.xlu0 %3212, %v3567_v17  }
  0x2e   : > { %3211 = vset.pattern.permute.xlu1 %v6390_v18 }
  0x2f   : > { %752 = vperm.xlu1 %3211, %v3559_v16  }
  0x30   : > { %666 = vperm.xlu0 %3212, %v3546_v14  }
  0x33   : > { %3213 = vset.pattern.permute.xlu1 %v6388_v20 }
  0x34   : > { %662 = vperm.xlu0 %3212, %v3577_v19   ;;  %830 = vperm.xlu1 %3213, %v3559_v16  }
  0x38   : > { %3215 = vset.pattern.permute.xlu0 %v6390_v18  ;;  %3214 = vset.pattern.permute.xlu1 %v6386_v2 }
  0x39   : > { %748 = vperm.xlu0 %3215, %v3567_v17   ;;  %581 = vperm.xlu1 %3214, %v3577_v19  }
  0x3d   : > { %744 = vperm.xlu0 %3215, %v3546_v14   ;;  %3217 = vset.pattern.permute.xlu1 %v3397_v21 }
  0x3e   : > { %908 = vperm.xlu1 %3217, %v3559_v16  }
  0x41   : > { %3216 = vset.pattern.permute.xlu0 %v6388_v20 }
  0x42   : > { %826 = vperm.xlu0 %3216, %v3567_v17   ;;  %3218 = vset.pattern.permute.xlu1 %v6390_v18 }
  0x43   : > { %740 = vperm.xlu1 %3218, %v3577_v19  }
  0x46   : > { %822 = vperm.xlu0 %3216, %v3546_v14  }
  0x47   : > { %3219 = vset.pattern.permute.xlu1 %v3397_v21 }
  0x48   : > { %904 = vperm.xlu1 %3219, %v3567_v17  }
  0x4a   : > { %818 = vperm.xlu0 %3216, %v3577_v19  }
  0x4c   : > { %3222 = vset.pattern.permute.xlu1 %v3398_v22 }
  0x4d   : > { %1064 = vperm.xlu1 %3222, %v3559_v16  }
  0x4e   : > { %3220 = vset.pattern.permute.xlu0 %v3397_v21 }
  0x4f   : > { %900 = vperm.xlu0 %3220, %v3546_v14  }
  0x51   : > { %3223 = vset.pattern.permute.xlu1 %v3397_v21 }
  0x52   : > { %896 = vperm.xlu1 %3223, %v3577_v19  }
  0x53   : > { %3221 = vset.pattern.permute.xlu0 %v3399_v23 }
  0x54   : > { %986 = vperm.xlu0 %3221, %v3559_v16  }
  0x56   : > { %3224 = vset.pattern.permute.xlu1 %v3398_v22 }
  0x57   : > { %1060 = vperm.xlu1 %3224, %v3567_v17  }
  0x58   : > { %982 = vperm.xlu0 %3221, %v3567_v17  }
  0x5b   : > { %3227 = vset.pattern.permute.xlu1 %v6394_v24 }
  0x5c   : > { %978 = vperm.xlu0 %3221, %v3546_v14   ;;  %1220 = vperm.xlu1 %3227, %v3559_v16  }
  0x60   : > { %974 = vperm.xlu0 %3221, %v3577_v19   ;;  %3228 = vset.pattern.permute.xlu1 %v3398_v22 }
  0x61   : > { %1052 = vperm.xlu1 %3228, %v3577_v19  }
  0x64   : > { %3225 = vset.pattern.permute.xlu0 %v3398_v22 }
  0x65   : > { %1056 = vperm.xlu0 %3225, %v3546_v14   ;;  %3229 = vset.pattern.permute.xlu1 %v6394_v24 }
  0x66   : > { %1216 = vperm.xlu1 %3229, %v3567_v17  }
  0x69   : > { %3226 = vset.pattern.permute.xlu0 %v3401_v25 }
  0x6a   : > { %1142 = vperm.xlu0 %3226, %v3559_v16   ;;  %3232 = vset.pattern.permute.xlu1 %v6392_v62 }
  0x6e   : > { %1138 = vperm.xlu0 %3226, %v3567_v17  }
  0x72   : > { %1134 = vperm.xlu0 %3226, %v3546_v14  }
  0x76   : > { %1130 = vperm.xlu0 %3226, %v3577_v19  }
  0x7a   : > { %3230 = vset.pattern.permute.xlu0 %v6394_v24 }
  0x7b   : > { %1212 = vperm.xlu0 %3230, %v3546_v14  }
  0x7f   : > { %3231 = vset.pattern.permute.xlu0 %v6382_v31 }
  0x89   : > { %v438_v26 = vpop.permute.xlu0 %437  ;;  %v3615_v28 = vpop.permute.xlu1 %461 }
  0x92   : > { %v433_v27 = vpop.permute.xlu0 %432 }
  0x93   : > { %v428_v30 = vpop.permute.xlu1 %427 }
  0x96   : > { %v3617_v29 = vpop.permute.xlu0 %586 }
  0x97   : > { %6656 = vst [vmem:[#allocation2_spill] sm:$0xff] %v3617_v29  ;;  %v423_v33 = vpop.permute.xlu1 %422 }
  0x9b   : > { %v458_v32 = vpop.permute.xlu0 %457 }
  0x9c   : > { %v454_v57 = vpop.permute.xlu1 %453 }
  0x9f   : > { %v450_v38 = vpop.permute.xlu0 %449 }
  0xa3   : > { %v3631_v1 = vpop.permute.xlu0 %674 }
  0xa4   : > { %6657 = vst [vmem:[#allocation3_spill] sm:$0xff] %v3631_v1 }
  0xa7   : > { %v3639_v8 = vpop.permute.xlu0 %670 }
  0xa8   : > { %6659 = vst [vmem:[#allocation5_spill] sm:$0xff] %v3639_v8 }
  0xab   : > { %v3653_v23 = vpop.permute.xlu0 %666 }
  0xac   : > { %6660 = vst [vmem:[#allocation6_spill] sm:$0xff] %v3653_v23 }
  0xd5   : > { %v397_v34 = vpop.f32.mrf.mxu0  ;;  %v409_v35 = vpop.f32.mrf.mxu1 }
  0xd6   : > { %v440_v36 = vmul.f32 %v423_v33, %v397_v34  ;;  %v444_v37 = vmul.f32 %v433_v27, %v409_v35 }
  0xd7   : > { %v399_v41 = vpop.f32.mrf.mxu0  ;;  %v411_v47 = vpop.f32.mrf.mxu1 }
  0xd8   : > { %v464_v39 = vadd.f32 %v450_v38, %v440_v36  ;;  %v468_v40 = vadd.f32 %v458_v32, %v444_v37  ;;  %v441_v44 = vmul.f32 %v423_v33, %v399_v41  ;;  %v445_v5 = vmul.f32 %v433_v27, %v411_v47  ;;  %v3667_v33 = vpop.permute.xlu0 %662  ;;  %v3701_v47 = vpop.permute.xlu1 %596 }
  0xd9   : > { %v415_v48 = vpop.f32.mrf.mxu1  ;;  %v403_v51 = vpop.f32.mrf.mxu0  ;;  %6666 = vst [vmem:[#allocation12_spill] sm:$0xff] %v3701_v47 }
  0xda   : > { %v3057_v42 = vmul.f32 -1.442695, %v468_v40  ;;  %v3053_v43 = vmul.f32 -1.442695, %v464_v39  ;;  %v3620_v45 = vadd.f32 %v450_v38, %v441_v44  ;;  %v446_v52 = vmul.f32 %v438_v26, %v415_v48 }
  0xdb   : > { %v442_v54 = vmul.f32 %v428_v30, %v403_v51  ;;  %v417_v6 = vpop.f32.mrf.mxu1  ;;  %v3641_v9 = vadd.f32 %v458_v32, %v445_v5  ;;  %v405_v10 = vpop.f32.mrf.mxu0 }
  0xdc   : > { %3282 = vpow2.f32 %v3057_v42  ;;  %v3054_v46 = vmul.f32 -1.442695, %v3620_v45  ;;  %v3624_v56 = vadd.f32 %v3615_v28, %v446_v52  ;;  %v447_v7 = vmul.f32 %v438_v26, %v417_v6  ;;  %v3676_v36 = vpop.permute.xlu0 %748  ;;  %v3712_v51 = vpop.permute.xlu1 %591 }
  0xdd   : > { %3284 = vpow2.f32 %v3053_v43  ;;  %v3626_v58 = vadd.f32 %v454_v57, %v442_v54  ;;  %v443_v12 = vmul.f32 %v428_v30, %v405_v10  ;;  %v3058_v21 = vmul.f32 -1.442695, %v3641_v9  ;;  %6662 = vst [vmem:[#allocation8_spill] sm:$0xff] %v3676_v36  ;;  %6669 = vst [vmem:[#allocation15_spill] sm:$0xff] %v3712_v51 }
  0xde   : > { %3286 = vpow2.f32 %v3054_v46  ;;  %v3059_v59 = vmul.f32 -1.442695, %v3624_v56  ;;  %v3648_v13 = vadd.f32 %v3615_v28, %v447_v7  ;;  %v3420_v36 = vmov 14  }
  0xdf   : > { %v3055_v61 = vmul.f32 -1.442695, %v3626_v58  ;;  %v3659_v25 = vadd.f32 %v454_v57, %v443_v12 }
  0xe0   : > { %v3060_v26 = vmul.f32 -1.442695, %v3648_v13  ;;  %v3686_v38 = vpop.permute.xlu0 %744  ;;  %v3718_v52 = vpop.permute.xlu1 %752 }
  0xe1   : > { %v3056_v32 = vmul.f32 -1.442695, %v3659_v25  ;;  %6663 = vst [vmem:[#allocation9_spill] sm:$0xff] %v3686_v38  ;;  %6670 = vst [vmem:[#allocation16_spill] sm:$0xff] %v3718_v52 }
  0xe4   : > { %v3733_v57 = vpop.permute.xlu1 %830 }
  0xe5   : > { %6672 = vst [vmem:[#allocation18_spill] sm:$0xff] %v3733_v57 }
  0xe9   : > { %v3283_v49 = vpop.eup %3282 }
  0xea   : > { %v500_v50 = vadd.f32 1.0, %v3283_v49  ;;  %v3285_v53 = vpop.eup %3284 }
  0xeb   : > { %v496_v55 = vadd.f32 1.0, %v3285_v53  ;;  %v3287_v60 = vpop.eup %3286 }
  0xec   : > { %3288 = vrcp.f32 %v500_v50  ;;  %v497_v63 = vadd.f32 1.0, %v3287_v60 }
  0xed   : > { %3290 = vrcp.f32 %v496_v55 }
  0xee   : > { %3292 = vpow2.f32 %v3059_v59 }
  0xef   : > { %3294 = vpow2.f32 %v3055_v61 }
  0xf0   : > { %3296 = vrcp.f32 %v497_v63 }
  0xf1   : > { %3298 = vpow2.f32 %v3058_v21 }
  0xf2   : > { %3300 = vpow2.f32 %v3060_v26 }
  0xf9   : > { %v3289_v3 = vpop.eup %3288 }
  0xfa   : > { %v3633_v4 = vmul.f32 %v3289_v3, %v468_v40  ;;  %v3291_v11 = vpop.eup %3290  ;;  %v3749_v3 = vpop.permute.xlu1 %581 }
  0xfb   : > { %v3650_v15 = vmul.f32 %v3291_v11, %v464_v39  ;;  %v3293_v22 = vpop.eup %3292 }
  0xfc   : > { %6658 = vst [vmem:[#allocation4_spill] sm:$0xff] %v3633_v4  ;;  %619 = vrot.lane.b32.xlu1 %v3633_v4, %s3404_s17  ;;  %532 = vrot.lane.b32.xlu0 %v3633_v4, %s3405_s18  ;;  %v3295_v27 = vpop.eup %3294  ;;  %v502_v28 = vadd.f32 1.0, %v3293_v22 }
  0xfd   : > { %v3297_v30 = vpop.eup %3296  ;;  %v498_v35 = vadd.f32 1.0, %v3295_v27 }
  0xfe   : > { %v3670_v34 = vmul.f32 %v3297_v30, %v3620_v45  ;;  %3302 = vrcp.f32 %v502_v28  ;;  %v3299_v37 = vpop.eup %3298  ;;  %v3695_v45 = vpop.permute.xlu0 %826 }
  0xff   : > { %3304 = vpow2.f32 %v3056_v32  ;;  %v3301_v39 = vpop.eup %3300  ;;  %v501_v40 = vadd.f32 1.0, %v3299_v37  ;;  %6665 = vst [vmem:[#allocation11_spill] sm:$0xff] %v3695_v45  ;;  %v3761_v6 = vpop.permute.xlu1 %908 }
 0x100   : > { %697 = vrot.lane.b32.xlu1 %v3633_v4, %s3406_s19  ;;  %775 = vrot.lane.b32.xlu0 %v3633_v4, %s3407_s20  ;;  %6661 = vst [vmem:[#allocation7_spill] sm:$0xff] %v3670_v34  ;;  %3306 = vrcp.f32 %v498_v35  ;;  %v503_v44 = vadd.f32 1.0, %v3301_v39  ;;  %6678 = vst [vmem:[#allocation24_spill] sm:$0xff] %v3761_v6 }
 0x101   : > { %3308 = vrcp.f32 %v501_v40 }
 0x102   : > { %3310 = vrcp.f32 %v503_v44  ;;  %v3710_v50 = vpop.permute.xlu0 %822 }
 0x103   : > { %6668 = vst [vmem:[#allocation14_spill] sm:$0xff] %v3710_v50 }
 0x104   : > { %931 = vrot.lane.b32.xlu0 %v3633_v4, %s3408_s21  ;;  %528 = vrot.lane.b32.xlu1 %v3650_v15, %s3405_s18 }
 0x106   : > { %v3720_v53 = vpop.permute.xlu0 %818 }
 0x108   : > { %1087 = vrot.lane.b32.xlu0 %v3633_v4, %s3409_s22  ;;  %615 = vrot.lane.b32.xlu1 %v3650_v15, %s3404_s17 }
 0x10b   : > { %v3303_v41 = vpop.eup %3302 }
 0x10c   : > { %693 = vrot.lane.b32.xlu1 %v3650_v15, %s3406_s19  ;;  %536 = vrot.lane.b32.xlu0 %v3670_v34, %s3405_s18  ;;  %v3305_v42 = vpop.eup %3304  ;;  %v3693_v43 = vmul.f32 %v3303_v41, %v3624_v56 }
 0x10d   : > { %v3307_v46 = vpop.eup %3306  ;;  %v499_v49 = vadd.f32 1.0, %v3305_v42 }
 0x10e   : > { %6664 = vst [vmem:[#allocation10_spill] sm:$0xff] %v3693_v43  ;;  %v3704_v48 = vmul.f32 %v3307_v46, %v3626_v58  ;;  %v3309_v54 = vpop.eup %3308  ;;  %v3735_v58 = vpop.permute.xlu0 %900 }
 0x10f   : > { %3312 = vrcp.f32 %v499_v49  ;;  %v3727_v55 = vmul.f32 %v3309_v54, %v3641_v9  ;;  %v3311_v56 = vpop.eup %3310  ;;  %6673 = vst [vmem:[#allocation19_spill] sm:$0xff] %v3735_v58  ;;  %v3769_v9 = vpop.permute.xlu1 %740  ;;  %v3415_v49 = vmov 11  }
 0x110   : > { %853 = vrot.lane.b32.xlu1 %v3633_v4, %s3410_s23  ;;  %623 = vrot.lane.b32.xlu0 %v3670_v34, %s3404_s17  ;;  %6667 = vst [vmem:[#allocation13_spill] sm:$0xff] %v3704_v48  ;;  %v3738_v59 = vmul.f32 %v3311_v56, %v3648_v13 }
 0x111   : > { %6671 = vst [vmem:[#allocation17_spill] sm:$0xff] %v3727_v55 }
 0x112   : > { %6674 = vst [vmem:[#allocation20_spill] sm:$0xff] %v3738_v59  ;;  %v3747_v63 = vpop.permute.xlu0 %986 }
 0x113   : > { %6676 = vst [vmem:[#allocation22_spill] sm:$0xff] %v3747_v63  ;;  %v3781_v11 = vpop.permute.xlu1 %904 }
 0x114   : > { %771 = vrot.lane.b32.xlu1 %v3650_v15, %s3407_s20  ;;  %779 = vrot.lane.b32.xlu0 %v3670_v34, %s3407_s20  ;;  %6680 = vst [vmem:[#allocation26_spill] sm:$0xff] %v3781_v11 }
 0x116   : > { %v3759_v5 = vpop.permute.xlu0 %982 }
 0x117   : > { %6677 = vst [vmem:[#allocation23_spill] sm:$0xff] %v3759_v5  ;;  %v3789_v13 = vpop.permute.xlu1 %1064  ;;  %v6405_v5 = vmov 12  }
 0x118   : > { %849 = vrot.lane.b32.xlu1 %v3650_v15, %s3410_s23  ;;  %935 = vrot.lane.b32.xlu0 %v3670_v34, %s3408_s21  ;;  %6682 = vst [vmem:[#allocation28_spill] sm:$0xff] %v3789_v13 }
 0x11a   : > { %v3767_v7 = vpop.permute.xlu0 %978 }
 0x11b   : > { %6679 = vst [vmem:[#allocation25_spill] sm:$0xff] %v3767_v7  ;;  %v3800_v22 = vpop.permute.xlu1 %896  ;;  %v6431_v7 = vmov 15  }
 0x11c   : > { %1009 = vrot.lane.b32.xlu1 %v3633_v4, %s3411_s24  ;;  %621 = vrot.lane.b32.xlu0 %v3693_v43, %s3404_s17  ;;  %v3313_v60 = vpop.eup %3312 }
 0x11d   : > { %v3745_v61 = vmul.f32 %v3313_v60, %v3659_v25 }
 0x11e   : > { %v3779_v10 = vpop.permute.xlu0 %974 }
 0x11f   : > { %6675 = vst [vmem:[#allocation21_spill] sm:$0xff] %v3745_v61  ;;  %v3807_v26 = vpop.permute.xlu1 %1060 }
 0x120   : > { %927 = vrot.lane.b32.xlu1 %v3650_v15, %s3408_s21  ;;  %617 = vrot.lane.b32.xlu0 %v3704_v48, %s3404_s17  ;;  %6685 = vst [vmem:[#allocation31_spill] sm:$0xff] %v3807_v26 }
 0x122   : > { %v3787_v12 = vpop.permute.xlu0 %1056 }
 0x123   : > { %6681 = vst [vmem:[#allocation27_spill] sm:$0xff] %v3787_v12  ;;  %v3819_v28 = vpop.permute.xlu1 %1220 }
 0x124   : > { %1005 = vrot.lane.b32.xlu1 %v3650_v15, %s3411_s24  ;;  %773 = vrot.lane.b32.xlu0 %v3704_v48, %s3407_s20  ;;  %6687 = vst [vmem:[#allocation33_spill] sm:$0xff] %v3819_v28 }
 0x126   : > { %v3798_v21 = vpop.permute.xlu0 %1142 }
 0x127   : > { %6683 = vst [vmem:[#allocation29_spill] sm:$0xff] %v3798_v21  ;;  %v3827_v32 = vpop.permute.xlu1 %1052 }
 0x128   : > { %1165 = vrot.lane.b32.xlu1 %v3633_v4, %s3412_s25  ;;  %929 = vrot.lane.b32.xlu0 %v3704_v48, %s3408_s21 }
 0x12a   : > { %v3805_v25 = vpop.permute.xlu0 %1138 }
 0x12b   : > { %6684 = vst [vmem:[#allocation30_spill] sm:$0xff] %v3805_v25  ;;  %v3838_v37 = vpop.permute.xlu1 %1216 }
 0x12c   : > { %540 = vrot.lane.b32.xlu1 %v3727_v55, %s3405_s18  ;;  %1085 = vrot.lane.b32.xlu0 %v3704_v48, %s3409_s22  ;;  %6690 = vst [vmem:[#allocation36_spill] sm:$0xff] %v3838_v37 }
 0x12e   : > { %v3817_v27 = vpop.permute.xlu0 %1134 }
 0x12f   : > { %6686 = vst [vmem:[#allocation32_spill] sm:$0xff] %v3817_v27 }
 0x130   : > { %627 = vrot.lane.b32.xlu1 %v3727_v55, %s3404_s17  ;;  %542 = vrot.lane.b32.xlu0 %v3738_v59, %s3405_s18 }
 0x132   : > { %v3825_v30 = vpop.permute.xlu0 %1130 }
 0x133   : > { %6688 = vst [vmem:[#allocation34_spill] sm:$0xff] %v3825_v30 }
 0x134   : > { %705 = vrot.lane.b32.xlu1 %v3727_v55, %s3406_s19  ;;  %538 = vrot.lane.b32.xlu0 %v3745_v61, %s3405_s18 }
 0x136   : > { %v3836_v35 = vpop.permute.xlu0 %1212 }
 0x137   : > { %6689 = vst [vmem:[#allocation35_spill] sm:$0xff] %v3836_v35 }
 0x138   : > { %783 = vrot.lane.b32.xlu1 %v3727_v55, %s3407_s20  ;;  %703 = vrot.lane.b32.xlu0 %v3745_v61, %s3406_s19 }
 0x13c   : > { %701 = vrot.lane.b32.xlu1 %v3670_v34, %s3406_s19  ;;  %863 = vrot.lane.b32.xlu0 %v3738_v59, %s3410_s23 }
 0x140   : > { %861 = vrot.lane.b32.xlu1 %v3727_v55, %s3410_s23  ;;  %859 = vrot.lane.b32.xlu0 %v3745_v61, %s3410_s23 }
 0x144   : > { %939 = vrot.lane.b32.xlu1 %v3727_v55, %s3408_s21  ;;  %1019 = vrot.lane.b32.xlu0 %v3738_v59, %s3411_s24 }
 0x148   : > { %857 = vrot.lane.b32.xlu1 %v3670_v34, %s3410_s23  ;;  %1015 = vrot.lane.b32.xlu0 %v3745_v61, %s3411_s24 }
 0x14c   : > { %1017 = vrot.lane.b32.xlu1 %v3727_v55, %s3411_s24  ;;  %1175 = vrot.lane.b32.xlu0 %v3738_v59, %s3412_s25 }
 0x150   : > { %1095 = vrot.lane.b32.xlu1 %v3727_v55, %s3409_s22  ;;  %1298 = vperm.xlu0 %3231, %v3559_v16  }
 0x154   : > { %1013 = vrot.lane.b32.xlu1 %v3670_v34, %s3411_s24  ;;  %1294 = vperm.xlu0 %3231, %v3567_v17  }
 0x158   : > { %1173 = vrot.lane.b32.xlu1 %v3727_v55, %s3412_s25  ;;  %1091 = vrot.lane.b32.xlu0 %v3670_v34, %s3409_s22 }
 0x15c   : > { %534 = vrot.lane.b32.xlu1 %v3693_v43, %s3405_s18  ;;  %1171 = vrot.lane.b32.xlu0 %v3745_v61, %s3412_s25 }
 0x160   : > { %699 = vrot.lane.b32.xlu1 %v3693_v43, %s3406_s19  ;;  %1243 = vrot.lane.b32.xlu0 %v3633_v4, %s3413_s26 }
 0x164   : > { %530 = vrot.lane.b32.xlu1 %v3704_v48, %s3405_s18  ;;  %1290 = vperm.xlu0 %3231, %v3546_v14   ;;  %s3433_s18 = smov 98  }
 0x168   : > { %777 = vrot.lane.b32.xlu1 %v3693_v43, %s3407_s20  ;;  %1331 = vrot.lane.b32.xlu0 %v3738_v59, %s3414_s29 }
 0x16c   : > { %695 = vrot.lane.b32.xlu1 %v3704_v48, %s3406_s19  ;;  %1241 = vrot.lane.b32.xlu0 %v3704_v48, %s3413_s26 }
 0x16e   : > { %v3844_v39 = vpop.permute.xlu1 %619  ;;  %v3846_v40 = vpop.permute.xlu0 %532 }
 0x170   : > { %855 = vrot.lane.b32.xlu1 %v3693_v43, %s3410_s23  ;;  %1286 = vperm.xlu0 %3231, %v3577_v19  }
 0x172   : > { %v3851_v41 = vpop.permute.xlu1 %697  ;;  %v3853_v42 = vpop.permute.xlu0 %775 }
 0x173   : > { %6691 = vst [vmem:[#allocation37_spill] sm:$0xff] %v3853_v42 }
 0x174   : > { %933 = vrot.lane.b32.xlu1 %v3693_v43, %s3408_s21  ;;  %3235 = vset.pattern.permute.xlu0 %v6392_v62 }
 0x175   : > { %1368 = vperm.xlu0 %3235, %v3546_v14  }
 0x176   : > { %v3859_v44 = vpop.permute.xlu1 %528  ;;  %v3863_v46 = vpop.permute.xlu0 %931 }
 0x177   : > { %6692 = vst [vmem:[#allocation38_spill] sm:$0xff] %v3863_v46 }
 0x178   : > { %851 = vrot.lane.b32.xlu1 %v3704_v48, %s3410_s23  ;;  %s3438_s23 = smov 95  }
 0x179   : > { %3236 = vset.pattern.permute.xlu0 %v3415_v49 }
 0x17a   : > { %v3865_v54 = vpop.permute.xlu1 %615  ;;  %1454 = vperm.xlu0 %3236, %v3559_v16   ;;  %v3873_v60 = vpop.permute.xlu0 %1087 }
 0x17b   : > { %6693 = vst [vmem:[#allocation39_spill] sm:$0xff] %v3873_v60 }
 0x17c   : > { %1011 = vrot.lane.b32.xlu1 %v3693_v43, %s3411_s24 }
 0x17e   : > { %v3870_v56 = vpop.permute.xlu1 %693  ;;  %1450 = vperm.xlu0 %3236, %v3567_v17   ;;  %v3883_v49 = vpop.permute.xlu0 %536 }
 0x180   : > { %1089 = vrot.lane.b32.xlu1 %v3693_v43, %s3409_s22 }
 0x182   : > { %v3877_v31 = vpop.permute.xlu1 %853  ;;  %1247 = vrot.lane.b32.xlu0 %v3670_v34, %s3413_s26  ;;  %v3895_v20 = vpop.permute.xlu0 %623 }
 0x183   : > { %6694 = vst [vmem:[#allocation40_spill] sm:$0xff] %v3877_v31 }
 0x184   : > { %1007 = vrot.lane.b32.xlu1 %v3704_v48, %s3411_s24 }
 0x186   : > { %v3885_v0 = vpop.permute.xlu1 %771  ;;  %1327 = vrot.lane.b32.xlu0 %v3745_v61, %s3414_s29  ;;  %v3904_v62 = vpop.permute.xlu0 %779 }
 0x188   : > { %1167 = vrot.lane.b32.xlu1 %v3693_v43, %s3412_s25 }
 0x18a   : > { %v3891_v2 = vpop.permute.xlu1 %849  ;;  %1399 = vrot.lane.b32.xlu0 %v3633_v4, %s3416_s30  ;;  %v3915_v25 = vpop.permute.xlu0 %935 }
 0x18c   : > { %629 = vrot.lane.b32.xlu1 %v3738_v59, %s3404_s17 }
 0x18e   : > { %v3899_v18 = vpop.permute.xlu1 %1009  ;;  %1446 = vperm.xlu0 %3236, %v3546_v14   ;;  %v3926_v11 = vpop.permute.xlu0 %621 }
 0x18f   : > { %6695 = vst [vmem:[#allocation41_spill] sm:$0xff] %v3899_v18  ;;  %6697 = vst [vmem:[#allocation43_spill] sm:$0xff] %v3926_v11  ;;  %v6410_v18 = vmov 13  }
 0x190   : > { %707 = vrot.lane.b32.xlu1 %v3738_v59, %s3406_s19  ;;  %s3434_s19 = smov 97  }
 0x192   : > { %v3906_v24 = vpop.permute.xlu1 %927  ;;  %1397 = vrot.lane.b32.xlu0 %v3704_v48, %s3416_s30  ;;  %v3936_v46 = vpop.permute.xlu0 %617 }
 0x193   : > { %6698 = vst [vmem:[#allocation44_spill] sm:$0xff] %v3936_v46 }
 0x194   : > { %625 = vrot.lane.b32.xlu1 %v3745_v61, %s3404_s17  ;;  %s3430_s17 = smov 110  }
 0x196   : > { %v3912_v37 = vpop.permute.xlu1 %1005  ;;  %1442 = vperm.xlu0 %3236, %v3577_v19   ;;  %v3946_v45 = vpop.permute.xlu0 %773 }
 0x197   : > { %6699 = vst [vmem:[#allocation45_spill] sm:$0xff] %v3946_v45 }
 0x198   : > { %785 = vrot.lane.b32.xlu1 %v3738_v59, %s3407_s20 }
 0x19a   : > { %v3919_v26 = vpop.permute.xlu1 %1165  ;;  %1540 = vrot.lane.b32.xlu0 %v3738_v59, %s3417_s10  ;;  %v3955_v51 = vpop.permute.xlu0 %929 }
 0x19b   : > { %6696 = vst [vmem:[#allocation42_spill] sm:$0xff] %v3919_v26  ;;  %3241 = vset.pattern.permute.xlu0 %v6405_v5  ;;  %6701 = vst [vmem:[#allocation47_spill] sm:$0xff] %v3955_v51 }
 0x19c   : > { %781 = vrot.lane.b32.xlu1 %v3745_v61, %s3407_s20 }
 0x19e   : > { %v3928_v60 = vpop.permute.xlu1 %540  ;;  %1495 = vperm.xlu0 %3241, %v3577_v19  }
 0x1a0   : > { %941 = vrot.lane.b32.xlu1 %v3738_v59, %s3408_s21 }
 0x1a2   : > { %v3933_v26 = vpop.permute.xlu1 %627  ;;  %3242 = vset.pattern.permute.xlu0 %v6410_v18 }
 0x1a3   : > { %1585 = vperm.xlu0 %3242, %v3559_v16  }
 0x1a4   : > { %937 = vrot.lane.b32.xlu1 %v3745_v61, %s3408_s21  ;;  %s3443_s21 = smov 123  }
 0x1a6   : > { %v3941_v5 = vpop.permute.xlu1 %705 }
 0x1a7   : > { %1577 = vperm.xlu0 %3242, %v3546_v14  }
 0x1a8   : > { %1097 = vrot.lane.b32.xlu1 %v3738_v59, %s3409_s22 }
 0x1aa   : > { %v3948_v31 = vpop.permute.xlu1 %783 }
 0x1ab   : > { %6700 = vst [vmem:[#allocation46_spill] sm:$0xff] %v3948_v31  ;;  %3243 = vset.pattern.permute.xlu0 %v3420_v36  ;;  %v3964_v36 = vpop.permute.xlu0 %1085 }
 0x1ac   : > { %1093 = vrot.lane.b32.xlu1 %v3745_v61, %s3409_s22  ;;  %1663 = vperm.xlu0 %3243, %v3559_v16   ;;  %6703 = vst [vmem:[#allocation49_spill] sm:$0xff] %v3964_v36  ;;  %v3424_v36 = vmov 16  }
 0x1ae   : > { %v3953_v18 = vpop.permute.xlu1 %701 }
 0x1af   : > { %v3975_v35 = vpop.permute.xlu0 %542 }
 0x1b0   : > { %1245 = vrot.lane.b32.xlu1 %v3693_v43, %s3413_s26  ;;  %1659 = vperm.xlu0 %3243, %v3567_v17  }
 0x1b2   : > { %v3960_v8 = vpop.permute.xlu1 %861 }
 0x1b3   : > { %6702 = vst [vmem:[#allocation48_spill] sm:$0xff] %v3960_v8  ;;  %v6705_v8 = vmov 8  }
 0x1b4   : > { %1253 = vrot.lane.b32.xlu1 %v3738_v59, %s3413_s26  ;;  %1536 = vrot.lane.b32.xlu0 %v3745_v61, %s3417_s10 }
 0x1b6   : > { %v3968_v42 = vpop.permute.xlu1 %939 }
 0x1b7   : > { %6704 = vst [vmem:[#allocation50_spill] sm:$0xff] %v3968_v42  ;;  %v3985_v42 = vpop.permute.xlu0 %538 }
 0x1b8   : > { %1376 = vperm.xlu1 %3232, %v3559_v16   ;;  %1608 = vrot.lane.b32.xlu0 %v3633_v4, %s3421_s11 }
 0x1ba   : > { %v3973_v31 = vpop.permute.xlu1 %857 }
 0x1bc   : > { %1083 = vrot.lane.b32.xlu1 %v3650_v15, %s3409_s22  ;;  %1655 = vperm.xlu0 %3243, %v3546_v14   ;;  %s3437_s22 = smov 96  }
 0x1bd   : > { %3233 = vset.pattern.permute.xlu1 %v6705_v8  ;;  %v3996_v8 = vpop.permute.xlu0 %703 }
 0x1be   : > { %v3981_v30 = vpop.permute.xlu1 %1017 }
 0x1bf   : > { %6706 = vst [vmem:[#allocation51_spill] sm:$0xff] %v3981_v30  ;;  %v6708_v30 = vmov 10  }
 0x1c0   : > { %1163 = vrot.lane.b32.xlu1 %v3704_v48, %s3412_s25  ;;  %1696 = vrot.lane.b32.xlu0 %v3738_v59, %s3422_s13 }
 0x1c2   : > { %v3989_v27 = vpop.permute.xlu1 %1095 }
 0x1c3   : > { %6707 = vst [vmem:[#allocation52_spill] sm:$0xff] %v3989_v27  ;;  %v4006_v27 = vpop.permute.xlu0 %863 }
 0x1c4   : > { %1208 = vperm.xlu1 %3233, %v3577_v19   ;;  %1606 = vrot.lane.b32.xlu0 %v3704_v48, %s3421_s11 }
 0x1c6   : > { %v3994_v21 = vpop.permute.xlu1 %1013 }
 0x1c7   : > { %v4015_v63 = vpop.permute.xlu0 %859 }
 0x1c8   : > { %1251 = vrot.lane.b32.xlu1 %v3727_v55, %s3413_s26  ;;  %1651 = vperm.xlu0 %3243, %v3577_v19   ;;  %6711 = vst [vmem:[#allocation55_spill] sm:$0xff] %v4015_v63 }
 0x1c9   : > { %3234 = vset.pattern.permute.xlu1 %v6708_v30 }
 0x1ca   : > { %v4002_v28 = vpop.permute.xlu1 %1173 }
 0x1cb   : > { %6709 = vst [vmem:[#allocation53_spill] sm:$0xff] %v4002_v28  ;;  %v6712_v28 = vmov 12   ;;  %v4026_v50 = vpop.permute.xlu0 %1019 }
 0x1cc   : > { %1323 = vrot.lane.b32.xlu1 %v3693_v43, %s3414_s29  ;;  %3247 = vset.pattern.permute.xlu0 %v6431_v7  ;;  %6713 = vst [vmem:[#allocation56_spill] sm:$0xff] %v4026_v50 }
 0x1cd   : > { %1733 = vperm.xlu0 %3247, %v3546_v14  }
 0x1ce   : > { %v4010_v12 = vpop.permute.xlu1 %534 }
 0x1cf   : > { %v4036_v57 = vpop.permute.xlu0 %1015 }
 0x1d0   : > { %1372 = vperm.xlu1 %3234, %v3567_v17   ;;  %6715 = vst [vmem:[#allocation58_spill] sm:$0xff] %v4036_v57 }
 0x1d1   : > { %3248 = vset.pattern.permute.xlu0 %v3424_v36 }
 0x1d2   : > { %v4013_v13 = vpop.permute.xlu1 %699  ;;  %1819 = vperm.xlu0 %3248, %v3559_v16  }
 0x1d3   : > { %6710 = vst [vmem:[#allocation54_spill] sm:$0xff] %v4013_v13  ;;  %v4048_v45 = vpop.permute.xlu0 %1175 }
 0x1d4   : > { %1161 = vrot.lane.b32.xlu1 %v3650_v15, %s3412_s25  ;;  %6716 = vst [vmem:[#allocation59_spill] sm:$0xff] %v4048_v45 }
 0x1d5   : > { %3237 = vset.pattern.permute.xlu1 %v6712_v28 }
 0x1d6   : > { %v4021_v7 = vpop.permute.xlu1 %530  ;;  %1815 = vperm.xlu0 %3248, %v3567_v17  }
 0x1d7   : > { %v4055_v57 = vpop.permute.xlu0 %1298 }
 0x1d8   : > { %1169 = vrot.lane.b32.xlu1 %v3670_v34, %s3412_s25  ;;  %6718 = vst [vmem:[#allocation61_spill] sm:$0xff] %v4055_v57 }
 0x1da   : > { %v4028_v36 = vpop.permute.xlu1 %777  ;;  %1612 = vrot.lane.b32.xlu0 %v3670_v34, %s3421_s11 }
 0x1db   : > { %6714 = vst [vmem:[#allocation57_spill] sm:$0xff] %v4028_v36  ;;  %v4065_v45 = vpop.permute.xlu0 %1294  ;;  %v3428_v36 = vmov 18  }
 0x1dc   : > { %1249 = vrot.lane.b32.xlu1 %v3745_v61, %s3413_s26  ;;  %6721 = vst [vmem:[#allocation64_spill] sm:$0xff] %v4065_v45 }
 0x1de   : > { %v4034_v51 = vpop.permute.xlu1 %695  ;;  %1692 = vrot.lane.b32.xlu0 %v3745_v61, %s3422_s13 }
 0x1df   : > { %v4075_v57 = vpop.permute.xlu0 %1091 }
 0x1e0   : > { %1321 = vrot.lane.b32.xlu1 %v3633_v4, %s3414_s29  ;;  %6723 = vst [vmem:[#allocation66_spill] sm:$0xff] %v4075_v57 }
 0x1e2   : > { %v4042_v23 = vpop.permute.xlu1 %855  ;;  %1764 = vrot.lane.b32.xlu0 %v3633_v4, %s3425_s14 }
 0x1e4   : > { %1329 = vrot.lane.b32.xlu1 %v3727_v55, %s3414_s29 }
 0x1e6   : > { %v4050_v52 = vpop.permute.xlu1 %933  ;;  %1811 = vperm.xlu0 %3248, %v3546_v14  }
 0x1e7   : > { %6717 = vst [vmem:[#allocation60_spill] sm:$0xff] %v4050_v52 }
 0x1e8   : > { %1401 = vrot.lane.b32.xlu1 %v3693_v43, %s3416_s30 }
 0x1ea   : > { %v4057_v1 = vpop.permute.xlu1 %851  ;;  %1852 = vrot.lane.b32.xlu0 %v3738_v59, %s3426_s15 }
 0x1eb   : > { %6719 = vst [vmem:[#allocation62_spill] sm:$0xff] %v4057_v1 }
 0x1ec   : > { %1409 = vrot.lane.b32.xlu1 %v3738_v59, %s3416_s30 }
 0x1ee   : > { %v4063_v58 = vpop.permute.xlu1 %1011  ;;  %1762 = vrot.lane.b32.xlu0 %v3704_v48, %s3425_s14 }
 0x1ef   : > { %6720 = vst [vmem:[#allocation63_spill] sm:$0xff] %v4063_v58  ;;  %v6450_v58 = vmov 17  }
 0x1f0   : > { %1507 = vperm.xlu1 %3237, %v3559_v16  }
 0x1f2   : > { %v4070_v52 = vpop.permute.xlu1 %1089  ;;  %1807 = vperm.xlu0 %3248, %v3577_v19  }
 0x1f3   : > { %6722 = vst [vmem:[#allocation65_spill] sm:$0xff] %v4070_v52  ;;  %v4086_v52 = vpop.permute.xlu0 %1171 }
 0x1f4   : > { %1239 = vrot.lane.b32.xlu1 %v3650_v15, %s3413_s26  ;;  %6726 = vst [vmem:[#allocation69_spill] sm:$0xff] %v4086_v52 }
 0x1f5   : > { %3238 = vset.pattern.permute.xlu1 %v6708_v30 }
 0x1f6   : > { %v4078_v50 = vpop.permute.xlu1 %1007  ;;  %3252 = vset.pattern.permute.xlu0 %v6450_v58 }
 0x1f7   : > { %6724 = vst [vmem:[#allocation67_spill] sm:$0xff] %v4078_v50  ;;  %1889 = vperm.xlu0 %3252, %v3546_v14   ;;  %v4094_v58 = vpop.permute.xlu0 %1243 }
 0x1f8   : > { %1319 = vrot.lane.b32.xlu1 %v3704_v48, %s3414_s29  ;;  %6728 = vst [vmem:[#allocation71_spill] sm:$0xff] %v4094_v58 }
 0x1fa   : > { %v4084_v45 = vpop.permute.xlu1 %1167 }
 0x1fb   : > { %6725 = vst [vmem:[#allocation68_spill] sm:$0xff] %v4084_v45  ;;  %3253 = vset.pattern.permute.xlu0 %v3428_v36  ;;  %v4105_v52 = vpop.permute.xlu0 %1290 }
 0x1fc   : > { %1364 = vperm.xlu1 %3238, %v3577_v19   ;;  %1975 = vperm.xlu0 %3253, %v3559_v16   ;;  %6731 = vst [vmem:[#allocation74_spill] sm:$0xff] %v4105_v52 }
 0x1fe   : > { %v4090_v30 = vpop.permute.xlu1 %629 }
 0x1ff   : > { %6727 = vst [vmem:[#allocation70_spill] sm:$0xff] %v4090_v30  ;;  %v3063_v30 = vld [vmem:[%s6376_s3 + $0x3] ss:$8 sm:$0x3] }
 0x200   : > { %1407 = vrot.lane.b32.xlu1 %v3727_v55, %s3416_s30  ;;  %1971 = vperm.xlu0 %3253, %v3567_v17  }
 0x201   : > { %3239 = vset.pattern.permute.xlu1 %v6712_v28  ;;  %v4115_v28 = vpop.permute.xlu0 %1331 }
 0x202   : > { %v4098_v57 = vpop.permute.xlu1 %707  ;;  %6733 = vst [vmem:[#allocation76_spill] sm:$0xff] %v4115_v28 }
 0x203   : > { %6729 = vst [vmem:[#allocation72_spill] sm:$0xff] %v4098_v57 }
 0x204   : > { %1503 = vperm.xlu1 %3239, %v3567_v17   ;;  %1768 = vrot.lane.b32.xlu0 %v3670_v34, %s3425_s14 }
 0x205   : > { %v4126_v50 = vpop.permute.xlu0 %1241 }
 0x206   : > { %v4103_v36 = vpop.permute.xlu1 %625  ;;  %6736 = vst [vmem:[#allocation79_spill] sm:$0xff] %v4126_v50 }
 0x207   : > { %6730 = vst [vmem:[#allocation73_spill] sm:$0xff] %v4103_v36 }
 0x208   : > { %1317 = vrot.lane.b32.xlu1 %v3650_v15, %s3414_s29  ;;  %1848 = vrot.lane.b32.xlu0 %v3745_v61, %s3426_s15 }
 0x209   : > { %v4131_v28 = vpop.permute.xlu0 %1286 }
 0x20a   : > { %v4111_v58 = vpop.permute.xlu1 %785  ;;  %6737 = vst [vmem:[#allocation80_spill] sm:$0xff] %v4131_v28  ;;  %v6469_v28 = vmov 19  }
 0x20b   : > { %6732 = vst [vmem:[#allocation75_spill] sm:$0xff] %v4111_v58 }
 0x20c   : > { %1325 = vrot.lane.b32.xlu1 %v3670_v34, %s3414_s29  ;;  %1920 = vrot.lane.b32.xlu0 %v3633_v4, %s3429_s16  ;;  %s3446_s29 = smov 121  }
 0x20d   : > { %v4141_v50 = vpop.permute.xlu0 %1368 }
 0x20e   : > { %v4119_v45 = vpop.permute.xlu1 %781  ;;  %6740 = vst [vmem:[#allocation82_spill] sm:$0xff] %v4141_v50  ;;  %v3432_v50 = vmov 20  }
 0x20f   : > { %6734 = vst [vmem:[#allocation77_spill] sm:$0xff] %v4119_v45  ;;  %v6739_v45 = vmov 13  }
 0x210   : > { %1405 = vrot.lane.b32.xlu1 %v3745_v61, %s3416_s30  ;;  %1967 = vperm.xlu0 %3253, %v3546_v14  }
 0x211   : > { %v4151_v46 = vpop.permute.xlu0 %1454 }
 0x212   : > { %v4124_v52 = vpop.permute.xlu1 %941  ;;  %6743 = vst [vmem:[#allocation84_spill] sm:$0xff] %v4151_v46 }
 0x213   : > { %6735 = vst [vmem:[#allocation78_spill] sm:$0xff] %v4124_v52 }
 0x214   : > { %1499 = vperm.xlu1 %3239, %v3546_v14   ;;  %2008 = vrot.lane.b32.xlu0 %v3738_v59, %s3430_s17 }
 0x216   : > { %v4133_v58 = vpop.permute.xlu1 %937 }
 0x217   : > { %6738 = vst [vmem:[#allocation81_spill] sm:$0xff] %v4133_v58  ;;  %v6742_v58 = vmov 15  }
 0x218   : > { %1532 = vrot.lane.b32.xlu1 %v3693_v43, %s3417_s10  ;;  %1918 = vrot.lane.b32.xlu0 %v3704_v48, %s3429_s16 }
 0x219   : > { %3240 = vset.pattern.permute.xlu1 %v6739_v45 }
 0x21a   : > { %v4143_v52 = vpop.permute.xlu1 %1097 }
 0x21b   : > { %6741 = vst [vmem:[#allocation83_spill] sm:$0xff] %v4143_v52  ;;  %v4160_v52 = vpop.permute.xlu0 %1450 }
 0x21c   : > { %1581 = vperm.xlu1 %3240, %v3567_v17   ;;  %1963 = vperm.xlu0 %3253, %v3577_v19   ;;  %6745 = vst [vmem:[#allocation86_spill] sm:$0xff] %v4160_v52 }
 0x21e   : > { %v4153_v36 = vpop.permute.xlu1 %1093 }
 0x21f   : > { %6744 = vst [vmem:[#allocation85_spill] sm:$0xff] %v4153_v36  ;;  %v4167_v46 = vpop.permute.xlu0 %1247 }
 0x220   : > { %1395 = vrot.lane.b32.xlu1 %v3650_v15, %s3416_s30  ;;  %3257 = vset.pattern.permute.xlu0 %v6469_v28  ;;  %6747 = vst [vmem:[#allocation88_spill] sm:$0xff] %v4167_v46 }
 0x221   : > { %3244 = vset.pattern.permute.xlu1 %v6742_v58  ;;  %2045 = vperm.xlu0 %3257, %v3546_v14  }
 0x222   : > { %v4162_v28 = vpop.permute.xlu1 %1245 }
 0x223   : > { %6746 = vst [vmem:[#allocation87_spill] sm:$0xff] %v4162_v28  ;;  %v4181_v52 = vpop.permute.xlu0 %1327 }
 0x224   : > { %1403 = vrot.lane.b32.xlu1 %v3670_v34, %s3416_s30  ;;  %6750 = vst [vmem:[#allocation91_spill] sm:$0xff] %v4181_v52 }
 0x225   : > { %3258 = vset.pattern.permute.xlu0 %v3432_v50 }
 0x226   : > { %2131 = vperm.xlu0 %3258, %v3559_v16   ;;  %v4169_v36 = vpop.permute.xlu1 %1253 }
 0x227   : > { %6748 = vst [vmem:[#allocation89_spill] sm:$0xff] %v4169_v36  ;;  %v4188_v28 = vpop.permute.xlu0 %1399 }
 0x228   : > { %1530 = vrot.lane.b32.xlu1 %v3633_v4, %s3417_s10  ;;  %6752 = vst [vmem:[#allocation93_spill] sm:$0xff] %v4188_v28 }
 0x22a   : > { %2127 = vperm.xlu0 %3258, %v3567_v17  }
 0x22c   : > { %1538 = vrot.lane.b32.xlu1 %v3727_v55, %s3417_s10 }
 0x22e   : > { %1924 = vrot.lane.b32.xlu0 %v3670_v34, %s3429_s16 }
 0x230   : > { %1610 = vrot.lane.b32.xlu1 %v3693_v43, %s3421_s11 }
 0x232   : > { %2004 = vrot.lane.b32.xlu0 %v3745_v61, %s3430_s17 }
 0x233   : > { %v4177_v50 = vpop.permute.xlu1 %1376 }
 0x234   : > { %6749 = vst [vmem:[#allocation90_spill] sm:$0xff] %v4177_v50  ;;  %1618 = vrot.lane.b32.xlu1 %v3738_v59, %s3421_s11  ;;  %v4201_v50 = vpop.permute.xlu0 %1446 }
 0x235   : > { %6755 = vst [vmem:[#allocation96_spill] sm:$0xff] %v4201_v50  ;;  %v6485_v50 = vmov 21  }
 0x236   : > { %2076 = vrot.lane.b32.xlu0 %v3633_v4, %s3433_s18 }
 0x237   : > { %v4185_v46 = vpop.permute.xlu1 %1083 }
 0x238   : > { %6751 = vst [vmem:[#allocation92_spill] sm:$0xff] %v4185_v46  ;;  %1741 = vperm.xlu1 %3244, %v3559_v16  }
 0x23a   : > { %2123 = vperm.xlu0 %3258, %v3546_v14  }
 0x23b   : > { %v4191_v36 = vpop.permute.xlu1 %1163 }
 0x23c   : > { %6753 = vst [vmem:[#allocation94_spill] sm:$0xff] %v4191_v36  ;;  %1528 = vrot.lane.b32.xlu1 %v3704_v48, %s3417_s10 }
 0x23d   : > { %3245 = vset.pattern.permute.xlu1 %v6739_v45  ;;  %v4210_v45 = vpop.permute.xlu0 %1397 }
 0x23e   : > { %2164 = vrot.lane.b32.xlu0 %v3738_v59, %s3434_s19  ;;  %6757 = vst [vmem:[#allocation98_spill] sm:$0xff] %v4210_v45 }
 0x23f   : > { %v4198_v52 = vpop.permute.xlu1 %1208 }
 0x240   : > { %6754 = vst [vmem:[#allocation95_spill] sm:$0xff] %v4198_v52  ;;  %1573 = vperm.xlu1 %3245, %v3577_v19  }
 0x242   : > { %2074 = vrot.lane.b32.xlu0 %v3704_v48, %s3433_s18 }
 0x243   : > { %v4205_v14 = vpop.permute.xlu1 %1251 }
 0x244   : > { %6756 = vst [vmem:[#allocation97_spill] sm:$0xff] %v4205_v14  ;;  %1616 = vrot.lane.b32.xlu1 %v3727_v55, %s3421_s11  ;;  %v4223_v14 = vld [vmem:[%s6375_s2 + $0x8] sm:$0xff] }
 0x245   : > { %3246 = vset.pattern.permute.xlu1 %v6742_v58 }
 0x246   : > { %2119 = vperm.xlu0 %3258, %v3577_v19   ;;  %v4227_v19 = vpop.permute.xlu0 %1442 }
 0x247   : > { %v4213_v28 = vpop.permute.xlu1 %1323  ;;  %6760 = vst [vmem:[#allocation101_spill] sm:$0xff] %v4227_v19 }
 0x248   : > { %6758 = vst [vmem:[#allocation99_spill] sm:$0xff] %v4213_v28  ;;  %1688 = vrot.lane.b32.xlu1 %v3693_v43, %s3422_s13  ;;  %v3436_v28 = vmov 22  }
 0x24a   : > { %3262 = vset.pattern.permute.xlu0 %v6485_v50  ;;  %v6762_v50 = vmov 17  }
 0x24b   : > { %v4218_v52 = vpop.permute.xlu1 %1372  ;;  %2201 = vperm.xlu0 %3262, %v4223_v14  }
 0x24c   : > { %6759 = vst [vmem:[#allocation100_spill] sm:$0xff] %v4218_v52  ;;  %1737 = vperm.xlu1 %3246, %v3567_v17   ;;  %v4235_v52 = vpop.permute.xlu0 %1540 }
 0x24d   : > { %6763 = vst [vmem:[#allocation103_spill] sm:$0xff] %v4235_v52 }
 0x24f   : > { %v4229_v45 = vpop.permute.xlu1 %1161  ;;  %3263 = vset.pattern.permute.xlu0 %v3436_v28 }
 0x250   : > { %6761 = vst [vmem:[#allocation102_spill] sm:$0xff] %v4229_v45  ;;  %1526 = vrot.lane.b32.xlu1 %v3650_v15, %s3417_s10  ;;  %2287 = vperm.xlu0 %3263, %v3559_v16   ;;  %v4246_v28 = vpop.permute.xlu0 %1495 }
 0x251   : > { %3249 = vset.pattern.permute.xlu1 %v6762_v50  ;;  %6766 = vst [vmem:[#allocation106_spill] sm:$0xff] %v4246_v28 }
 0x253   : > { %v4237_v36 = vpop.permute.xlu1 %1169 }
 0x254   : > { %6764 = vst [vmem:[#allocation104_spill] sm:$0xff] %v4237_v36  ;;  %1534 = vrot.lane.b32.xlu1 %v3670_v34, %s3417_s10  ;;  %2283 = vperm.xlu0 %3263, %v3567_v17   ;;  %v4254_v52 = vpop.permute.xlu0 %1585  ;;  %s305_s10 = scalar_lea.vmem %s6381_s8, %s3108_s9 }
 0x255   : > { %6768 = vst [vmem:[#allocation108_spill] sm:$0xff] %v4254_v52 }
 0x257   : > { %v4242_v19 = vpop.permute.xlu1 %1249 }
 0x258   : > { %6765 = vst [vmem:[#allocation105_spill] sm:$0xff] %v4242_v19  ;;  %1614 = vrot.lane.b32.xlu1 %v3745_v61, %s3421_s11  ;;  %2080 = vrot.lane.b32.xlu0 %v3670_v34, %s3433_s18  ;;  %v4264_v19 = vpop.permute.xlu0 %1577 }
 0x259   : > { %6770 = vst [vmem:[#allocation110_spill] sm:$0xff] %v4264_v19  ;;  %v4284_v19 = vld [vmem:[%s6375_s2 + $0x18] sm:$0xff] }
 0x25b   : > { %v4250_v16 = vpop.permute.xlu1 %1321 }
 0x25c   : > { %6767 = vst [vmem:[#allocation107_spill] sm:$0xff] %v4250_v16  ;;  %1686 = vrot.lane.b32.xlu1 %v3633_v4, %s3422_s13  ;;  %2160 = vrot.lane.b32.xlu0 %v3745_v61, %s3434_s19 }
 0x25f   : > { %v4258_v17 = vpop.permute.xlu1 %1329 }
 0x260   : > { %6769 = vst [vmem:[#allocation109_spill] sm:$0xff] %v4258_v17  ;;  %1694 = vrot.lane.b32.xlu1 %v3727_v55, %s3422_s13  ;;  %2232 = vrot.lane.b32.xlu0 %v3633_v4, %s3437_s22  ;;  %v4275_v17 = vpop.permute.xlu0 %1663 }
 0x261   : > { %6773 = vst [vmem:[#allocation113_spill] sm:$0xff] %v4275_v17  ;;  %v4298_v17 = vld [vmem:[%s6375_s2] sm:$0xff] }
 0x263   : > { %v4266_v16 = vpop.permute.xlu1 %1401 }
 0x264   : > { %6771 = vst [vmem:[#allocation111_spill] sm:$0xff] %v4266_v16  ;;  %1766 = vrot.lane.b32.xlu1 %v3693_v43, %s3425_s14  ;;  %2279 = vperm.xlu0 %3263, %v4223_v14   ;;  %v4289_v16 = vpop.permute.xlu0 %1659 }
 0x265   : > { %6775 = vst [vmem:[#allocation115_spill] sm:$0xff] %v4289_v16 }
 0x267   : > { %v4271_v52 = vpop.permute.xlu1 %1409 }
 0x268   : > { %6772 = vst [vmem:[#allocation112_spill] sm:$0xff] %v4271_v52  ;;  %1774 = vrot.lane.b32.xlu1 %v3738_v59, %s3425_s14  ;;  %2320 = vrot.lane.b32.xlu0 %v3738_v59, %s3438_s23  ;;  %v4306_v16 = vpop.permute.xlu0 %1536 }
 0x269   : > { %6778 = vst [vmem:[#allocation118_spill] sm:$0xff] %v4306_v16 }
 0x26b   : > { %v4279_v45 = vpop.permute.xlu1 %1507 }
 0x26c   : > { %6774 = vst [vmem:[#allocation114_spill] sm:$0xff] %v4279_v45  ;;  %1897 = vperm.xlu1 %3249, %v4284_v19   ;;  %2230 = vrot.lane.b32.xlu0 %v3704_v48, %s3437_s22 }
 0x26f   : > { %v4291_v52 = vpop.permute.xlu1 %1239 }
 0x270   : > { %6776 = vst [vmem:[#allocation116_spill] sm:$0xff] %v4291_v52  ;;  %1604 = vrot.lane.b32.xlu1 %v3650_v15, %s3421_s11  ;;  %2275 = vperm.xlu0 %3263, %v4298_v17   ;;  %v6505_v52 = vmov 23   ;;  %s3441_s11 = smov 94  }
 0x271   : > { %3250 = vset.pattern.permute.xlu1 %v6742_v58  ;;  %v4315_v58 = vpop.permute.xlu0 %1608 }
 0x272   : > { %6780 = vst [vmem:[#allocation120_spill] sm:$0xff] %v4315_v58 }
 0x273   : > { %v4302_v45 = vpop.permute.xlu1 %1319 }
 0x274   : > { %6777 = vst [vmem:[#allocation117_spill] sm:$0xff] %v4302_v45  ;;  %1684 = vrot.lane.b32.xlu1 %v3704_v48, %s3422_s13  ;;  %3267 = vset.pattern.permute.xlu0 %v6505_v52 }
 0x275   : > { %2357 = vperm.xlu0 %3267, %v4223_v14   ;;  %v4327_v16 = vpop.permute.xlu0 %1655 }
 0x276   : > { %6783 = vst [vmem:[#allocation123_spill] sm:$0xff] %v4327_v16 }
 0x277   : > { %v4310_v36 = vpop.permute.xlu1 %1364 }
 0x278   : > { %6779 = vst [vmem:[#allocation119_spill] sm:$0xff] %v4310_v36  ;;  %1729 = vperm.xlu1 %3250, %v4298_v17   ;;  %v6513_v36 = vmov 24  }
 0x279   : > { %2308 = vrot.lane.b32.xlu0 %v3704_v48, %s3438_s23 }
 0x27b   : > { %v4317_v45 = vpop.permute.xlu1 %1407 }
 0x27c   : > { %6781 = vst [vmem:[#allocation121_spill] sm:$0xff] %v4317_v45  ;;  %1772 = vrot.lane.b32.xlu1 %v3727_v55, %s3425_s14  ;;  %v4336_v45 = vld [vmem:[%s6375_s2 + $0x10] sm:$0xff] }
 0x27d   : > { %3251 = vset.pattern.permute.xlu1 %v6762_v50  ;;  %2353 = vperm.xlu0 %3267, %v4298_v17   ;;  %6785 = vst [vmem:[#allocation125_spill] sm:$0xff] %v4336_v45 }
 0x27f   : > { %v4323_v52 = vpop.permute.xlu1 %1503 }
 0x280   : > { %6782 = vst [vmem:[#allocation122_spill] sm:$0xff] %v4323_v52  ;;  %1844 = vrot.lane.b32.xlu1 %v3693_v43, %s3426_s15  ;;  %v4339_v52 = vpop.permute.xlu0 %1696 }
 0x281   : > { %3268 = vset.pattern.permute.xlu0 %v6513_v36  ;;  %6786 = vst [vmem:[#allocation126_spill] sm:$0xff] %v4339_v52  ;;  %v6788_v36 = vmov 19  }
 0x282   : > { %2443 = vperm.xlu0 %3268, %v4284_v19  }
 0x283   : > { %v4331_v58 = vpop.permute.xlu1 %1317 }
 0x284   : > { %6784 = vst [vmem:[#allocation124_spill] sm:$0xff] %v4331_v58  ;;  %1893 = vperm.xlu1 %3251, %v4336_v45   ;;  %v4352_v58 = vpop.permute.xlu0 %1606 }
 0x285   : > { %6790 = vst [vmem:[#allocation129_spill] sm:$0xff] %v4352_v58 }
 0x286   : > { %2439 = vperm.xlu0 %3268, %v4336_v45  }
 0x287   : > { %v4342_v28 = vpop.permute.xlu1 %1325 }
 0x288   : > { %6787 = vst [vmem:[#allocation127_spill] sm:$0xff] %v4342_v28  ;;  %1682 = vrot.lane.b32.xlu1 %v3650_v15, %s3422_s13  ;;  %v6792_v28 = vmov 2   ;;  %v4361_v46 = vpop.permute.xlu0 %1651 }
 0x289   : > { %3254 = vset.pattern.permute.xlu1 %v6788_v36  ;;  %6793 = vst [vmem:[#allocation131_spill] sm:$0xff] %v4361_v46 }
 0x28a   : > { %2435 = vperm.xlu0 %3268, %v4223_v14  }
 0x28b   : > { %v4348_v16 = vpop.permute.xlu1 %1405 }
 0x28c   : > { %6789 = vst [vmem:[#allocation128_spill] sm:$0xff] %v4348_v16  ;;  %1690 = vrot.lane.b32.xlu1 %v3670_v34, %s3422_s13  ;;  %v4369_v58 = vpop.permute.xlu0 %1733 }
 0x28d   : > { %6795 = vst [vmem:[#allocation133_spill] sm:$0xff] %v4369_v58 }
 0x28e   : > { %2314 = vrot.lane.b32.xlu0 %v3670_v34, %s3438_s23 }
 0x28f   : > { %v4356_v52 = vpop.permute.xlu1 %1499  ;;  %3271 = vset.pattern.permute.xlu0 %v6792_v28 }
 0x290   : > { %6791 = vst [vmem:[#allocation130_spill] sm:$0xff] %v4356_v52  ;;  %1770 = vrot.lane.b32.xlu1 %v3745_v61, %s3425_s14  ;;  %v3370_v52 = vld [vmem:[%s6380_s7 + $0x10] sm:$0xff]  ;;  %v4385_v58 = vpop.permute.xlu0 %1819 }
 0x291   : > { %6799 = vst [vmem:[#allocation136_spill] sm:$0xff] %v4385_v58  ;;  %v6804_v58 = vmov 0  }
 0x292   : > { %2394 = vrot.lane.b32.xlu0 %v3745_v61, %s3441_s11 }
 0x293   : > { %v4365_v14 = vpop.permute.xlu1 %1532 }
 0x294   : > { %6794 = vst [vmem:[#allocation132_spill] sm:$0xff] %v4365_v14  ;;  %1842 = vrot.lane.b32.xlu1 %v3633_v4, %s3426_s15  ;;  %v6798_v14 = vmov 3  }
 0x296   : > { %2471 = vperm.xlu0 %3271, %v3370_v52  }
 0x297   : > { %v4374_v16 = vpop.permute.xlu1 %1581 }
 0x298   : > { %6796 = vst [vmem:[#allocation134_spill] sm:$0xff] %v4374_v16  ;;  %1850 = vrot.lane.b32.xlu1 %v3727_v55, %s3426_s15  ;;  %v4391_v16 = vpop.permute.xlu0 %1815 }
 0x299   : > { %6801 = vst [vmem:[#allocation138_spill] sm:$0xff] %v4391_v16 }
 0x29a   : > { %2392 = vrot.lane.b32.xlu0 %v3670_v34, %s3441_s11 }
 0x29b   : > { %v4380_v46 = vpop.permute.xlu1 %1395  ;;  %3274 = vset.pattern.permute.xlu0 %v6798_v14 }
 0x29c   : > { %6797 = vst [vmem:[#allocation135_spill] sm:$0xff] %v4380_v46  ;;  %1922 = vrot.lane.b32.xlu1 %v3693_v43, %s3429_s16  ;;  %v3371_v46 = vld [vmem:[%s6380_s7] sm:$0xff] }
 0x29e   : > { %2495 = vperm.xlu0 %3274, %v3370_v52  }
 0x29f   : > { %v4387_v28 = vpop.permute.xlu1 %1403 }
 0x2a0   : > { %6800 = vst [vmem:[#allocation137_spill] sm:$0xff] %v4387_v28  ;;  %1930 = vrot.lane.b32.xlu1 %v3738_v59, %s3429_s16 }
 0x2a2   : > { %2487 = vperm.xlu0 %3274, %v3371_v46  }
 0x2a3   : > { %v4393_v13 = vpop.permute.xlu1 %1530 }
 0x2a4   : > { %6802 = vst [vmem:[#allocation139_spill] sm:$0xff] %v4393_v13  ;;  %2053 = vperm.xlu1 %3254, %v4284_v19  }
 0x2a6   : > { %3277 = vset.pattern.permute.xlu0 %v6804_v58  ;;  %v6811_v58 = vmov 21  }
 0x2a7   : > { %v4399_v14 = vpop.permute.xlu1 %1538 }
 0x2a8   : > { %6803 = vst [vmem:[#allocation140_spill] sm:$0xff] %v4399_v14  ;;  %1760 = vrot.lane.b32.xlu1 %v3650_v15, %s3425_s14 }
 0x2a9   : > { %3255 = vset.pattern.permute.xlu1 %v6762_v50 }
 0x2ab   : > { %v4405_v52 = vpop.permute.xlu1 %1610 }
 0x2ac   : > { %6805 = vst [vmem:[#allocation141_spill] sm:$0xff] %v4405_v52  ;;  %1840 = vrot.lane.b32.xlu1 %v3704_v48, %s3426_s15  ;;  %v4439_v52 = vpop.permute.xlu0 %1612 }
 0x2ad   : > { %6815 = vst [vmem:[#allocation150_spill] sm:$0xff] %v4439_v52 }
 0x2af   : > { %v4409_v16 = vpop.permute.xlu1 %1618 }
 0x2b0   : > { %6806 = vst [vmem:[#allocation142_spill] sm:$0xff] %v4409_v16  ;;  %1885 = vperm.xlu1 %3255, %v4298_v17  }
 0x2b3   : > { %v4412_v46 = vpop.permute.xlu1 %1741 }
 0x2b4   : > { %6807 = vst [vmem:[#allocation143_spill] sm:$0xff] %v4412_v46  ;;  %1928 = vrot.lane.b32.xlu1 %v3727_v55, %s3429_s16 }
 0x2b5   : > { %3256 = vset.pattern.permute.xlu1 %v6788_v36 }
 0x2b7   : > { %v4417_v13 = vpop.permute.xlu1 %1528 }
 0x2b8   : > { %6808 = vst [vmem:[#allocation144_spill] sm:$0xff] %v4417_v13  ;;  %2000 = vrot.lane.b32.xlu1 %v3693_v43, %s3430_s17 }
 0x2bb   : > { %v4421_v50 = vpop.permute.xlu1 %1573 }
 0x2bc   : > { %6809 = vst [vmem:[#allocation145_spill] sm:$0xff] %v4421_v50  ;;  %2049 = vperm.xlu1 %3256, %v4336_v45  }
 0x2bf   : > { %v4424_v14 = vpop.permute.xlu1 %1616 }
 0x2c0   : > { %6810 = vst [vmem:[#allocation146_spill] sm:$0xff] %v4424_v14  ;;  %1838 = vrot.lane.b32.xlu1 %v3650_v15, %s3426_s15 }
 0x2c1   : > { %3259 = vset.pattern.permute.xlu1 %v6811_v58 }
 0x2c3   : > { %v4429_v46 = vpop.permute.xlu1 %1688 }
 0x2c4   : > { %6812 = vst [vmem:[#allocation147_spill] sm:$0xff] %v4429_v46  ;;  %1846 = vrot.lane.b32.xlu1 %v3670_v34, %s3426_s15  ;;  %v4447_v46 = vpop.permute.xlu0 %1692 }
 0x2c5   : > { %6817 = vst [vmem:[#allocation152_spill] sm:$0xff] %v4447_v46 }
 0x2c7   : > { %v4433_v13 = vpop.permute.xlu1 %1737 }
 0x2c8   : > { %6813 = vst [vmem:[#allocation148_spill] sm:$0xff] %v4433_v13  ;;  %1926 = vrot.lane.b32.xlu1 %v3745_v61, %s3429_s16 }
 0x2cb   : > { %v4437_v50 = vpop.permute.xlu1 %1526 }
 0x2cc   : > { %6814 = vst [vmem:[#allocation149_spill] sm:$0xff] %v4437_v50  ;;  %1998 = vrot.lane.b32.xlu1 %v3633_v4, %s3430_s17  ;;  %v4455_v50 = vpop.permute.xlu0 %1764 }
 0x2cd   : > { %6820 = vst [vmem:[#allocation155_spill] sm:$0xff] %v4455_v50 }
 0x2cf   : > { %v4443_v14 = vpop.permute.xlu1 %1534 }
 0x2d0   : > { %6816 = vst [vmem:[#allocation151_spill] sm:$0xff] %v4443_v14  ;;  %2006 = vrot.lane.b32.xlu1 %v3727_v55, %s3430_s17  ;;  %v4462_v14 = vpop.permute.xlu0 %1811 }
 0x2d1   : > { %6822 = vst [vmem:[#allocation157_spill] sm:$0xff] %v4462_v14 }
 0x2d3   : > { %v4449_v16 = vpop.permute.xlu1 %1614 }
 0x2d4   : > { %6818 = vst [vmem:[#allocation153_spill] sm:$0xff] %v4449_v16  ;;  %2078 = vrot.lane.b32.xlu1 %v3693_v43, %s3433_s18 }
 0x2d7   : > { %v4453_v13 = vpop.permute.xlu1 %1686 }
 0x2d8   : > { %6819 = vst [vmem:[#allocation154_spill] sm:$0xff] %v4453_v13  ;;  %2086 = vrot.lane.b32.xlu1 %v3738_v59, %s3433_s18  ;;  %v4471_v13 = vpop.permute.xlu0 %1852 }
 0x2d9   : > { %6825 = vst [vmem:[#allocation160_spill] sm:$0xff] %v4471_v13 }
 0x2db   : > { %v4459_v52 = vpop.permute.xlu1 %1694 }
 0x2dc   : > { %6821 = vst [vmem:[#allocation156_spill] sm:$0xff] %v4459_v52  ;;  %2209 = vperm.xlu1 %3259, %v4284_v19   ;;  %v4478_v52 = vpop.permute.xlu0 %1762 }
 0x2dd   : > { %6827 = vst [vmem:[#allocation162_spill] sm:$0xff] %v4478_v52 }
 0x2df   : > { %v4464_v28 = vpop.permute.xlu1 %1766 }
 0x2e0   : > { %6823 = vst [vmem:[#allocation158_spill] sm:$0xff] %v4464_v28  ;;  %1916 = vrot.lane.b32.xlu1 %v3650_v15, %s3429_s16 }
 0x2e1   : > { %3260 = vset.pattern.permute.xlu1 %v6788_v36  ;;  %v4485_v36 = vpop.permute.xlu0 %1807 }
 0x2e2   : > { %6829 = vst [vmem:[#allocation164_spill] sm:$0xff] %v4485_v36 }
 0x2e3   : > { %v4469_v46 = vpop.permute.xlu1 %1774 }
 0x2e4   : > { %6824 = vst [vmem:[#allocation159_spill] sm:$0xff] %v4469_v46  ;;  %1996 = vrot.lane.b32.xlu1 %v3704_v48, %s3430_s17  ;;  %v6834_v46 = vmov 23  }
 0x2e7   : > { %v4475_v50 = vpop.permute.xlu1 %1897 }
 0x2e8   : > { %6826 = vst [vmem:[#allocation161_spill] sm:$0xff] %v4475_v50  ;;  %2041 = vperm.xlu1 %3260, %v4298_v17   ;;  %v4493_v50 = vpop.permute.xlu0 %1889 }
 0x2e9   : > { %6832 = vst [vmem:[#allocation167_spill] sm:$0xff] %v4493_v50 }
 0x2eb   : > { %v4480_v14 = vpop.permute.xlu1 %1604 }
 0x2ec   : > { %6828 = vst [vmem:[#allocation163_spill] sm:$0xff] %v4480_v14  ;;  %2084 = vrot.lane.b32.xlu1 %v3727_v55, %s3433_s18  ;;  %v544_v14 = vlaneseq  ;;  %v4501_v36 = vpop.permute.xlu0 %1975 }
 0x2ed   : > { %3261 = vset.pattern.permute.xlu1 %v6811_v58  ;;  %6835 = vst [vmem:[#allocation169_spill] sm:$0xff] %v4501_v36  ;;  %v3072_v36 = vld [vmem:[%s6376_s3 + $0x14] ss:$8 sm:$0x3] }
 0x2ee   : > { %v4524_v57 = vand.u32 127, %v544_v14 }
 0x2ef   : > { %v4487_v28 = vpop.permute.xlu1 %1684 }
 0x2f0   : > { %6830 = vst [vmem:[#allocation165_spill] sm:$0xff] %v4487_v28  ;;  %2156 = vrot.lane.b32.xlu1 %v3693_v43, %s3434_s19  ;;  %v4509_v50 = vpop.permute.xlu0 %1971  ;;  %vm631_vm1 = vcmp.lt.s32.totalorder %v4524_v57, 33  ;;  %vm546_vm2 = vcmp.lt.s32.totalorder %v4524_v57, 34  ;;  %vm787_vm3 = vcmp.lt.s32.totalorder %v4524_v57, 31  ;;  %vm943_vm4 = vcmp.lt.s32.totalorder %v4524_v57, 18 }
 0x2f1   : > { %6838 = vst [vmem:[#allocation172_spill] sm:$0xff] %v4509_v50  ;;  %v551_v29 = vsel %vm546_vm2, %v3883_v49, %v3859_v44  ;;  %vm709_vm5 = vcmp.lt.s32.totalorder %v4524_v57, 32  ;;  %vm865_vm6 = vcmp.lt.s32.totalorder %v4524_v57, 30  ;;  %vm1021_vm7 = vcmp.lt.s32.totalorder %v4524_v57, 17 }
 0x2f2   : > { %vm1177_vm8 = vcmp.lt.s32.totalorder %v4524_v57, 15  ;;  %vm1099_vm9 = vcmp.lt.s32.totalorder %v4524_v57, 16  ;;  %vm1255_vm10 = vcmp.lt.s32.totalorder %v4524_v57, 14  ;;  %vm1333_vm11 = vcmp.lt.s32.totalorder %v4524_v57, 2 }
 0x2f3   : > { %v4491_v13 = vpop.permute.xlu1 %1729  ;;  %vm1411_vm12 = vcmp.lt.s32.totalorder %v4524_v57, 1  ;;  %vm1542_vm13 = vcmp.lt.s32.totalorder %v4524_v57, 127  ;;  %vm6647_vm14 = vcmp.lt.s32.totalorder %v4524_v57, 126  ;;  %vm6655_vm15 = vcmp.lt.s32.totalorder %v4524_v57, 114 }
 0x2f4   : > { %6831 = vst [vmem:[#allocation166_spill] sm:$0xff] %v4491_v13  ;;  %2205 = vperm.xlu1 %3261, %v4336_v45   ;;  %v558_v13 = vshrl.u32 %v544_v14, 7  ;;  %v4535_v6 = vpop.permute.xlu0 %1768  ;;  %vm6651_vm0 = vcmp.lt.s32.totalorder %v4524_v57, 113 }
 0x2f5   : > { %6842 = vst [vmem:[#allocation176_spill] sm:$0xff] %v4535_v6 }
 0x2f6   : > { %v4515_v45 = vsub.s32 1, %v558_v13 }
 0x2f7   : > { %v4496_v52 = vpop.permute.xlu1 %1772 }
 0x2f8   : > { %6833 = vst [vmem:[#allocation168_spill] sm:$0xff] %v4496_v52  ;;  %1994 = vrot.lane.b32.xlu1 %v3650_v15, %s3430_s17  ;;  %v4513_v52 = vsub.s32 0, %v558_v13  ;;  %v555_v13 = vld [vmem:[%s6376_s3] ss:$8 sm:$0x3] }
 0x2f9   : > { %3264 = vset.pattern.permute.xlu1 %v6834_v46 }
 0x2fa   : > { %v4527_v50 = vrot.slane %v3072_v36, %v4513_v52  ;;  %v4547_v14 = vrot.slane %v555_v13, %v4513_v52 }
 0x2fb   : > { %v4503_v28 = vpop.permute.xlu1 %1844 }
 0x2fc   : > { %6836 = vst [vmem:[#allocation170_spill] sm:$0xff] %v4503_v28  ;;  %2002 = vrot.lane.b32.xlu1 %v3670_v34, %s3430_s17  ;;  %6840 = vst [vmem:[#allocation174_spill] sm:$0xff] %v4527_v50 }
 0x2ff   : > { %v4507_v16 = vpop.permute.xlu1 %1893 }
 0x300   : > { %6837 = vst [vmem:[#allocation171_spill] sm:$0xff] %v4507_v16  ;;  %2082 = vrot.lane.b32.xlu1 %v3745_v61, %s3433_s18  ;;  %v4530_v16 = vrot.slane %v3072_v36, %v4515_v45  ;;  %v4551_v36 = vmul.f32 %v4527_v50, %v3650_v15 }
 0x302   : > { %6841 = vst [vmem:[#allocation175_spill] sm:$0xff] %v4530_v16  ;;  %6844 = vst [vmem:[#allocation178_spill] sm:$0xff] %v4551_v36  ;;  %v4555_v6 = vmul.f32 %v4530_v16, %v3670_v34  ;;  %v4571_v36 = vmul.f32 %v4527_v50, %v3693_v43 }
 0x303   : > { %v4520_v28 = vpop.permute.xlu1 %1682 }
 0x304   : > { %6839 = vst [vmem:[#allocation173_spill] sm:$0xff] %v4520_v28  ;;  %2154 = vrot.lane.b32.xlu1 %v3633_v4, %s3434_s19  ;;  %v3061_v28 = vld [vmem:[%s6376_s3 + $0x1] ss:$8 sm:$0x3]  ;;  %6845 = vst [vmem:[#allocation179_spill] sm:$0xff] %v4555_v6  ;;  %v636_v6 = vsel %vm631_vm1, %v3895_v20, %v3865_v54 }
 0x305   : > { %v4561_v4 = vrot.slane %v3061_v28, %v4513_v52  ;;  %v4564_v11 = vrot.slane %v3061_v28, %v4515_v45  ;;  %6846 = vst [vmem:[#allocation180_spill] sm:$0xff] %v4571_v36  ;;  %v4584_v28 = vmul.f32 %v4527_v50, %v3704_v48  ;;  %v547_v36 = vsel %vm546_vm2, %v3859_v44, %v3883_v49 }
 0x306   : > { %v4604_v50 = vmul.f32 %v4530_v16, %v3738_v59  ;;  %v4615_v44 = vrot.slane %v3063_v30, %v4513_v52  ;;  %v4618_v49 = vrot.slane %v3063_v30, %v4515_v45  ;;  %v714_v30 = vsel %vm709_vm5, %v3953_v18, %v3870_v56 }
 0x307   : > { %v4540_v38 = vpop.permute.xlu1 %1690  ;;  %6847 = vst [vmem:[#allocation181_spill] sm:$0xff] %v4584_v28  ;;  %v4610_v28 = vmul.f32 %v4530_v16, %v3745_v61  ;;  %v653_v16 = vmul.f32 %v4561_v4, %v636_v6  ;;  %v567_v61 = vmul.f32 %v4547_v14, %v551_v29 }
 0x308   : > { %6843 = vst [vmem:[#allocation177_spill] sm:$0xff] %v4540_v38  ;;  %2162 = vrot.lane.b32.xlu1 %v3727_v55, %s3434_s19  ;;  %v4558_v38 = vrot.slane %v555_v13, %v4515_v45  ;;  %v632_v13 = vsel %vm631_vm1, %v3865_v54, %v3895_v20  ;;  %v3065_v20 = vld [vmem:[%s6376_s3 + $0x5] ss:$8 sm:$0x3]  ;;  %6849 = vst [vmem:[#allocation183_spill] sm:$0xff] %v4604_v50  ;;  %v710_v50 = vsel %vm709_vm5, %v3870_v56, %v3953_v18 }
 0x309   : > { %v3062_v54 = vld [vmem:[%s6376_s3 + $0x2] ss:$8 sm:$0x3]  ;;  %6851 = vst [vmem:[#allocation185_spill] sm:$0xff] %v4610_v28  ;;  %6852 = vst [vmem:[#allocation186_spill] sm:$0xff] %v4615_v44  ;;  %v654_v28 = vmul.f32 %v4564_v11, %v632_v13  ;;  %v4649_v47 = vrot.slane %v3065_v20, %v4513_v52  ;;  %v4652_v18 = vrot.slane %v3065_v20, %v4515_v45 }
 0x30a   : > { %6853 = vst [vmem:[#allocation187_spill] sm:$0xff] %v4618_v49  ;;  %v4638_v1 = vrot.slane %v3062_v54, %v4513_v52  ;;  %v4641_v6 = vrot.slane %v3062_v54, %v4515_v45  ;;  %v3066_v13 = vld [vmem:[%s6376_s3 + $0x6] ss:$8 sm:$0x3]  ;;  %v677_v20 = vmul.f32 %v3667_v33, %v653_v16  ;;  %v792_v16 = vsel %vm787_vm3, %v3904_v62, %v3885_v0 }
 0x30b   : > { %v4586_v34 = vpop.permute.xlu1 %1770  ;;  %6856 = vst [vmem:[#allocation190_spill] sm:$0xff] %v4649_v47  ;;  %6857 = vst [vmem:[#allocation191_spill] sm:$0xff] %v4652_v18  ;;  %v4669_v46 = vrot.slane %v3066_v13, %v4513_v52  ;;  %v4672_v55 = vrot.slane %v3066_v13, %v4515_v45  ;;  %v944_v13 = vsel %vm943_vm4, %v3906_v24, %v3915_v25 }
 0x30c   : > { %6848 = vst [vmem:[#allocation182_spill] sm:$0xff] %v4586_v34  ;;  %v4606_v34 = vpop.permute.xlu0 %1848  ;;  %2234 = vrot.lane.b32.xlu1 %v3693_v43, %s3437_s22  ;;  %v568_v43 = vmul.f32 %v4558_v38, %v547_v36  ;;  %6854 = vst [vmem:[#allocation188_spill] sm:$0xff] %v4641_v6  ;;  %v731_v56 = vmul.f32 %v4638_v1, %v714_v30  ;;  %v732_v36 = vmul.f32 %v4641_v6, %v710_v50  ;;  %v3067_v30 = vld [vmem:[%s6376_s3 + $0x7] ss:$8 sm:$0x3] }
 0x30d   : > { %6850 = vst [vmem:[#allocation184_spill] sm:$0xff] %v4606_v34  ;;  %v3064_v34 = vld [vmem:[%s6376_s3 + $0x4] ss:$8 sm:$0x3]  ;;  %6860 = vst [vmem:[#allocation194_spill] sm:$0xff] %v4669_v46 }
 0x30e   : > { %v4656_v29 = vrot.slane %v3064_v34, %v4513_v52  ;;  %v4663_v54 = vrot.slane %v3064_v34, %v4515_v45  ;;  %6861 = vst [vmem:[#allocation195_spill] sm:$0xff] %v4672_v55  ;;  %v599_v34 = vmul.f32 %v3749_v3, %v567_v61  ;;  %v866_v61 = vsel %vm865_vm6, %v3891_v2, %v3973_v31 }
 0x30f   : > { %v4646_v63 = vpop.permute.xlu1 %1842 }
 0x310   : > { %6855 = vst [vmem:[#allocation189_spill] sm:$0xff] %v4646_v63  ;;  %6858 = vst [vmem:[#allocation192_spill] sm:$0xff] %v4656_v29  ;;  %2242 = vrot.lane.b32.xlu1 %v3738_v59, %s3437_s22  ;;  %v678_v63 = vmul.f32 %v3667_v33, %v654_v28  ;;  %v4677_v50 = vpop.permute.xlu0 %1920  ;;  %v600_v59 = vmul.f32 %v3749_v3, %v568_v43  ;;  %v788_v33 = vsel %vm787_vm3, %v3885_v0, %v3904_v62 }
 0x311   : > { %6859 = vst [vmem:[#allocation193_spill] sm:$0xff] %v4663_v54  ;;  %6862 = vst [vmem:[#allocation196_spill] sm:$0xff] %v4677_v50  ;;  %v948_v43 = vsel %vm943_vm4, %v3915_v25, %v3906_v24  ;;  %v870_v0 = vsel %vm865_vm6, %v3973_v31, %v3891_v2  ;;  %v755_v62 = vmul.f32 %v3769_v9, %v731_v56  ;;  %v3068_v25 = vld [vmem:[%s6376_s3 + $0x10] ss:$8 sm:$0x3] }
 0x312   : > { %v756_v3 = vmul.f32 %v3769_v9, %v732_v36  ;;  %v4711_v50 = vrot.slane %v3067_v30, %v4513_v52  ;;  %v4714_v24 = vrot.slane %v3067_v30, %v4515_v45  ;;  %v686_v6 = vadd.f32 %v678_v63, %v600_v59 }
 0x313   : > { %v4689_v28 = vpop.permute.xlu1 %1850  ;;  %v809_v2 = vmul.f32 %v4615_v44, %v792_v16  ;;  %v810_v31 = vmul.f32 %v4618_v49, %v788_v33  ;;  %v966_v9 = vmul.f32 %v4652_v18, %v944_v13  ;;  %v887_v56 = vmul.f32 %v4656_v29, %v870_v0 }
 0x314   : > { %6863 = vst [vmem:[#allocation197_spill] sm:$0xff] %v4689_v28  ;;  %2365 = vperm.xlu1 %3264, %v4284_v19   ;;  %6864 = vst [vmem:[#allocation198_spill] sm:$0xff] %v4711_v50  ;;  %v685_v28 = vadd.f32 %v677_v20, %v599_v34  ;;  %v965_v19 = vmul.f32 %v4649_v47, %v948_v43  ;;  %v888_v36 = vmul.f32 %v4663_v54, %v866_v61  ;;  %v4741_v33 = vpop.permute.xlu0 %1967 }
 0x315   : > { %6865 = vst [vmem:[#allocation199_spill] sm:$0xff] %v4714_v24  ;;  %v549_v20 = vsel %vm546_vm2, %v3846_v40, %v3928_v60  ;;  %v553_v59 = vsel %vm546_vm2, %v3928_v60, %v3846_v40  ;;  %v4736_v63 = vrot.slane %v3068_v25, %v4513_v52  ;;  %v4739_v34 = vrot.slane %v3068_v25, %v4515_v45 }
 0x316   : > { %6869 = vst [vmem:[#allocation203_spill] sm:$0xff] %v4741_v33  ;;  %v763_v16 = vadd.f32 %v755_v62, %v685_v28  ;;  %v764_v13 = vadd.f32 %v756_v3, %v686_v6  ;;  %v1022_v43 = vsel %vm1021_vm7, %v3912_v37, %v3994_v21  ;;  %v1026_v40 = vsel %vm1021_vm7, %v3994_v21, %v3912_v37  ;;  %v6911_v33 = vld [vmem:[#allocation19_spill] sm:$0xff] }
 0x317   : > { %v4725_v30 = vpop.permute.xlu1 %1922  ;;  %6867 = vst [vmem:[#allocation201_spill] sm:$0xff] %v4736_v63  ;;  %6868 = vst [vmem:[#allocation202_spill] sm:$0xff] %v4739_v34  ;;  %v833_v60 = vmul.f32 %v3720_v53, %v809_v2  ;;  %v834_v61 = vmul.f32 %v3720_v53, %v810_v31  ;;  %v634_v6 = vsel %vm631_vm1, %v3844_v39, %v3933_v26  ;;  %v3069_v53 = vld [vmem:[%s6376_s3 + $0x11] ss:$8 sm:$0x3] }
 0x318   : > { %6866 = vst [vmem:[#allocation200_spill] sm:$0xff] %v4725_v30  ;;  %2072 = vrot.lane.b32.xlu1 %v3650_v15, %s3433_s18  ;;  %v638_v28 = vsel %vm631_vm1, %v3933_v26, %v3844_v39  ;;  %v989_v0 = vmul.f32 %v3779_v10, %v965_v19  ;;  %v990_v21 = vmul.f32 %v3779_v10, %v966_v9 }
 0x319   : > { %3265 = vset.pattern.permute.xlu1 %v6811_v58  ;;  %v911_v37 = vmul.f32 %v3800_v22, %v887_v56  ;;  %v912_v58 = vmul.f32 %v3800_v22, %v888_v36  ;;  %v4774_v3 = vmul.f32 %v4547_v14, %v553_v59  ;;  %v4777_v25 = vmul.f32 %v4558_v38, %v549_v20  ;;  %v4803_v20 = vpop.permute.xlu0 %2008 }
 0x31a   : > { %v1043_v26 = vmul.f32 %v4669_v46, %v1026_v40  ;;  %v1044_v10 = vmul.f32 %v4672_v55, %v1022_v43  ;;  %v4784_v22 = vmul.f32 %v4561_v4, %v638_v28  ;;  %v4787_v39 = vmul.f32 %v4564_v11, %v634_v6  ;;  %6877 = vst [vmem:[#allocation211_spill] sm:$0xff] %v4803_v20  ;;  %v6912_v20 = vld [vmem:[#allocation3_spill] sm:$0xff] }
 0x31b   : > { %v4771_v62 = vpop.permute.xlu1 %1930  ;;  %6871 = vst [vmem:[#allocation205_spill] sm:$0xff] %v4774_v3  ;;  %6872 = vst [vmem:[#allocation206_spill] sm:$0xff] %v4777_v25  ;;  %v841_v2 = vadd.f32 %v833_v60, %v763_v16  ;;  %v842_v31 = vadd.f32 %v834_v61, %v764_v13  ;;  %v712_v19 = vsel %vm709_vm5, %v3851_v41, %v3941_v5  ;;  %v6902_v25 = vld [vmem:[#allocation44_spill] sm:$0xff] }
 0x31c   : > { %6870 = vst [vmem:[#allocation204_spill] sm:$0xff] %v4771_v62  ;;  %2152 = vrot.lane.b32.xlu1 %v3704_v48, %s3434_s19  ;;  %6873 = vst [vmem:[#allocation207_spill] sm:$0xff] %v4784_v22  ;;  %v716_v9 = vsel %vm709_vm5, %v3941_v5, %v3851_v41  ;;  %v4798_v56 = vrot.slane %v3069_v53, %v4513_v52  ;;  %v4801_v36 = vrot.slane %v3069_v53, %v4515_v45 }
 0x31d   : > { %6874 = vst [vmem:[#allocation208_spill] sm:$0xff] %v4787_v39  ;;  %v919_v59 = vadd.f32 %v911_v37, %v841_v2  ;;  %v920_v16 = vadd.f32 %v912_v58, %v842_v31  ;;  %v550_v13 = vsel %vm546_vm2, %v4010_v12, %v3975_v35  ;;  %v554_v5 = vsel %vm546_vm2, %v3975_v35, %v4010_v12 }
 0x31e   : > { %6875 = vst [vmem:[#allocation209_spill] sm:$0xff] %v4798_v56  ;;  %6876 = vst [vmem:[#allocation210_spill] sm:$0xff] %v4801_v36  ;;  %v1067_v43 = vmul.f32 %v3827_v32, %v1043_v26  ;;  %v1068_v40 = vmul.f32 %v3827_v32, %v1044_v10  ;;  %v548_v60 = vsel %vm546_vm2, %v4021_v7, %v3985_v42 }
 0x31f   : > { %v4813_v41 = vpop.permute.xlu1 %2053  ;;  %v552_v61 = vsel %vm546_vm2, %v3985_v42, %v4021_v7  ;;  %v711_v12 = vsel %vm709_vm5, %v4034_v51, %v3996_v8  ;;  %v715_v32 = vsel %vm709_vm5, %v3996_v8, %v4034_v51  ;;  %v869_v35 = vsel %vm865_vm6, %v4042_v23, %v4006_v27  ;;  %v3070_v51 = vld [vmem:[%s6376_s3 + $0x12] ss:$8 sm:$0x3] }
 0x320   : > { %6878 = vst [vmem:[#allocation212_spill] sm:$0xff] %v4813_v41  ;;  %2197 = vperm.xlu1 %3265, %v4298_v17   ;;  %v873_v7 = vsel %vm865_vm6, %v4006_v27, %v4042_v23  ;;  %v4843_v42 = vmul.f32 %v4638_v1, %v716_v9  ;;  %v6880_v17 = vld [vmem:[#allocation188_spill] sm:$0xff]  ;;  %v573_v28 = vmul.f32 %v4547_v14, %v554_v5  ;;  %v6884_v9 = vld [vmem:[#allocation17_spill] sm:$0xff]  ;;  %vm1932_vm2 = vcmp.lt.s32.totalorder %v4524_v57, 111 }
 0x321   : > { %v4846_v6 = vmul.f32 %v6880_v17, %v712_v19  ;;  %v574_v8 = vmul.f32 %v4558_v38, %v550_v13  ;;  %v997_v37 = vadd.f32 %v989_v0, %v919_v59  ;;  %v998_v58 = vadd.f32 %v990_v21, %v920_v16  ;;  %v4861_v19 = vpop.permute.xlu0 %1918  ;;  %v6888_v16 = vld [vmem:[#allocation12_spill] sm:$0xff] }
 0x322   : > { %6879 = vst [vmem:[#allocation213_spill] sm:$0xff] %v4843_v42  ;;  %v569_v53 = vmul.f32 %v4547_v14, %v552_v61  ;;  %v570_v23 = vmul.f32 %v4558_v38, %v548_v60  ;;  %v733_v26 = vmul.f32 %v4638_v1, %v715_v32  ;;  %v734_v10 = vmul.f32 %v6880_v17, %v711_v12  ;;  %v6889_v60 = vld [vmem:[#allocation55_spill] sm:$0xff]  ;;  %v6890_v61 = vld [vmem:[#allocation62_spill] sm:$0xff]  ;;  %v6901_v42 = vld [vmem:[#allocation73_spill] sm:$0xff] }
 0x323   : > { %6881 = vst [vmem:[#allocation188_spill] sm:$0xff] %v4846_v6  ;;  %v4855_v27 = vpop.permute.xlu1 %1760  ;;  %v893_v2 = vmul.f32 %v4656_v29, %v873_v7  ;;  %v894_v31 = vmul.f32 %v4663_v54, %v869_v35  ;;  %6883 = vst [vmem:[#allocation215_spill] sm:$0xff] %v4861_v19  ;;  %v4865_v0 = vadd.f32 %v1067_v43, %v997_v37  ;;  %v6887_v59 = vmov 23   ;;  %v6891_v12 = vld [vmem:[#allocation2_spill] sm:$0xff] }
 0x324   : > { %6882 = vst [vmem:[#allocation214_spill] sm:$0xff] %v4855_v27  ;;  %2240 = vrot.lane.b32.xlu1 %v6884_v9, %s3437_s22  ;;  %v4867_v14 = vadd.f32 %v1068_v40, %v998_v58  ;;  %v4870_v38 = vrot.slane %v3070_v51, %v4513_v52  ;;  %v4873_v21 = vrot.slane %v3070_v51, %v4515_v45  ;;  %v6892_v7 = vld [vmem:[#allocation70_spill] sm:$0xff]  ;;  %v6895_v58 = vld [vmem:[#allocation9_spill] sm:$0xff] }
 0x325   : > { %3266 = vset.pattern.permute.xlu1 %v6887_v59  ;;  %v605_v13 = vmul.f32 %v6888_v16, %v573_v28  ;;  %v606_v5 = vmul.f32 %v6888_v16, %v574_v8  ;;  %v867_v43 = vsel %vm865_vm6, %v6890_v61, %v6889_v60  ;;  %v871_v40 = vsel %vm865_vm6, %v6889_v60, %v6890_v61  ;;  %v6893_v28 = vld [vmem:[#allocation43_spill] sm:$0xff]  ;;  %v3071_v61 = vld [vmem:[%s6376_s3 + $0x13] ss:$8 sm:$0x3] }
 0x326   : > { %6885 = vst [vmem:[#allocation216_spill] sm:$0xff] %v4870_v38  ;;  %6886 = vst [vmem:[#allocation217_spill] sm:$0xff] %v4873_v21  ;;  %v4887_v32 = vmul.f32 %v6891_v12, %v569_v53  ;;  %v4890_v35 = vmul.f32 %v6891_v12, %v570_v23  ;;  %v635_v8 = vsel %vm631_vm1, %v6893_v28, %v6892_v7  ;;  %v6896_v23 = vld [vmem:[#allocation24_spill] sm:$0xff]  ;;  %v4917_v12 = vpop.permute.xlu0 %1963 }
 0x327   : > { %v639_v51 = vsel %vm631_vm1, %v6892_v7, %v6893_v28  ;;  %v4900_v37 = vpop.permute.xlu1 %1840  ;;  %v4903_v59 = vmul.f32 %v6895_v58, %v733_v26  ;;  %v4906_v53 = vmul.f32 %v6895_v58, %v734_v10  ;;  %v4909_v16 = vmul.f32 %v6896_v23, %v893_v2  ;;  %6897 = vst [vmem:[#allocation55_spill] sm:$0xff] %v4917_v12  ;;  %v6898_v7 = vld [vmem:[#allocation10_spill] sm:$0xff]  ;;  %v6899_v28 = vld [vmem:[#allocation72_spill] sm:$0xff] }
 0x328   : > { %6894 = vst [vmem:[#allocation12_spill] sm:$0xff] %v4900_v37  ;;  %v4912_v60 = vmul.f32 %v6896_v23, %v894_v31  ;;  %2312 = vrot.lane.b32.xlu1 %v6898_v7, %s3438_s23  ;;  %v889_v26 = vmul.f32 %v4656_v29, %v871_v40  ;;  %v890_v10 = vmul.f32 %v4663_v54, %v867_v43  ;;  %v6900_v58 = vld [vmem:[#allocation54_spill] sm:$0xff]  ;;  %v6903_v54 = vld [vmem:[#allocation75_spill] sm:$0xff]  ;;  %v6904_v29 = vld [vmem:[#allocation57_spill] sm:$0xff] }
 0x329   : > { %v713_v2 = vsel %vm709_vm5, %v6900_v58, %v6899_v28  ;;  %v717_v31 = vsel %vm709_vm5, %v6899_v28, %v6900_v58  ;;  %v659_v23 = vmul.f32 %v4561_v4, %v639_v51  ;;  %v660_v6 = vmul.f32 %v4564_v11, %v635_v8 }
 0x32a   : > { %v633_v40 = vsel %vm631_vm1, %v6902_v25, %v6901_v42  ;;  %v637_v43 = vsel %vm631_vm1, %v6901_v42, %v6902_v25  ;;  %v791_v3 = vsel %vm787_vm3, %v6904_v29, %v6903_v54  ;;  %v795_v8 = vsel %vm787_vm3, %v6903_v54, %v6904_v29  ;;  %v6908_v25 = vld [vmem:[#allocation56_spill] sm:$0xff]  ;;  %v6909_v42 = vld [vmem:[#allocation63_spill] sm:$0xff] }
 0x32b   : > { %v4950_v51 = vrot.slane %v3071_v61, %v4513_v52  ;;  %v4953_v28 = vrot.slane %v3071_v61, %v4515_v45  ;;  %v4955_v58 = vpop.permute.xlu1 %1885  ;;  %v1025_v39 = vsel %vm1021_vm7, %v6909_v42, %v6908_v25  ;;  %v1029_v29 = vsel %vm1021_vm7, %v6908_v25, %v6909_v42  ;;  %v6910_v61 = vld [vmem:[#allocation125_spill] sm:$0xff] }
 0x32c   : > { %6907 = vst [vmem:[#allocation70_spill] sm:$0xff] %v4955_v58  ;;  %v737_v54 = vmul.f32 %v4638_v1, %v717_v31  ;;  %v738_v22 = vmul.f32 %v6880_v17, %v713_v2  ;;  %2361 = vperm.xlu1 %3266, %v6910_v61   ;;  %v4970_v12 = vmul.f32 %v6911_v33, %v889_v26  ;;  %v4982_v31 = vpop.permute.xlu0 %2045  ;;  %vm1854_vm1 = vcmp.lt.s32.totalorder %v4524_v57, 112 }
 0x32d   : > { %6905 = vst [vmem:[#allocation62_spill] sm:$0xff] %v4950_v51  ;;  %6906 = vst [vmem:[#allocation2_spill] sm:$0xff] %v4953_v28  ;;  %v4973_v58 = vmul.f32 %v6911_v33, %v890_v10  ;;  %v655_v19 = vmul.f32 %v4561_v4, %v637_v43  ;;  %v656_v41 = vmul.f32 %v4564_v11, %v633_v40  ;;  %v6914_v10 = vld [vmem:[#allocation58_spill] sm:$0xff]  ;;  %v6915_v4 = vld [vmem:[#allocation67_spill] sm:$0xff]  ;;  %vm2010_vm5 = vcmp.lt.s32.totalorder %v4524_v57, 110 }
 0x32e   : > { %v683_v25 = vmul.f32 %v6912_v20, %v659_v23  ;;  %v684_v1 = vmul.f32 %v6912_v20, %v660_v6  ;;  %v815_v17 = vmul.f32 %v4615_v44, %v795_v8  ;;  %v816_v2 = vmul.f32 %v4618_v49, %v791_v3  ;;  %6913 = vst [vmem:[#allocation43_spill] sm:$0xff] %v4982_v31  ;;  %v6917_v23 = vld [vmem:[#allocation16_spill] sm:$0xff]  ;;  %v6918_v43 = vld [vmem:[#allocation77_spill] sm:$0xff]  ;;  %v6924_v31 = vld [vmem:[#allocation18_spill] sm:$0xff] }
 0x32f   : > { %v1049_v26 = vmul.f32 %v4669_v46, %v1029_v29  ;;  %v1050_v33 = vmul.f32 %v4672_v55, %v1025_v39  ;;  %v1023_v11 = vsel %vm1021_vm7, %v6915_v4, %v6914_v10  ;;  %v1027_v20 = vsel %vm1021_vm7, %v6914_v10, %v6915_v4  ;;  %v4994_v6 = vpop.permute.xlu1 %1928  ;;  %v6919_v8 = vld [vmem:[#allocation45_spill] sm:$0xff]  ;;  %v6920_v29 = vld [vmem:[#allocation6_spill] sm:$0xff]  ;;  %v6922_v4 = vld [vmem:[#allocation60_spill] sm:$0xff] }
 0x330   : > { %6916 = vst [vmem:[#allocation9_spill] sm:$0xff] %v4994_v6  ;;  %v761_v3 = vmul.f32 %v6917_v23, %v737_v54  ;;  %v762_v40 = vmul.f32 %v6917_v23, %v738_v22  ;;  %v789_v39 = vsel %vm787_vm3, %v6919_v8, %v6918_v43  ;;  %v793_v42 = vsel %vm787_vm3, %v6918_v43, %v6919_v8  ;;  %v6921_v54 = vld [vmem:[#allocation78_spill] sm:$0xff] }
 0x331   : > { %2150 = vrot.lane.b32.xlu1 %v3650_v15, %s3434_s19  ;;  %v679_v61 = vmul.f32 %v6920_v29, %v655_v19  ;;  %v680_v10 = vmul.f32 %v6920_v29, %v656_v41  ;;  %v947_v22 = vsel %vm943_vm4, %v6922_v4, %v6921_v54  ;;  %v951_v23 = vsel %vm943_vm4, %v6921_v54, %v6922_v4 }
 0x332   : > { %v6923_v6 = vmov 2   ;;  %v691_v43 = vadd.f32 %v683_v25, %v605_v13  ;;  %v692_v8 = vadd.f32 %v684_v1, %v606_v5  ;;  %v839_v37 = vmul.f32 %v6924_v31, %v815_v17  ;;  %v5029_v5 = vpop.permute.xlu0 %2131  ;;  %v6925_v25 = vld [vmem:[#allocation7_spill] sm:$0xff]  ;;  %v6927_v17 = vld [vmem:[#allocation68_spill] sm:$0xff] }
 0x333   : > { %3269 = vset.pattern.permute.xlu1 %v6923_v6  ;;  %v840_v19 = vmul.f32 %v6924_v31, %v816_v2  ;;  %v1045_v41 = vmul.f32 %v4669_v46, %v1027_v20  ;;  %v1046_v29 = vmul.f32 %v4672_v55, %v1023_v11  ;;  %v811_v27 = vmul.f32 %v4615_v44, %v793_v42  ;;  %v5025_v62 = vpop.permute.xlu1 %2000  ;;  %v6926_v1 = vld [vmem:[#allocation59_spill] sm:$0xff]  ;;  %v6957_v55 = vld [vmem:[#allocation76_spill] sm:$0xff] }
 0x334   : > { %v812_v30 = vmul.f32 %v4618_v49, %v789_v39  ;;  %v769_v48 = vadd.f32 %v761_v3, %v691_v43  ;;  %v770_v54 = vadd.f32 %v762_v40, %v692_v8  ;;  %v971_v4 = vmul.f32 %v4649_v47, %v951_v23  ;;  %v6928_v39 = vld [vmem:[#allocation81_spill] sm:$0xff]  ;;  %v6929_v42 = vld [vmem:[#allocation47_spill] sm:$0xff]  ;;  %v6930_v43 = vld [vmem:[#allocation14_spill] sm:$0xff] }
 0x335   : > { %v972_v13 = vmul.f32 %v4652_v18, %v947_v22  ;;  %2158 = vrot.lane.b32.xlu1 %v6925_v25, %s3434_s19  ;;  %v1181_v2 = vsel %vm1177_vm8, %v6927_v17, %v6926_v1  ;;  %v1185_v31 = vsel %vm1177_vm8, %v6926_v1, %v6927_v17  ;;  %v687_v11 = vadd.f32 %v679_v61, %v4887_v32  ;;  %v6931_v61 = vld [vmem:[#allocation83_spill] sm:$0xff]  ;;  %v6934_v1 = vld [vmem:[#allocation22_spill] sm:$0xff]  ;;  %v6935_v17 = vld [vmem:[#allocation21_spill] sm:$0xff]  ;;  %s3444_s19 = smov 124  }
 0x336   : > { %v688_v20 = vadd.f32 %v680_v10, %v4890_v35  ;;  %v847_v3 = vadd.f32 %v839_v37, %v769_v48  ;;  %v848_v40 = vadd.f32 %v840_v19, %v770_v54  ;;  %v945_v22 = vsel %vm943_vm4, %v6929_v42, %v6928_v39  ;;  %v6932_v35 = vld [vmem:[#allocation65_spill] sm:$0xff]  ;;  %v6988_v46 = vld [vmem:[#allocation124_spill] sm:$0xff] }
 0x337   : > { %v949_v23 = vsel %vm943_vm4, %v6928_v39, %v6929_v42  ;;  %v835_v8 = vmul.f32 %v6930_v43, %v811_v27  ;;  %v836_v32 = vmul.f32 %v6930_v43, %v812_v30  ;;  %v1103_v48 = vsel %vm1099_vm9, %v6932_v35, %v6931_v61  ;;  %v5062_v10 = vpop.permute.xlu1 %2049 }
 0x338   : > { %v1107_v37 = vsel %vm1099_vm9, %v6931_v61, %v6932_v35  ;;  %6933 = vst [vmem:[#allocation24_spill] sm:$0xff] %v5062_v10  ;;  %v1205_v19 = vmul.f32 %v4736_v63, %v1185_v31  ;;  %v1206_v54 = vmul.f32 %v4739_v34, %v1181_v2  ;;  %v995_v27 = vmul.f32 %v6934_v1, %v971_v4 }
 0x339   : > { %v996_v30 = vmul.f32 %v6934_v1, %v972_v13  ;;  %2238 = vrot.lane.b32.xlu1 %v6935_v17, %s3437_s22  ;;  %v765_v39 = vadd.f32 %v4903_v59, %v687_v11  ;;  %v766_v42 = vadd.f32 %v4906_v53, %v688_v20  ;;  %v967_v43 = vmul.f32 %v4649_v47, %v949_v23  ;;  %v5078_v13 = vpop.permute.xlu0 %2127  ;;  %v6937_v1 = vld [vmem:[#allocation28_spill] sm:$0xff]  ;;  %v6941_v23 = vld [vmem:[#allocation27_spill] sm:$0xff] }
 0x33a   : > { %v968_v61 = vmul.f32 %v4652_v18, %v945_v22  ;;  %v925_v35 = vadd.f32 %v4909_v16, %v847_v3  ;;  %v926_v31 = vadd.f32 %v4912_v60, %v848_v40  ;;  %v1127_v2 = vmul.f32 %v4711_v50, %v1107_v37  ;;  %6936 = vst [vmem:[#allocation10_spill] sm:$0xff] %v5078_v13  ;;  %v6938_v3 = vld [vmem:[#allocation85_spill] sm:$0xff] }
 0x33b   : > { %v1128_v4 = vmul.f32 %v4714_v24, %v1103_v48  ;;  %v1073_v10 = vmul.f32 %v6937_v1, %v1049_v26  ;;  %v1074_v59 = vmul.f32 %v6937_v1, %v1050_v33  ;;  %v843_v11 = vadd.f32 %v835_v8, %v765_v39  ;;  %v5083_v20 = vpop.permute.xlu1 %1838  ;;  %v6939_v60 = vld [vmem:[#allocation49_spill] sm:$0xff]  ;;  %v6940_v33 = vld [vmem:[#allocation4_spill] sm:$0xff] }
 0x33c   : > { %v844_v53 = vadd.f32 %v836_v32, %v766_v42  ;;  %v1003_v22 = vadd.f32 %v995_v27, %v925_v35  ;;  %v1004_v16 = vadd.f32 %v996_v30, %v926_v31  ;;  %v1101_v40 = vsel %vm1099_vm9, %v6939_v60, %v6938_v3  ;;  %v6942_v48 = vld [vmem:[#allocation25_spill] sm:$0xff] }
 0x33d   : > { %v1105_v26 = vsel %vm1099_vm9, %v6938_v3, %v6939_v60  ;;  %2310 = vrot.lane.b32.xlu1 %v6940_v33, %s3438_s23  ;;  %v1069_v8 = vmul.f32 %v6941_v23, %v1045_v41  ;;  %v1070_v32 = vmul.f32 %v6941_v23, %v1046_v29  ;;  %v991_v37 = vmul.f32 %v6942_v48, %v967_v43  ;;  %v3073_v30 = vld [vmem:[%s6376_s3 + $0x15] ss:$8 sm:$0x3] }
 0x33e   : > { %v992_v27 = vmul.f32 %v6942_v48, %v968_v61  ;;  %v6943_v39 = vld [vmem:[#allocation33_spill] sm:$0xff]  ;;  %v921_v41 = vadd.f32 %v4970_v12, %v843_v11  ;;  %v922_v29 = vadd.f32 %v4973_v58, %v844_v53  ;;  %v1123_v43 = vmul.f32 %v4711_v50, %v1105_v26  ;;  %v6948_v11 = vld [vmem:[#allocation87_spill] sm:$0xff] }
 0x33f   : > { %v1229_v42 = vmul.f32 %v6943_v39, %v1205_v19  ;;  %v1230_v35 = vmul.f32 %v6943_v39, %v1206_v54  ;;  %v6944_v31 = vld [vmem:[#allocation29_spill] sm:$0xff]  ;;  %v1124_v61 = vmul.f32 %v4714_v24, %v1101_v40  ;;  %v5110_v60 = vpop.permute.xlu1 %1846  ;;  %v1081_v23 = vadd.f32 %v1073_v10, %v1003_v22  ;;  %v6950_v40 = vld [vmem:[#allocation92_spill] sm:$0xff] }
 0x340   : > { %v1151_v1 = vmul.f32 %v6944_v31, %v1127_v2  ;;  %v1152_v3 = vmul.f32 %v6944_v31, %v1128_v4  ;;  %v1082_v48 = vadd.f32 %v1074_v59, %v1004_v16  ;;  %v5114_v19 = vrot.slane %v3073_v30, %v4513_v52  ;;  %v5119_v2 = vpop.permute.xlu0 %1924  ;;  %v6947_v4 = vld [vmem:[#allocation89_spill] sm:$0xff]  ;;  %v6949_v16 = vld [vmem:[#allocation66_spill] sm:$0xff] }
 0x341   : > { %v5117_v54 = vrot.slane %v3073_v30, %v4515_v45  ;;  %2318 = vrot.lane.b32.xlu1 %v6884_v9, %s3438_s23  ;;  %v999_v12 = vadd.f32 %v991_v37, %v921_v41  ;;  %v1000_v58 = vadd.f32 %v992_v27, %v922_v29  ;;  %v1259_v10 = vsel %vm1255_vm10, %v6948_v11, %v6947_v4  ;;  %v6951_v27 = vld [vmem:[#allocation32_spill] sm:$0xff]  ;;  %v6952_v31 = vld [vmem:[#allocation69_spill] sm:$0xff]  ;;  %v6953_v41 = vld [vmem:[#allocation94_spill] sm:$0xff] }
 0x342   : > { %6945 = vst [vmem:[#allocation72_spill] sm:$0xff] %v5114_v19  ;;  %v1263_v59 = vsel %vm1255_vm10, %v6947_v4, %v6948_v11  ;;  %v1159_v53 = vadd.f32 %v1151_v1, %v1081_v23  ;;  %v1160_v22 = vadd.f32 %v1152_v3, %v1082_v48  ;;  %v1100_v26 = vsel %vm1099_vm9, %v6950_v40, %v6949_v16  ;;  %v6954_v23 = vld [vmem:[#allocation178_spill] sm:$0xff]  ;;  %v6956_v11 = vld [vmem:[#allocation179_spill] sm:$0xff] }
 0x343   : > { %6946 = vst [vmem:[#allocation54_spill] sm:$0xff] %v5117_v54  ;;  %v1104_v37 = vsel %vm1099_vm9, %v6949_v16, %v6950_v40  ;;  %v1147_v30 = vmul.f32 %v6951_v27, %v1123_v43  ;;  %v1148_v39 = vmul.f32 %v6951_v27, %v1124_v61  ;;  %v1179_v1 = vsel %vm1177_vm8, %v6953_v41, %v6952_v31  ;;  %v5149_v29 = vpop.permute.xlu1 %1926  ;;  %v6955_v48 = vld [vmem:[#allocation106_spill] sm:$0xff] }
 0x344   : > { %v1183_v3 = vsel %vm1177_vm8, %v6952_v31, %v6953_v41  ;;  %v5153_v4 = vmul.f32 %v6955_v48, %v6954_v23  ;;  %v5157_v43 = vmul.f32 %v6955_v48, %v6956_v11  ;;  %v1283_v61 = vmul.f32 %v4798_v56, %v1263_v59  ;;  %v6958_v48 = vld [vmem:[#allocation99_spill] sm:$0xff]  ;;  %v6962_v11 = vld [vmem:[#allocation104_spill] sm:$0xff] }
 0x345   : > { %v1284_v16 = vmul.f32 %v4801_v36, %v1259_v10  ;;  %2390 = vrot.lane.b32.xlu1 %v6898_v7, %s3441_s11  ;;  %v1077_v40 = vadd.f32 %v1069_v8, %v999_v12  ;;  %v1078_v27 = vadd.f32 %v1070_v32, %v1000_v58  ;;  %v1121_v31 = vmul.f32 %v4711_v50, %v1104_v37  ;;  %v5175_v8 = vpop.permute.xlu0 %2004  ;;  %v6961_v37 = vld [vmem:[#allocation61_spill] sm:$0xff] }
 0x346   : > { %v1122_v41 = vmul.f32 %v4714_v24, %v1100_v26  ;;  %v1201_v23 = vmul.f32 %v4736_v63, %v1183_v3  ;;  %v1202_v13 = vmul.f32 %v4739_v34, %v1179_v1  ;;  %v1337_v59 = vsel %vm1333_vm11, %v6958_v48, %v6957_v55  ;;  %6959 = vst [vmem:[#allocation73_spill] sm:$0xff] %v5175_v8  ;;  %v6963_v24 = vld [vmem:[#allocation102_spill] sm:$0xff] }
 0x347   : > { %v1341_v7 = vsel %vm1333_vm11, %v6957_v55, %v6958_v48  ;;  %v1155_v32 = vadd.f32 %v1147_v30, %v1077_v40  ;;  %v1156_v12 = vadd.f32 %v1148_v39, %v1078_v27  ;;  %v1237_v58 = vadd.f32 %v1229_v42, %v1159_v53  ;;  %v5177_v26 = vpop.permute.xlu1 %1998  ;;  %v6964_v30 = vld [vmem:[#allocation20_spill] sm:$0xff]  ;;  %v6965_v53 = vld [vmem:[#allocation105_spill] sm:$0xff]  ;;  %v6968_v27 = vld [vmem:[#allocation35_spill] sm:$0xff] }
 0x348   : > { %v1238_v10 = vadd.f32 %v1230_v35, %v1160_v22  ;;  %6960 = vst [vmem:[#allocation44_spill] sm:$0xff] %v5177_v26  ;;  %v1307_v1 = vmul.f32 %v6961_v37, %v1283_v61  ;;  %v1308_v3 = vmul.f32 %v6961_v37, %v1284_v16  ;;  %v1178_v50 = vsel %vm1177_vm8, %v6963_v24, %v6962_v11  ;;  %v6966_v22 = vld [vmem:[#allocation79_spill] sm:$0xff]  ;;  %v6967_v16 = vld [vmem:[#allocation34_spill] sm:$0xff] }
 0x349   : > { %v1182_v55 = vsel %vm1177_vm8, %v6962_v11, %v6963_v24  ;;  %2398 = vrot.lane.b32.xlu1 %v6964_v30, %s3441_s11  ;;  %v1361_v42 = vmul.f32 %v4870_v38, %v1341_v7  ;;  %v1362_v35 = vmul.f32 %v4873_v21, %v1337_v59  ;;  %v1257_v39 = vsel %vm1255_vm10, %v6966_v22, %v6965_v53  ;;  %v3074_v59 = vld [vmem:[%s6376_s3 + $0x16] ss:$8 sm:$0x3]  ;;  %v6970_v26 = vld [vmem:[#allocation111_spill] sm:$0xff] }
 0x34a   : > { %v1261_v61 = vsel %vm1255_vm10, %v6965_v53, %v6966_v22  ;;  %v1145_v40 = vmul.f32 %v6967_v16, %v1121_v31  ;;  %v1146_v24 = vmul.f32 %v6967_v16, %v1122_v41  ;;  %v1225_v48 = vmul.f32 %v6968_v27, %v1201_v23  ;;  %v6969_v30 = vld [vmem:[#allocation112_spill] sm:$0xff]  ;;  %v5222_v16 = vpop.permute.xlu0 %2076 }
 0x34b   : > { %v1226_v7 = vmul.f32 %v6968_v27, %v1202_v13  ;;  %v1199_v37 = vmul.f32 %v4736_v63, %v1182_v55  ;;  %v1200_v11 = vmul.f32 %v4739_v34, %v1178_v50  ;;  %v1415_v53 = vsel %vm1411_vm12, %v6970_v26, %v6969_v30  ;;  %v5218_v41 = vpop.permute.xlu1 %2006  ;;  %6972 = vst [vmem:[#allocation57_spill] sm:$0xff] %v5222_v16  ;;  %v6973_v50 = vld [vmem:[#allocation90_spill] sm:$0xff]  ;;  %v6987_v63 = vld [vmem:[#allocation127_spill] sm:$0xff] }
 0x34c   : > { %v1419_v31 = vsel %vm1411_vm12, %v6969_v30, %v6970_v26  ;;  %6971 = vst [vmem:[#allocation75_spill] sm:$0xff] %v5218_v41  ;;  %v1315_v13 = vadd.f32 %v1307_v1, %v1237_v58  ;;  %v1316_v23 = vadd.f32 %v1308_v3, %v1238_v10  ;;  %v1279_v22 = vmul.f32 %v4798_v56, %v1261_v61  ;;  %v6976_v30 = vld [vmem:[#allocation95_spill] sm:$0xff]  ;;  %v6977_v41 = vld [vmem:[#allocation74_spill] sm:$0xff] }
 0x34d   : > { %v1280_v55 = vmul.f32 %v4801_v36, %v1257_v39  ;;  %2228 = vrot.lane.b32.xlu1 %v3650_v15, %s3437_s22  ;;  %v1385_v27 = vmul.f32 %v6973_v50, %v1361_v42  ;;  %v1386_v34 = vmul.f32 %v6973_v50, %v1362_v35  ;;  %v5230_v26 = vrot.slane %v3074_v59, %v4513_v52  ;;  %v3075_v42 = vld [vmem:[%s6376_s3 + $0x17] ss:$8 sm:$0x3] }
 0x34e   : > { %v5233_v58 = vrot.slane %v3074_v59, %v4515_v45  ;;  %v1153_v10 = vadd.f32 %v1145_v40, %v4865_v0  ;;  %v1154_v1 = vadd.f32 %v1146_v24, %v4867_v14  ;;  %v1439_v3 = vmul.f32 %v4950_v51, %v1419_v31  ;;  %v6978_v40 = vld [vmem:[#allocation91_spill] sm:$0xff]  ;;  %v6979_v24 = vld [vmem:[#allocation117_spill] sm:$0xff] }
 0x34f   : > { %6974 = vst [vmem:[#allocation56_spill] sm:$0xff] %v5230_v26  ;;  %v1440_v39 = vmul.f32 %v4953_v28, %v1415_v53  ;;  %v1233_v35 = vadd.f32 %v1225_v48, %v1155_v32  ;;  %v1234_v61 = vadd.f32 %v1226_v7, %v1156_v12  ;;  %v1223_v50 = vmul.f32 %v6976_v30, %v1199_v37  ;;  %v5244_v59 = vpop.permute.xlu1 %2078 }
 0x350   : > { %6975 = vst [vmem:[#allocation63_spill] sm:$0xff] %v5233_v58  ;;  %v1224_v16 = vmul.f32 %v6976_v30, %v1200_v11  ;;  %v1303_v0 = vmul.f32 %v6977_v41, %v1279_v22  ;;  %v1304_v14 = vmul.f32 %v6977_v41, %v1280_v55  ;;  %v1335_v53 = vsel %vm1333_vm11, %v6979_v24, %v6978_v40  ;;  %v6981_v11 = vld [vmem:[#allocation84_spill] sm:$0xff] }
 0x351   : > { %v1339_v32 = vsel %vm1333_vm11, %v6978_v40, %v6979_v24  ;;  %2236 = vrot.lane.b32.xlu1 %v6925_v25, %s3437_s22  ;;  %v1393_v12 = vadd.f32 %v1385_v27, %v1315_v13  ;;  %v1394_v48 = vadd.f32 %v1386_v34, %v1316_v23  ;;  %v5259_v7 = vrot.slane %v3075_v42, %v4513_v52  ;;  %v6982_v22 = vld [vmem:[#allocation88_spill] sm:$0xff]  ;;  %v5274_v25 = vpop.permute.xlu0 %2123  ;;  %s3445_s22 = smov 122  }
 0x352   : > { %v5262_v37 = vrot.slane %v3075_v42, %v4515_v45  ;;  %v1463_v31 = vmul.f32 %v6981_v11, %v1439_v3  ;;  %v1464_v41 = vmul.f32 %v6981_v11, %v1440_v39  ;;  %v6983_v55 = vld [vmem:[#allocation116_spill] sm:$0xff]  ;;  %6984 = vst [vmem:[#allocation19_spill] sm:$0xff] %v5274_v25  ;;  %v1357_v13 = vmul.f32 %v4870_v38, %v1339_v32  ;;  %v6986_v3 = vld [vmem:[#allocation98_spill] sm:$0xff]  ;;  %v7028_v25 = vld [vmem:[#allocation13_spill] sm:$0xff] }
 0x353   : > { %v1256_v30 = vsel %vm1255_vm10, %v6983_v55, %v6982_v22  ;;  %v1260_v34 = vsel %vm1255_vm10, %v6982_v22, %v6983_v55  ;;  %v1358_v23 = vmul.f32 %v4873_v21, %v1335_v53  ;;  %v6985_v27 = vld [vmem:[#allocation128_spill] sm:$0xff]  ;;  %v5286_v40 = vpop.permute.xlu1 %2086  ;;  %v1231_v24 = vadd.f32 %v1223_v50, %v1153_v10 }
 0x354   : > { %6980 = vst [vmem:[#allocation125_spill] sm:$0xff] %v5262_v37  ;;  %v1413_v39 = vsel %vm1411_vm12, %v6986_v3, %v6985_v27  ;;  %v1417_v42 = vsel %vm1411_vm12, %v6985_v27, %v6986_v3  ;;  %v1232_v11 = vadd.f32 %v1224_v16, %v1154_v1  ;;  %v1311_v22 = vadd.f32 %v1303_v0, %v1233_v35  ;;  %v6989_v10 = vld [vmem:[#allocation180_spill] sm:$0xff]  ;;  %v6990_v1 = vld [vmem:[#allocation114_spill] sm:$0xff] }
 0x355   : > { %v1312_v55 = vadd.f32 %v1304_v14, %v1234_v61  ;;  %2316 = vrot.lane.b32.xlu1 %v6935_v17, %s3438_s23  ;;  %v1277_v53 = vmul.f32 %v4798_v56, %v1260_v34  ;;  %v1278_v32 = vmul.f32 %v4801_v36, %v1256_v30  ;;  %v1334_v27 = vsel %vm1333_vm11, %v6988_v46, %v6987_v63  ;;  %v6991_v61 = vld [vmem:[#allocation183_spill] sm:$0xff]  ;;  %v6992_v3 = vld [vmem:[#allocation82_spill] sm:$0xff] }
 0x356   : > { %v1338_v16 = vsel %vm1333_vm11, %v6987_v63, %v6988_v46  ;;  %v1516_v35 = vmul.f32 %v6990_v1, %v6989_v10  ;;  %v1517_v17 = vmul.f32 %v6990_v1, %v6991_v61  ;;  %v1435_v50 = vmul.f32 %v4950_v51, %v1417_v42  ;;  %v3076_v14 = vld [vmem:[%s6376_s3 + $0x20] ss:$8 sm:$0x3]  ;;  %v6994_v42 = vld [vmem:[#allocation132_spill] sm:$0xff] }
 0x357   : > { %v1436_v0 = vmul.f32 %v4953_v28, %v1413_v39  ;;  %v1471_v30 = vadd.f32 %v1463_v31, %v1393_v12  ;;  %v1472_v34 = vadd.f32 %v1464_v41, %v1394_v48  ;;  %v1381_v36 = vmul.f32 %v6992_v3, %v1357_v13  ;;  %v5312_v63 = vpop.permute.xlu1 %2209  ;;  %v6993_v61 = vld [vmem:[#allocation103_spill] sm:$0xff]  ;;  %v5324_v48 = vpop.permute.xlu0 %2164  ;;  %v6995_v31 = vld [vmem:[#allocation80_spill] sm:$0xff] }
 0x358   : > { %v1382_v46 = vmul.f32 %v6992_v3, %v1358_v23  ;;  %v1355_v10 = vmul.f32 %v4870_v38, %v1338_v16  ;;  %v1356_v1 = vmul.f32 %v4873_v21, %v1334_v27  ;;  %v1546_v39 = vsel %vm1542_vm13, %v6994_v42, %v6993_v61  ;;  %v6998_v16 = vld [vmem:[#allocation96_spill] sm:$0xff]  ;;  %v7000_v21 = vld [vmem:[#allocation135_spill] sm:$0xff] }
 0x359   : > { %v1550_v12 = vsel %vm1542_vm13, %v6993_v61, %v6994_v42  ;;  %2388 = vrot.lane.b32.xlu1 %v6940_v33, %s3441_s11  ;;  %v1301_v41 = vmul.f32 %v6995_v31, %v1277_v53  ;;  %v1302_v13 = vmul.f32 %v6995_v31, %v1278_v32  ;;  %v5332_v23 = vrot.slane %v3076_v14, %v4513_v52  ;;  %v6999_v42 = vld [vmem:[#allocation137_spill] sm:$0xff] }
 0x35a   : > { %v5335_v27 = vrot.slane %v3076_v14, %v4515_v45  ;;  %v1459_v3 = vmul.f32 %v6998_v16, %v1435_v50  ;;  %v1460_v61 = vmul.f32 %v6998_v16, %v1436_v0  ;;  %v1412_v33 = vsel %vm1411_vm12, %v7000_v21, %v6999_v42  ;;  %v7001_v16 = vld [vmem:[#allocation119_spill] sm:$0xff] }
 0x35b   : > { %6996 = vst [vmem:[#allocation3_spill] sm:$0xff] %v5332_v23  ;;  %v1416_v53 = vsel %vm1411_vm12, %v6999_v42, %v7000_v21  ;;  %v1524_v32 = vadd.f32 %v1516_v35, %v1471_v30  ;;  %v1525_v31 = vadd.f32 %v1517_v17, %v1472_v34  ;;  %v1570_v38 = vmul.f32 %v5114_v19, %v1546_v39  ;;  %v5349_v56 = vpop.permute.xlu1 %1916  ;;  %v7002_v34 = vld [vmem:[#allocation181_spill] sm:$0xff] }
 0x35c   : > { %6997 = vst [vmem:[#allocation58_spill] sm:$0xff] %v5335_v27  ;;  %v1571_v14 = vmul.f32 %v5117_v54, %v1550_v12  ;;  %v1389_v50 = vadd.f32 %v1381_v36, %v1311_v22  ;;  %v1390_v0 = vadd.f32 %v1382_v46, %v1312_v55  ;;  %v1379_v18 = vmul.f32 %v7001_v16, %v1355_v10  ;;  %v3077_v36 = vld [vmem:[%s6376_s3 + $0x21] ss:$8 sm:$0x3]  ;;  %v5365_v12 = vpop.permute.xlu0 %2074 }
 0x35d   : > { %v1380_v47 = vmul.f32 %v7001_v16, %v1356_v1  ;;  %2396 = vrot.lane.b32.xlu1 %v6884_v9, %s3441_s11  ;;  %v1309_v21 = vadd.f32 %v1301_v41, %v1231_v24  ;;  %v1310_v35 = vadd.f32 %v1302_v13, %v1232_v11  ;;  %v1433_v17 = vmul.f32 %v4950_v51, %v1416_v53  ;;  %v7003_v46 = vld [vmem:[#allocation130_spill] sm:$0xff]  ;;  %v7004_v1 = vld [vmem:[#allocation185_spill] sm:$0xff]  ;;  %v7006_v24 = vld [vmem:[#allocation108_spill] sm:$0xff] }
 0x35e   : > { %v1434_v30 = vmul.f32 %v4953_v28, %v1412_v33  ;;  %v1467_v22 = vadd.f32 %v1459_v3, %v1389_v50  ;;  %v1468_v55 = vadd.f32 %v1460_v61, %v1390_v0  ;;  %v1512_v10 = vmul.f32 %v7003_v46, %v7002_v34  ;;  %7005 = vst [vmem:[#allocation67_spill] sm:$0xff] %v5365_v12  ;;  %v7007_v13 = vld [vmem:[#allocation142_spill] sm:$0xff]  ;;  %v7008_v33 = vld [vmem:[#allocation141_spill] sm:$0xff] }
 0x35f   : > { %v1513_v39 = vmul.f32 %v7003_v46, %v7004_v1  ;;  %v1594_v11 = vmul.f32 %v7006_v24, %v1570_v38  ;;  %v1595_v41 = vmul.f32 %v7006_v24, %v1571_v14  ;;  %v1624_v42 = vsel %vm6647_vm14, %v7008_v33, %v7007_v13  ;;  %v5377_v61 = vpop.permute.xlu1 %1996  ;;  %v3078_v14 = vld [vmem:[%s6376_s3 + $0x22] ss:$8 sm:$0x3]  ;;  %v5391_v16 = vld [vmem:[%s6380_s7 + $0x18] sm:$0xff] }
 0x360   : > { %v1628_v3 = vsel %vm6647_vm14, %v7007_v13, %v7008_v33  ;;  %7009 = vst [vmem:[#allocation16_spill] sm:$0xff] %v5377_v61  ;;  %v1387_v53 = vadd.f32 %v1379_v18, %v1309_v21  ;;  %v1388_v50 = vadd.f32 %v1380_v47, %v1310_v35  ;;  %v5380_v0 = vrot.slane %v3077_v36, %v4513_v52  ;;  %v7010_v34 = vld [vmem:[#allocation101_spill] sm:$0xff]  ;;  %v7011_v21 = vld [vmem:[#allocation118_spill] sm:$0xff]  ;;  %v7012_v35 = vld [vmem:[#allocation144_spill] sm:$0xff]  ;;  %v5406_v9 = vpop.permute.xlu0 %2119 }
 0x361   : > { %v5383_v38 = vrot.slane %v3077_v36, %v4515_v45  ;;  %2475 = vperm.xlu1 %3269, %v5391_v16   ;;  %v1457_v18 = vmul.f32 %v7010_v34, %v1433_v17  ;;  %v1458_v47 = vmul.f32 %v7010_v34, %v1434_v30  ;;  %v1544_v36 = vsel %vm1542_vm13, %v7012_v35, %v7011_v21 }
 0x362   : > { %v1548_v46 = vsel %vm1542_vm13, %v7011_v21, %v7012_v35  ;;  %v1520_v1 = vadd.f32 %v1512_v10, %v1467_v22  ;;  %v1521_v24 = vadd.f32 %v1513_v39, %v1468_v55  ;;  %v1648_v13 = vmul.f32 %v5230_v26, %v1624_v42  ;;  %7013 = vst [vmem:[#allocation77_spill] sm:$0xff] %v5406_v9  ;;  %v7015_v55 = vld [vmem:[#allocation126_spill] sm:$0xff]  ;;  %v7016_v10 = vld [vmem:[#allocation147_spill] sm:$0xff]  ;;  %v7018_v42 = vld [vmem:[#allocation149_spill] sm:$0xff] }
 0x363   : > { %v1649_v33 = vmul.f32 %v5233_v58, %v1628_v3  ;;  %v1602_v17 = vadd.f32 %v1594_v11, %v1524_v32  ;;  %v1603_v30 = vadd.f32 %v1595_v41, %v1525_v31  ;;  %v5409_v34 = vrot.slane %v3078_v14, %v4513_v52  ;;  %v5414_v51 = vpop.permute.xlu1 %2041  ;;  %v7017_v41 = vld [vmem:[#allocation151_spill] sm:$0xff] }
 0x364   : > { %v5412_v28 = vrot.slane %v3078_v14, %v4515_v45  ;;  %7014 = vst [vmem:[#allocation45_spill] sm:$0xff] %v5414_v51  ;;  %v1566_v21 = vmul.f32 %v5114_v19, %v1544_v36  ;;  %v1567_v22 = vmul.f32 %v5117_v54, %v1548_v46  ;;  %v1702_v39 = vsel %vm6655_vm15, %v7016_v10, %v7015_v55  ;;  %v7020_v36 = vld [vmem:[#allocation113_spill] sm:$0xff] }
 0x365   : > { %v1706_v32 = vsel %vm6655_vm15, %v7015_v55, %v7016_v10  ;;  %2306 = vrot.lane.b32.xlu1 %v3650_v15, %s3438_s23  ;;  %v1465_v31 = vadd.f32 %v1457_v18, %v1387_v53  ;;  %v1466_v11 = vadd.f32 %v1458_v47, %v1388_v50  ;;  %v1543_v3 = vsel %vm1542_vm13, %v7018_v42, %v7017_v41  ;;  %v7021_v53 = vld [vmem:[#allocation153_spill] sm:$0xff] }
 0x366   : > { %v1547_v14 = vsel %vm1542_vm13, %v7017_v41, %v7018_v42  ;;  %v7019_v35 = vmov 24   ;;  %v1672_v46 = vmul.f32 %v7020_v36, %v1648_v13  ;;  %v1673_v55 = vmul.f32 %v7020_v36, %v1649_v33  ;;  %v7022_v50 = vld [vmem:[#allocation129_spill] sm:$0xff]  ;;  %v7023_v42 = vld [vmem:[#allocation159_spill] sm:$0xff] }
 0x367   : > { %3270 = vset.pattern.permute.xlu1 %v7019_v35  ;;  %v1622_v18 = vsel %vm6647_vm14, %v7022_v50, %v7021_v53  ;;  %v1626_v47 = vsel %vm6647_vm14, %v7021_v53, %v7022_v50  ;;  %v1726_v10 = vmul.f32 %v5259_v7, %v1702_v39  ;;  %v1727_v41 = vmul.f32 %v5262_v37, %v1706_v32  ;;  %v7024_v35 = vld [vmem:[#allocation158_spill] sm:$0xff]  ;;  %v5461_v49 = vpop.permute.xlu1 %2084  ;;  %v5465_v50 = vpop.permute.xlu0 %2201 }
 0x368   : > { %v1780_v13 = vsel %vm6651_vm0, %v7024_v35, %v7023_v42  ;;  %v1784_v33 = vsel %vm6651_vm0, %v7023_v42, %v7024_v35  ;;  %v3079_v36 = vld [vmem:[%s6376_s3 + $0x23] ss:$8 sm:$0x3]  ;;  %7025 = vst [vmem:[#allocation6_spill] sm:$0xff] %v5461_v49  ;;  %7027 = vst [vmem:[#allocation78_spill] sm:$0xff] %v5465_v50  ;;  %v1564_v44 = vmul.f32 %v5114_v19, %v1543_v3  ;;  %v7038_v19 = vld [vmem:[#allocation160_spill] sm:$0xff] }
 0x369   : > { %v7026_v53 = vld [vmem:[#allocation110_spill] sm:$0xff]  ;;  %v1565_v9 = vmul.f32 %v5117_v54, %v1547_v14  ;;  %2386 = vrot.lane.b32.xlu1 %v7028_v25, %s3441_s11  ;;  %v1518_v42 = vadd.f32 %v5153_v4, %v1465_v31  ;;  %v1519_v35 = vadd.f32 %v5157_v43, %v1466_v11  ;;  %v1644_v51 = vmul.f32 %v5230_v26, %v1622_v18  ;;  %v7029_v54 = vld [vmem:[#allocation143_spill] sm:$0xff] }
 0x36a   : > { %v1590_v39 = vmul.f32 %v7026_v53, %v1566_v21  ;;  %v1591_v32 = vmul.f32 %v7026_v53, %v1567_v22  ;;  %v1645_v49 = vmul.f32 %v5233_v58, %v1626_v47  ;;  %v1804_v21 = vmul.f32 %v5332_v23, %v1780_v13  ;;  %v7030_v47 = vld [vmem:[#allocation145_spill] sm:$0xff]  ;;  %v7039_v50 = vld [vmem:[#allocation170_spill] sm:$0xff] }
 0x36b   : > { %v1805_v22 = vmul.f32 %v5335_v27, %v1784_v33  ;;  %v5478_v53 = vrot.slane %v3079_v36, %v4513_v52  ;;  %v5481_v3 = vrot.slane %v3079_v36, %v4515_v45  ;;  %v1680_v14 = vadd.f32 %v1672_v46, %v1602_v17  ;;  %v5486_v31 = vpop.permute.xlu1 %2156  ;;  %v3080_v36 = vld [vmem:[%s6376_s3 + $0x24] ss:$8 sm:$0x3] }
 0x36c   : > { %v1681_v25 = vadd.f32 %v1673_v55, %v1603_v30  ;;  %v1750_v4 = vmul.f32 %v7029_v54, %v1726_v10  ;;  %v1751_v43 = vmul.f32 %v7029_v54, %v1727_v41  ;;  %v1598_v11 = vadd.f32 %v1590_v39, %v1520_v1  ;;  %v3373_v17 = vld [vmem:[%s6375_s2] sm:$0xff]  ;;  %v7031_v54 = vld [vmem:[#allocation123_spill] sm:$0xff]  ;;  %v7035_v10 = vld [vmem:[#allocation136_spill] sm:$0xff] }
 0x36d   : > { %v1599_v18 = vadd.f32 %v1591_v32, %v1521_v24  ;;  %v1588_v13 = vmul.f32 %v7030_v47, %v1564_v44  ;;  %v1589_v33 = vmul.f32 %v7030_v47, %v1565_v9  ;;  %2431 = vperm.xlu1 %3270, %v3373_v17   ;;  %v1668_v30 = vmul.f32 %v7031_v54, %v1644_v51  ;;  %v7032_v55 = vld [vmem:[#allocation150_spill] sm:$0xff]  ;;  %v7033_v1 = vld [vmem:[#allocation163_spill] sm:$0xff]  ;;  %v5506_v24 = vpop.permute.xlu0 %2287  ;;  %v7036_v32 = vld [vmem:[#allocation152_spill] sm:$0xff] }
 0x36e   : > { %v1669_v46 = vmul.f32 %v7031_v54, %v1645_v49  ;;  %v1621_v44 = vsel %vm6647_vm14, %v7033_v1, %v7032_v55  ;;  %v1625_v9 = vsel %vm6647_vm14, %v7032_v55, %v7033_v1  ;;  %7034 = vst [vmem:[#allocation60_spill] sm:$0xff] %v5506_v24  ;;  %v1828_v41 = vmul.f32 %v7035_v10, %v1804_v21  ;;  %v7037_v51 = vld [vmem:[#allocation165_spill] sm:$0xff] }
 0x36f   : > { %v1829_v39 = vmul.f32 %v7035_v10, %v1805_v22  ;;  %v1700_v49 = vsel %vm6655_vm15, %v7037_v51, %v7036_v32  ;;  %v1704_v47 = vsel %vm6655_vm15, %v7036_v32, %v7037_v51  ;;  %v1758_v17 = vadd.f32 %v1750_v4, %v1680_v14  ;;  %v5525_v22 = vpop.permute.xlu1 %2205  ;;  %v3081_v4 = vld [vmem:[%s6376_s3 + $0x25] ss:$8 sm:$0x3] }
 0x370   : > { %v1759_v54 = vadd.f32 %v1751_v43, %v1681_v25  ;;  %v5520_v55 = vrot.slane %v3080_v36, %v4513_v52  ;;  %v5523_v21 = vrot.slane %v3080_v36, %v4515_v45  ;;  %v1642_v1 = vmul.f32 %v5230_v26, %v1621_v44 }
 0x371   : > { %v1643_v10 = vmul.f32 %v5233_v58, %v1625_v9  ;;  %v1858_v14 = vsel %vm1854_vm1, %v7039_v50, %v7038_v19  ;;  %v1862_v25 = vsel %vm1854_vm1, %v7038_v19, %v7039_v50  ;;  %v7040_v43 = vmov 3  }
 0x372   : > { %3272 = vset.pattern.permute.xlu1 %v7040_v43  ;;  %v1596_v36 = vadd.f32 %v1588_v13, %v1518_v42  ;;  %v1597_v44 = vadd.f32 %v1589_v33, %v1519_v35  ;;  %v1722_v9 = vmul.f32 %v5259_v7, %v1700_v49  ;;  %v1723_v32 = vmul.f32 %v5262_v37, %v1704_v47  ;;  %v5552_v13 = vpop.permute.xlu0 %2283  ;;  %v7042_v33 = vld [vmem:[#allocation131_spill] sm:$0xff] }
 0x373   : > { %2499 = vperm.xlu1 %3272, %v5391_v16   ;;  %v1676_v51 = vadd.f32 %v1668_v30, %v1598_v11  ;;  %v1677_v58 = vadd.f32 %v1669_v46, %v1599_v18  ;;  %v1836_v26 = vadd.f32 %v1828_v41, %v1758_v17  ;;  %v1837_v12 = vadd.f32 %v1829_v39, %v1759_v54  ;;  %v1995_v35 = vpop.permute.xlu1 %1994  ;;  %v7043_v11 = vld [vmem:[#allocation177_spill] sm:$0xff]  ;;  %v7046_v17 = vld [vmem:[#allocation182_spill] sm:$0xff] }
 0x374   : > { %v1882_v19 = vmul.f32 %v5380_v0, %v1858_v14  ;;  %v1883_v50 = vmul.f32 %v5383_v38, %v1862_v25  ;;  %v5547_v24 = vrot.slane %v3081_v4, %v4513_v52  ;;  %v5550_v42 = vrot.slane %v3081_v4, %v4515_v45  ;;  %7041 = vst [vmem:[#allocation18_spill] sm:$0xff] %v5552_v13  ;;  %v7044_v18 = vld [vmem:[#allocation173_spill] sm:$0xff]  ;;  %v7047_v54 = vld [vmem:[#allocation162_spill] sm:$0xff]  ;;  %v7048_v14 = vld [vmem:[#allocation204_spill] sm:$0xff] }
 0x375   : > { %v1666_v49 = vmul.f32 %v7042_v33, %v1642_v1  ;;  %v1667_v16 = vmul.f32 %v7042_v33, %v1643_v10  ;;  %v1699_v30 = vsel %vm6655_vm15, %v7044_v18, %v7043_v11  ;;  %v1703_v46 = vsel %vm6655_vm15, %v7043_v11, %v7044_v18  ;;  %v7045_v41 = vld [vmem:[#allocation133_spill] sm:$0xff]  ;;  %v7049_v25 = vld [vmem:[#allocation200_spill] sm:$0xff]  ;;  %v7051_v33 = vld [vmem:[#allocation214_spill] sm:$0xff] }
 0x376   : > { %v1746_v39 = vmul.f32 %v7045_v41, %v1722_v9  ;;  %v1747_v47 = vmul.f32 %v7045_v41, %v1723_v32  ;;  %v1778_v1 = vsel %vm6651_vm0, %v7047_v54, %v7046_v17  ;;  %v1782_v10 = vsel %vm6651_vm0, %v7046_v17, %v7047_v54  ;;  %v7050_v32 = vld [vmem:[#allocation176_spill] sm:$0xff]  ;;  %v7052_v18 = vld [vmem:[#allocation161_spill] sm:$0xff] }
 0x377   : > { %vm2088_vm14 = vcmp.lt.s32.totalorder %v4524_v57, 98  ;;  %2384 = vrot.lane.b32.xlu1 %v3650_v15, %s3441_s11  ;;  %v1936_v4 = vsel %vm1932_vm2, %v7049_v25, %v7048_v14  ;;  %v1940_v9 = vsel %vm1932_vm2, %v7048_v14, %v7049_v25  ;;  %v1777_v11 = vsel %vm6651_vm0, %v7051_v33, %v7050_v32  ;;  %v2003_v25 = vpop.permute.xlu1 %2002 }
 0x378   : > { %v1781_v15 = vsel %vm6651_vm0, %v7050_v32, %v7051_v33  ;;  %3273 = vset.pattern.permute.xlu1 %v6923_v6  ;;  %v1906_v41 = vmul.f32 %v7052_v18, %v1882_v19  ;;  %v1907_v17 = vmul.f32 %v7052_v18, %v1883_v50  ;;  %v1720_v54 = vmul.f32 %v5259_v7, %v1699_v30 }
 0x379   : > { %v1721_v14 = vmul.f32 %v5262_v37, %v1703_v46  ;;  %v1800_v13 = vmul.f32 %v5332_v23, %v1778_v1  ;;  %v1801_v61 = vmul.f32 %v5335_v27, %v1782_v10  ;;  %v5602_v8 = vsel %vm2010_vm5, %v1995_v35, %v2003_v25  ;;  %v3374_v1 = vld [vmem:[%s6380_s7 + $0x8] sm:$0xff]  ;;  %v5616_v10 = vpop.permute.xlu0 %2080 }
 0x37a   : > { %v5606_v6 = vsel %vm2010_vm5, %v2003_v25, %v1995_v35  ;;  %v1960_v19 = vmul.f32 %v5409_v34, %v1936_v4  ;;  %v1961_v50 = vmul.f32 %v5412_v28, %v1940_v9  ;;  %v1798_v30 = vmul.f32 %v5332_v23, %v1777_v11  ;;  %v7053_v4 = vld [vmem:[#allocation166_spill] sm:$0xff]  ;;  %v7054_v11 = vld [vmem:[#allocation184_spill] sm:$0xff] }
 0x37b   : > { %v1799_v46 = vmul.f32 %v5335_v27, %v1781_v15  ;;  %vm2166_vm0 = vcmp.lt.s32.totalorder %v4524_v57, 97  ;;  %2467 = vperm.xlu1 %3273, %v3374_v1   ;;  %v1674_v32 = vadd.f32 %v1666_v49, %v1596_v36  ;;  %v1675_v35 = vadd.f32 %v1667_v16, %v1597_v44  ;;  %v7055_v23 = vld [vmem:[#allocation12_spill] sm:$0xff]  ;;  %v5628_v37 = vpop.permute.xlu1 %2082  ;;  %v3082_v16 = vld [vmem:[%s6376_s3 + $0x26] ss:$8 sm:$0x3] }
 0x37c   : > { %v1754_v33 = vadd.f32 %v1746_v39, %v1676_v51  ;;  %v1755_v18 = vadd.f32 %v1747_v47, %v1677_v58  ;;  %v1744_v25 = vmul.f32 %v7053_v4, %v1720_v54  ;;  %v1745_v9 = vmul.f32 %v7053_v4, %v1721_v14  ;;  %v7056_v51 = vld [vmem:[#allocation157_spill] sm:$0xff]  ;;  %v7058_v14 = vld [vmem:[#allocation164_spill] sm:$0xff] }
 0x37d   : > { %v1856_v15 = vsel %vm1854_vm1, %v7055_v23, %v7054_v11  ;;  %v1860_v27 = vsel %vm1854_vm1, %v7054_v11, %v7055_v23  ;;  %v1914_v36 = vadd.f32 %v1906_v41, %v1836_v26  ;;  %v1915_v44 = vadd.f32 %v1907_v17, %v1837_v12  ;;  %v7057_v39 = vld [vmem:[#allocation169_spill] sm:$0xff]  ;;  %v3375_v26 = vld [vmem:[%s6380_s7] sm:$0xff] }
 0x37e   : > { %v1824_v58 = vmul.f32 %v7056_v51, %v1800_v13  ;;  %v1825_v49 = vmul.f32 %v7056_v51, %v1801_v61  ;;  %v1984_v47 = vmul.f32 %v7057_v39, %v1960_v19  ;;  %v1985_v54 = vmul.f32 %v7057_v39, %v1961_v50  ;;  %v7059_v13 = vld [vmem:[#allocation211_spill] sm:$0xff] }
 0x37f   : > { %v1822_v4 = vmul.f32 %v7058_v14, %v1798_v30  ;;  %v1823_v23 = vmul.f32 %v7058_v14, %v1799_v46  ;;  %2463 = vperm.xlu1 %3273, %v3375_v26   ;;  %v1878_v12 = vmul.f32 %v5380_v0, %v1856_v15  ;;  %v1879_v61 = vmul.f32 %v5383_v38, %v1860_v27  ;;  %v2155_v30 = vpop.permute.xlu1 %2154  ;;  %v5658_v27 = vpop.permute.xlu0 %2160 }
 0x380   : > { %v2014_v41 = vsel %vm2010_vm5, %v5025_v62, %v7059_v13  ;;  %v2018_v17 = vsel %vm2010_vm5, %v7059_v13, %v5025_v62  ;;  %v1752_v19 = vadd.f32 %v1744_v25, %v1674_v32  ;;  %v1753_v50 = vadd.f32 %v1745_v9, %v1675_v35 }
 0x381   : > { %v5653_v46 = vrot.slane %v3082_v16, %v4513_v52  ;;  %v5656_v11 = vrot.slane %v3082_v16, %v4515_v45  ;;  %v1832_v15 = vadd.f32 %v1824_v58, %v1754_v33  ;;  %v1833_v51 = vadd.f32 %v1825_v49, %v1755_v18  ;;  %v7060_v58 = vld [vmem:[#allocation167_spill] sm:$0xff] }
 0x382   : > { %v2092_v39 = vsel %vm2088_vm14, %v5244_v59, %v5286_v40  ;;  %v2096_v62 = vsel %vm2088_vm14, %v5286_v40, %v5244_v59  ;;  %v1992_v32 = vadd.f32 %v1984_v47, %v1914_v36  ;;  %v1993_v35 = vadd.f32 %v1985_v54, %v1915_v44 }
 0x383   : > { %v2038_v25 = vmul.f32 %v5478_v53, %v2014_v41  ;;  %v2039_v9 = vmul.f32 %v5481_v3, %v2018_v17  ;;  %3275 = vset.pattern.permute.xlu1 %v7040_v43  ;;  %vm2244_vm15 = vcmp.lt.s32.totalorder %v4524_v57, 96  ;;  %v5672_v33 = vadd.f32 %v1822_v4, %v1752_v19  ;;  %v2163_v44 = vpop.permute.xlu1 %2162 }
 0x384   : > { %v5674_v18 = vadd.f32 %v1823_v23, %v1753_v50  ;;  %v1902_v49 = vmul.f32 %v7060_v58, %v1878_v12  ;;  %v1903_v16 = vmul.f32 %v7060_v58, %v1879_v61  ;;  %2491 = vperm.xlu1 %3275, %v3374_v1   ;;  %v1855_v59 = vsel %vm1854_vm1, %v5083_v20, %v5110_v60  ;;  %v5704_v12 = vpop.permute.xlu0 %2232 }
 0x385   : > { %v1859_v40 = vsel %vm1854_vm1, %v5110_v60, %v5083_v20  ;;  %v2116_v43 = vmul.f32 %v5520_v55, %v2092_v39  ;;  %v2117_v36 = vmul.f32 %v5523_v21, %v2096_v62  ;;  %v2170_v1 = vsel %vm2166_vm0, %v5486_v31, %v5324_v48  ;;  %v7061_v60 = vld [vmem:[#allocation212_spill] sm:$0xff]  ;;  %v7063_v62 = vld [vmem:[#allocation215_spill] sm:$0xff] }
 0x386   : > { %v2174_v47 = vsel %vm2166_vm0, %v5324_v48, %v5486_v31  ;;  %v2169_v54 = vsel %vm2166_vm0, %v2155_v30, %v2163_v44  ;;  %v2173_v20 = vsel %vm2166_vm0, %v2163_v44, %v2155_v30  ;;  %v2062_v14 = vmul.f32 %v7061_v60, %v2038_v25  ;;  %v7064_v44 = vld [vmem:[#allocation70_spill] sm:$0xff] }
 0x387   : > { %v2063_v4 = vmul.f32 %v7061_v60, %v2039_v9  ;;  %v2192_v23 = vmul.f32 %v5547_v24, %v2169_v54  ;;  %v2193_v26 = vmul.f32 %v5550_v42, %v2173_v20  ;;  %v1876_v61 = vmul.f32 %v5380_v0, %v1855_v59  ;;  %v2235_v39 = vpop.permute.xlu1 %2234 }
 0x388   : > { %v1877_v48 = vmul.f32 %v5383_v38, %v1859_v40  ;;  %v1933_v31 = vsel %vm1932_vm2, %v5349_v56, %v5119_v2  ;;  %v1937_v13 = vsel %vm1932_vm2, %v5119_v2, %v5349_v56  ;;  %v7062_v41 = vmov 0  }
 0x389   : > { %3276 = vset.pattern.permute.xlu1 %v7062_v41  ;;  %v2194_v17 = vmul.f32 %v5547_v24, %v2170_v1  ;;  %v2195_v19 = vmul.f32 %v5550_v42, %v2174_v47  ;;  %v5720_v50 = vmul.f32 %v5525_v22, %v2192_v23  ;;  %v5723_v30 = vmul.f32 %v5525_v22, %v2193_v26 }
 0x38a   : > { %v1934_v25 = vsel %vm1932_vm2, %v7063_v62, %v5149_v29  ;;  %v1938_v56 = vsel %vm1932_vm2, %v5149_v29, %v7063_v62  ;;  %v2140_v2 = vmul.f32 %v5029_v5, %v2116_v43  ;;  %v2141_v9 = vmul.f32 %v5029_v5, %v2117_v36  ;;  %v7065_v36 = vld [vmem:[#allocation73_spill] sm:$0xff] }
 0x38b   : > { %v1910_v58 = vadd.f32 %v1902_v49, %v1832_v15  ;;  %v1911_v59 = vadd.f32 %v1903_v16, %v1833_v51  ;;  %v2070_v40 = vadd.f32 %v2062_v14, %v1992_v32  ;;  %v2071_v22 = vadd.f32 %v2063_v4, %v1993_v35  ;;  %v2243_v15 = vpop.permute.xlu1 %2242  ;;  %v5743_v51 = vpop.permute.xlu0 %2279  ;;  %v7066_v14 = vld [vmem:[#allocation16_spill] sm:$0xff] }
 0x38c   : > { %v1900_v1 = vmul.f32 %v7064_v44, %v1876_v61  ;;  %v1901_v47 = vmul.f32 %v7064_v44, %v1877_v48  ;;  %v1954_v54 = vmul.f32 %v5409_v34, %v1933_v31  ;;  %v1955_v20 = vmul.f32 %v5412_v28, %v1937_v13  ;;  %v7067_v61 = vld [vmem:[#allocation55_spill] sm:$0xff] }
 0x38d   : > { %v1956_v60 = vmul.f32 %v5409_v34, %v1934_v25  ;;  %v1957_v29 = vmul.f32 %v5412_v28, %v1938_v56  ;;  %v2218_v43 = vmul.f32 %v5312_v63, %v2194_v17  ;;  %v2219_v5 = vmul.f32 %v5312_v63, %v2195_v19 }
 0x38e   : > { %v2148_v32 = vadd.f32 %v2140_v2, %v2070_v40  ;;  %v2149_v35 = vadd.f32 %v2141_v9, %v2071_v22  ;;  %v2248_v49 = vsel %vm2244_vm15, %v2235_v39, %v2243_v15  ;;  %v2252_v16 = vsel %vm2244_vm15, %v2243_v15, %v2235_v39  ;;  %v7068_v39 = vld [vmem:[#allocation60_spill] sm:$0xff]  ;;  %v7069_v40 = vld [vmem:[#allocation67_spill] sm:$0xff] }
 0x38f   : > { %v2012_v4 = vsel %vm2010_vm5, %v7066_v14, %v7065_v36  ;;  %v2016_v63 = vsel %vm2010_vm5, %v7065_v36, %v7066_v14  ;;  %v2272_v23 = vmul.f32 %v5653_v46, %v2248_v49  ;;  %v2273_v26 = vmul.f32 %v5656_v11, %v2252_v16  ;;  %v5767_v56 = vpop.permute.xlu1 %2365 }
 0x390   : > { %v1978_v48 = vmul.f32 %v7067_v61, %v1954_v54  ;;  %v1979_v31 = vmul.f32 %v7067_v61, %v1955_v20  ;;  %v2032_v13 = vmul.f32 %v5478_v53, %v5602_v8  ;;  %v2033_v41 = vmul.f32 %v5481_v3, %v5606_v6 }
 0x391   : > { %v2226_v17 = vadd.f32 %v2218_v43, %v2148_v32  ;;  %v2227_v19 = vadd.f32 %v2219_v5, %v2149_v35  ;;  %v2296_v62 = vmul.f32 %v7068_v39, %v2272_v23  ;;  %v2297_v25 = vmul.f32 %v7068_v39, %v2273_v26  ;;  %v5785_v43 = vpop.permute.xlu0 %2320  ;;  %v7070_v5 = vld [vmem:[#allocation203_spill] sm:$0xff]  ;;  %v7071_v35 = vld [vmem:[#allocation45_spill] sm:$0xff] }
 0x392   : > { %v2034_v2 = vmul.f32 %v5478_v53, %v2012_v4  ;;  %v2035_v9 = vmul.f32 %v5481_v3, %v2016_v63  ;;  %v2090_v8 = vsel %vm2088_vm14, %v7069_v40, %v5628_v37  ;;  %v2094_v6 = vsel %vm2088_vm14, %v5628_v37, %v7069_v40  ;;  %v7073_v63 = vld [vmem:[#allocation46_spill] sm:$0xff]  ;;  %v7074_v23 = vld [vmem:[#allocation37_spill] sm:$0xff]  ;;  %v7075_v39 = vld [vmem:[#allocation19_spill] sm:$0xff] }
 0x393   : > { %v1908_v22 = vadd.f32 %v1900_v1, %v5672_v33  ;;  %v1909_v44 = vadd.f32 %v1901_v47, %v5674_v18  ;;  %v5781_v54 = vadd.f32 %v2296_v62, %v2226_v17  ;;  %v5783_v20 = vadd.f32 %v2297_v25, %v2227_v19  ;;  %v2073_v1 = vpop.permute.xlu1 %2072  ;;  %v7072_v47 = vld [vmem:[#allocation43_spill] sm:$0xff]  ;;  %v7076_v25 = vld [vmem:[#allocation77_spill] sm:$0xff] }
 0x394   : > { %v1980_v15 = vmul.f32 %v7070_v5, %v1956_v60  ;;  %v1981_v32 = vmul.f32 %v7070_v5, %v1957_v29  ;;  %v2056_v49 = vmul.f32 %v7071_v35, %v2032_v13  ;;  %v2057_v16 = vmul.f32 %v7071_v35, %v2033_v41  ;;  %v7077_v35 = vld [vmem:[#allocation207_spill] sm:$0xff] }
 0x395   : > { %v1986_v36 = vadd.f32 %v1978_v48, %v1908_v22  ;;  %v1987_v37 = vadd.f32 %v1979_v31, %v1909_v44  ;;  %v2112_v33 = vmul.f32 %v5520_v55, %v2090_v8  ;;  %v2113_v18 = vmul.f32 %v5523_v21, %v2094_v6  ;;  %v5815_v8 = vpop.permute.xlu0 %2230 }
 0x396   : > { %v2058_v14 = vmul.f32 %v7072_v47, %v2034_v2  ;;  %v2059_v4 = vmul.f32 %v7072_v47, %v2035_v9  ;;  %v2089_v60 = vsel %vm2088_vm14, %v2073_v1, %v5616_v10  ;;  %v2093_v29 = vsel %vm2088_vm14, %v5616_v10, %v2073_v1  ;;  %v7081_v1 = vld [vmem:[#allocation187_spill] sm:$0xff] }
 0x397   : > { %v790_v26 = vsel %vm787_vm3, %v7074_v23, %v7073_v63  ;;  %v794_v61 = vsel %vm787_vm3, %v7073_v63, %v7074_v23  ;;  %v2110_v48 = vmul.f32 %v5520_v55, %v2089_v60  ;;  %v2111_v31 = vmul.f32 %v5523_v21, %v2093_v29  ;;  %v2153_v40 = vpop.permute.xlu1 %2152  ;;  %v7083_v23 = vld [vmem:[#allocation205_spill] sm:$0xff] }
 0x398   : > { %v1988_v13 = vadd.f32 %v1980_v15, %v1910_v58  ;;  %v1989_v41 = vadd.f32 %v1981_v32, %v1911_v59  ;;  %v2064_v17 = vadd.f32 %v2056_v49, %v1986_v36  ;;  %v2065_v19 = vadd.f32 %v2057_v16, %v1987_v37  ;;  %v7078_v49 = vld [vmem:[#allocation5_spill] sm:$0xff]  ;;  %v7079_v36 = vld [vmem:[#allocation208_spill] sm:$0xff] }
 0x399   : > { %v2136_v10 = vmul.f32 %v7075_v39, %v2112_v33  ;;  %v2137_v62 = vmul.f32 %v7075_v39, %v2113_v18  ;;  %v2134_v2 = vmul.f32 %v7076_v25, %v2110_v48  ;;  %v2135_v9 = vmul.f32 %v7076_v25, %v2111_v31  ;;  %v7080_v33 = vld [vmem:[#allocation186_spill] sm:$0xff]  ;;  %v7084_v48 = vld [vmem:[#allocation15_spill] sm:$0xff] }
 0x39a   : > { %v2066_v6 = vadd.f32 %v2058_v14, %v1988_v13  ;;  %v2067_v22 = vadd.f32 %v2059_v4, %v1989_v41  ;;  %v2168_v58 = vsel %vm2166_vm0, %v2153_v40, %v5658_v27  ;;  %v2172_v59 = vsel %vm2166_vm0, %v5658_v27, %v2153_v40  ;;  %v7082_v4 = vld [vmem:[#allocation78_spill] sm:$0xff] }
 0x39b   : > { %v5823_v44 = vadd.f32 %v2134_v2, %v2064_v17  ;;  %v5825_v5 = vadd.f32 %v2135_v9, %v2065_v19  ;;  %v2190_v15 = vmul.f32 %v5547_v24, %v2168_v58  ;;  %v2191_v32 = vmul.f32 %v5550_v42, %v2172_v59  ;;  %v5837_v63 = vpop.permute.xlu1 %2197  ;;  %v7085_v13 = vld [vmem:[#allocation206_spill] sm:$0xff]  ;;  %v7086_v17 = vld [vmem:[#allocation213_spill] sm:$0xff]  ;;  %v7087_v19 = vld [vmem:[#allocation8_spill] sm:$0xff]  ;;  %v5859_v58 = vpop.permute.xlu0 %2275 }
 0x39c   : > { %v681_v16 = vmul.f32 %v7078_v49, %v7077_v35  ;;  %v682_v37 = vmul.f32 %v7078_v49, %v7079_v36  ;;  %v813_v18 = vmul.f32 %v7080_v33, %v794_v61  ;;  %v814_v47 = vmul.f32 %v7081_v1, %v790_v26  ;;  %v7088_v61 = vld [vmem:[#allocation188_spill] sm:$0xff]  ;;  %v3083_v59 = vld [vmem:[%s6376_s3 + $0x27] ss:$8 sm:$0x3] }
 0x39d   : > { %v2144_v14 = vadd.f32 %v2136_v10, %v2066_v6  ;;  %v2145_v27 = vadd.f32 %v2137_v62, %v2067_v22  ;;  %v2214_v60 = vmul.f32 %v7082_v4, %v2190_v15  ;;  %v2215_v29 = vmul.f32 %v7082_v4, %v2191_v32  ;;  %v7089_v10 = vld [vmem:[#allocation48_spill] sm:$0xff]  ;;  %v7091_v15 = vld [vmem:[#allocation11_spill] sm:$0xff]  ;;  %v7092_v49 = vld [vmem:[#allocation50_spill] sm:$0xff] }
 0x39e   : > { %v603_v31 = vmul.f32 %v7084_v48, %v7083_v23  ;;  %v604_v41 = vmul.f32 %v7084_v48, %v7085_v13  ;;  %v759_v39 = vmul.f32 %v7087_v19, %v7086_v17  ;;  %v760_v26 = vmul.f32 %v7087_v19, %v7088_v61  ;;  %v7090_v62 = vld [vmem:[#allocation40_spill] sm:$0xff]  ;;  %v7093_v36 = vld [vmem:[#allocation38_spill] sm:$0xff]  ;;  %v7095_v4 = vld [vmem:[#allocation193_spill] sm:$0xff] }
 0x39f   : > { %v868_v25 = vsel %vm865_vm6, %v7090_v62, %v7089_v10  ;;  %v872_v2 = vsel %vm865_vm6, %v7089_v10, %v7090_v62  ;;  %v5855_v9 = vadd.f32 %v2214_v60, %v2144_v14  ;;  %v5857_v40 = vadd.f32 %v2215_v29, %v2145_v27  ;;  %v7094_v14 = vld [vmem:[#allocation192_spill] sm:$0xff]  ;;  %v7096_v23 = vld [vmem:[#allocation190_spill] sm:$0xff]  ;;  %v7099_v17 = vld [vmem:[#allocation41_spill] sm:$0xff] }
 0x3a0   : > { %v689_v6 = vadd.f32 %v681_v16, %v603_v31  ;;  %v690_v22 = vadd.f32 %v682_v37, %v604_v41  ;;  %v837_v32 = vmul.f32 %v7091_v15, %v813_v18  ;;  %v838_v35 = vmul.f32 %v7091_v15, %v814_v47  ;;  %v5874_v37 = vpop.permute.xlu1 %2240  ;;  %v7097_v31 = vld [vmem:[#allocation191_spill] sm:$0xff]  ;;  %v7100_v10 = vld [vmem:[#allocation52_spill] sm:$0xff] }
 0x3a1   : > { %v946_v33 = vsel %vm943_vm4, %v7093_v36, %v7092_v49  ;;  %v950_v16 = vsel %vm943_vm4, %v7092_v49, %v7093_v36  ;;  %v891_v27 = vmul.f32 %v7094_v14, %v872_v2  ;;  %v892_v60 = vmul.f32 %v7095_v4, %v868_v25  ;;  %v7098_v41 = vld [vmem:[#allocation51_spill] sm:$0xff]  ;;  %v5905_v49 = vpop.permute.xlu0 %2357  ;;  %v7103_v36 = vld [vmem:[#allocation194_spill] sm:$0xff] }
 0x3a2   : > { %v767_v1 = vadd.f32 %v759_v39, %v689_v6  ;;  %v768_v18 = vadd.f32 %v760_v26, %v690_v22  ;;  %vm2322_vm3 = vcmp.lt.s32.totalorder %v4524_v57, 95  ;;  %v5880_v47 = vrot.slane %v3083_v59, %v4513_v52  ;;  %v7101_v62 = vld [vmem:[#allocation39_spill] sm:$0xff]  ;;  %v7102_v22 = vld [vmem:[#allocation26_spill] sm:$0xff] }
 0x3a3   : > { %v5883_v29 = vrot.slane %v3083_v59, %v4515_v45  ;;  %v969_v48 = vmul.f32 %v7096_v23, %v950_v16  ;;  %v970_v13 = vmul.f32 %v7097_v31, %v946_v33  ;;  %v1024_v19 = vsel %vm1021_vm7, %v7099_v17, %v7098_v41  ;;  %v7104_v16 = vld [vmem:[#allocation195_spill] sm:$0xff]  ;;  %v7106_v23 = vld [vmem:[#allocation198_spill] sm:$0xff] }
 0x3a4   : > { %v1028_v39 = vsel %vm1021_vm7, %v7098_v41, %v7099_v17  ;;  %v845_v61 = vadd.f32 %v837_v32, %v767_v1  ;;  %v846_v26 = vadd.f32 %v838_v35, %v768_v18  ;;  %v1102_v25 = vsel %vm1099_vm9, %v7101_v62, %v7100_v10  ;;  %v2313_v6 = vpop.permute.xlu1 %2312  ;;  %v7105_v4 = vld [vmem:[#allocation23_spill] sm:$0xff] }
 0x3a5   : > { %v1106_v2 = vsel %vm1099_vm9, %v7100_v10, %v7101_v62  ;;  %v915_v59 = vmul.f32 %v7102_v22, %v891_v27  ;;  %v916_v15 = vmul.f32 %v7102_v22, %v892_v60  ;;  %v2326_v32 = vsel %vm2322_vm3, %v2313_v6, %v5785_v43  ;;  %v7107_v41 = vld [vmem:[#allocation199_spill] sm:$0xff] }
 0x3a6   : > { %v2330_v35 = vsel %vm2322_vm3, %v5785_v43, %v2313_v6  ;;  %v1047_v33 = vmul.f32 %v7103_v36, %v1028_v39  ;;  %v1048_v1 = vmul.f32 %v7104_v16, %v1024_v19  ;;  %v2350_v14 = vmul.f32 %v5880_v47, %v2326_v32  ;;  %v7108_v6 = vld [vmem:[#allocation31_spill] sm:$0xff]  ;;  %v5935_v16 = vpop.permute.xlu0 %2308 }
 0x3a7   : > { %v2351_v27 = vmul.f32 %v5883_v29, %v2330_v35  ;;  %v993_v60 = vmul.f32 %v7105_v4, %v969_v48  ;;  %v994_v18 = vmul.f32 %v7105_v4, %v970_v13  ;;  %v1125_v31 = vmul.f32 %v7106_v23, %v1106_v2  ;;  %v7109_v35 = vld [vmem:[#allocation30_spill] sm:$0xff] }
 0x3a8   : > { %v1126_v17 = vmul.f32 %v7107_v41, %v1102_v25  ;;  %v2374_v10 = vmul.f32 %v5767_v56, %v2350_v14  ;;  %v5923_v62 = vpop.permute.xlu1 %2361  ;;  %v923_v39 = vadd.f32 %v915_v59, %v845_v61  ;;  %v924_v19 = vadd.f32 %v916_v15, %v846_v26  ;;  %v7110_v61 = vld [vmem:[#allocation53_spill] sm:$0xff]  ;;  %v7111_v26 = vld [vmem:[#allocation42_spill] sm:$0xff]  ;;  %v7113_v15 = vld [vmem:[#allocation71_spill] sm:$0xff] }
 0x3a9   : > { %v2375_v43 = vmul.f32 %v5767_v56, %v2351_v27  ;;  %v1071_v22 = vmul.f32 %v7108_v6, %v1047_v33  ;;  %v1072_v32 = vmul.f32 %v7108_v6, %v1048_v1  ;;  %v1149_v36 = vmul.f32 %v7109_v35, %v1125_v31  ;;  %v7115_v23 = vld [vmem:[#allocation202_spill] sm:$0xff]  ;;  %v7116_v41 = vld [vmem:[#allocation209_spill] sm:$0xff] }
 0x3aa   : > { %v5928_v48 = vadd.f32 %v2374_v10, %v5781_v54  ;;  %v1001_v2 = vadd.f32 %v993_v60, %v923_v39  ;;  %v1002_v25 = vadd.f32 %v994_v18, %v924_v19  ;;  %v1150_v56 = vmul.f32 %v7109_v35, %v1126_v17  ;;  %v7114_v60 = vld [vmem:[#allocation201_spill] sm:$0xff]  ;;  %v7117_v10 = vld [vmem:[#allocation210_spill] sm:$0xff] }
 0x3ab   : > { %v5931_v13 = vadd.f32 %v2375_v43, %v5783_v20  ;;  %v1180_v59 = vsel %vm1177_vm8, %v7111_v26, %v7110_v61  ;;  %v1184_v54 = vsel %vm1177_vm8, %v7110_v61, %v7111_v26  ;;  %v7112_v20 = vld [vmem:[#allocation97_spill] sm:$0xff]  ;;  %v7119_v61 = vld [vmem:[#allocation107_spill] sm:$0xff]  ;;  %vm7139_vm4 = vcmp.lt.s32.totalorder %v4524_v57, 126 }
 0x3ac   : > { %v1258_v33 = vsel %vm1255_vm10, %v7113_v15, %v7112_v20  ;;  %v1262_v1 = vsel %vm1255_vm10, %v7112_v20, %v7113_v15  ;;  %v2151_v14 = vpop.permute.xlu1 %2150  ;;  %v1079_v27 = vadd.f32 %v1071_v22, %v1001_v2  ;;  %v1080_v4 = vadd.f32 %v1072_v32, %v1002_v25  ;;  %v7118_v35 = vld [vmem:[#allocation109_spill] sm:$0xff]  ;;  %v5965_v32 = vpop.permute.xlu0 %2353  ;;  %vm7140_vm6 = vmmov %vm7139_vm4 }
 0x3ad   : > { %v1203_v18 = vmul.f32 %v7114_v60, %v1184_v54  ;;  %v1204_v31 = vmul.f32 %v7115_v23, %v1180_v59  ;;  %v1281_v17 = vmul.f32 %v7116_v41, %v1262_v1  ;;  %v1282_v43 = vmul.f32 %v7117_v10, %v1258_v33  ;;  %v7122_v33 = vld [vmem:[#allocation36_spill] sm:$0xff]  ;;  %v7125_v10 = vld [vmem:[#allocation217_spill] sm:$0xff] }
 0x3ae   : > { %v1157_v39 = vadd.f32 %v1149_v36, %v1079_v27  ;;  %v1158_v19 = vadd.f32 %v1150_v56, %v1080_v4  ;;  %v1336_v26 = vsel %vm1333_vm11, %v7119_v61, %v7118_v35  ;;  %v1340_v22 = vsel %vm1333_vm11, %v7118_v35, %v7119_v61  ;;  %v7120_v36 = vld [vmem:[#allocation121_spill] sm:$0xff]  ;;  %v7123_v4 = vld [vmem:[#allocation64_spill] sm:$0xff] }
 0x3af   : > { %v7121_v56 = vld [vmem:[#allocation93_spill] sm:$0xff]  ;;  %v1227_v1 = vmul.f32 %v7122_v33, %v1203_v18  ;;  %v1228_v27 = vmul.f32 %v7122_v33, %v1204_v31  ;;  %v1306_v60 = vmul.f32 %v7123_v4, %v1282_v43  ;;  %v7124_v23 = vld [vmem:[#allocation216_spill] sm:$0xff]  ;;  %vm7148_vm7 = vcmp.lt.s32.totalorder %v4524_v57, 114 }
 0x3b0   : > { %v2159_v6 = vpop.permute.xlu1 %2158  ;;  %v1414_v59 = vsel %vm1411_vm12, %v7121_v56, %v7120_v36  ;;  %v1418_v54 = vsel %vm1411_vm12, %v7120_v36, %v7121_v56  ;;  %v1359_v41 = vmul.f32 %v7124_v23, %v1340_v22  ;;  %v7129_v23 = vld [vmem:[#allocation86_spill] sm:$0xff]  ;;  %vm7149_vm8 = vmmov %vm7148_vm7  ;;  %vm7153_vm9 = vcmp.lt.s32.totalorder %v4524_v57, 113 }
 0x3b1   : > { %v2167_v2 = vsel %vm2166_vm0, %v2151_v14, %v2159_v6  ;;  %v2171_v25 = vsel %vm2166_vm0, %v2159_v6, %v2151_v14  ;;  %v1305_v14 = vmul.f32 %v7123_v4, %v1281_v17  ;;  %v1360_v6 = vmul.f32 %v7125_v10, %v1336_v26  ;;  %vm7154_vm10 = vmmov %vm7153_vm9 }
 0x3b2   : > { %v2188_v20 = vmul.f32 %v5547_v24, %v2167_v2  ;;  %v2189_v15 = vmul.f32 %v5550_v42, %v2171_v25  ;;  %v7126_v24 = vld [vmem:[#allocation62_spill] sm:$0xff]  ;;  %v1235_v22 = vadd.f32 %v1227_v1, %v1157_v39  ;;  %v1236_v56 = vadd.f32 %v1228_v27, %v1158_v19  ;;  %v7130_v39 = vld [vmem:[#allocation140_spill] sm:$0xff]  ;;  %v7131_v19 = vld [vmem:[#allocation139_spill] sm:$0xff] }
 0x3b3   : > { %v1437_v2 = vmul.f32 %v7126_v24, %v1418_v54  ;;  %v7127_v42 = vld [vmem:[#allocation2_spill] sm:$0xff]  ;;  %v7128_v54 = vld [vmem:[#allocation100_spill] sm:$0xff]  ;;  %v1545_v1 = vsel %vm1542_vm13, %v7131_v19, %v7130_v39  ;;  %v1549_v27 = vsel %vm1542_vm13, %v7130_v39, %v7131_v19  ;;  %v7145_v39 = vld [vmem:[#allocation63_spill] sm:$0xff]  ;;  %vm2400_vm11 = vcmp.lt.s32.totalorder %v4524_v57, 94 }
 0x3b4   : > { %v2212_v35 = vmul.f32 %v5837_v63, %v2188_v20  ;;  %v2213_v61 = vmul.f32 %v5837_v63, %v2189_v15  ;;  %v2239_v36 = vpop.permute.xlu1 %2238  ;;  %v1438_v25 = vmul.f32 %v7127_v42, %v1414_v59  ;;  %v6005_v59 = vpop.permute.xlu0 %2443  ;;  %v1383_v20 = vmul.f32 %v7128_v54, %v1359_v41  ;;  %v7134_v41 = vld [vmem:[#allocation174_spill] sm:$0xff] }
 0x3b5   : > { %v2246_v18 = vsel %vm2244_vm15, %v5815_v8, %v2239_v36  ;;  %v2250_v31 = vsel %vm2244_vm15, %v2239_v36, %v5815_v8  ;;  %v1384_v15 = vmul.f32 %v7128_v54, %v1360_v6  ;;  %v1314_v4 = vadd.f32 %v1306_v60, %v1236_v56  ;;  %v7133_v60 = vld [vmem:[#allocation4_spill] sm:$0xff]  ;;  %v7136_v36 = vld [vmem:[#allocation175_spill] sm:$0xff] }
 0x3b6   : > { %v5998_v17 = vadd.f32 %v2212_v35, %v5823_v44  ;;  %v6001_v43 = vadd.f32 %v2213_v61, %v5825_v5  ;;  %v2268_v63 = vmul.f32 %v5653_v46, %v2246_v18  ;;  %v2269_v26 = vmul.f32 %v5656_v11, %v2250_v31  ;;  %v7135_v61 = vld [vmem:[#allocation17_spill] sm:$0xff]  ;;  %v7138_v18 = vld [vmem:[#allocation120_spill] sm:$0xff] }
 0x3b7   : > { %v1313_v5 = vadd.f32 %v1305_v14, %v1235_v22  ;;  %v1461_v10 = vmul.f32 %v7129_v23, %v1437_v2  ;;  %v1462_v35 = vmul.f32 %v7129_v23, %v1438_v25  ;;  %v1490_v6 = vmul.f32 %v7134_v41, %v7133_v60  ;;  %v7137_v25 = vld [vmem:[#allocation146_spill] sm:$0xff]  ;;  %v7146_v60 = vld [vmem:[#allocation156_spill] sm:$0xff] }
 0x3b8   : > { %v2292_v8 = vmul.f32 %v5743_v51, %v2268_v63  ;;  %v2293_v44 = vmul.f32 %v5743_v51, %v2269_v26  ;;  %v6011_v33 = vpop.permute.xlu1 %2310  ;;  %v1491_v24 = vmul.f32 %v7136_v36, %v7135_v61  ;;  %v1392_v42 = vadd.f32 %v1384_v15, %v1314_v4  ;;  %v7141_v63 = vld [vmem:[#allocation72_spill] sm:$0xff]  ;;  %v7142_v22 = vld [vmem:[#allocation54_spill] sm:$0xff]  ;;  %v6045_v54 = vpop.permute.xlu0 %2439 }
 0x3b9   : > { %v1391_v2 = vadd.f32 %v1383_v20, %v1313_v5  ;;  %v1623_v31 = vsel %vm7139_vm4, %v7138_v18, %v7137_v25  ;;  %v1568_v26 = vmul.f32 %v7141_v63, %v1545_v1  ;;  %v1569_v56 = vmul.f32 %v7142_v22, %v1549_v27  ;;  %v7144_v4 = vld [vmem:[#allocation56_spill] sm:$0xff]  ;;  %v7147_v41 = vld [vmem:[#allocation154_spill] sm:$0xff]  ;;  %v7156_v22 = vld [vmem:[#allocation115_spill] sm:$0xff] }
 0x3ba   : > { %v6024_v51 = vadd.f32 %v2292_v8, %v5855_v9  ;;  %v6027_v14 = vadd.f32 %v2293_v44, %v5857_v40  ;;  %v1627_v9 = vsel %vm7140_vm6, %v7137_v25, %v7138_v18  ;;  %v1470_v15 = vadd.f32 %v1462_v35, %v1392_v42  ;;  %v7143_v8 = vld [vmem:[#allocation122_spill] sm:$0xff]  ;;  %v7151_v36 = vld [vmem:[#allocation168_spill] sm:$0xff]  ;;  %v7155_v18 = vld [vmem:[#allocation125_spill] sm:$0xff] }
 0x3bb   : > { %v1469_v20 = vadd.f32 %v1461_v10, %v1391_v2  ;;  %v1514_v44 = vmul.f32 %v7143_v8, %v1490_v6  ;;  %v1515_v5 = vmul.f32 %v7143_v8, %v1491_v24  ;;  %v1646_v23 = vmul.f32 %v7144_v4, %v1623_v31  ;;  %v7150_v35 = vld [vmem:[#allocation134_spill] sm:$0xff]  ;;  %v7152_v24 = vld [vmem:[#allocation155_spill] sm:$0xff] }
 0x3bc   : > { %7132 = vst [vmem:[#allocation7_spill] sm:$0xff] %v6027_v14  ;;  %v6041_v40 = vpop.permute.xlu1 %2318  ;;  %v1647_v19 = vmul.f32 %v7145_v39, %v1627_v9  ;;  %v1701_v61 = vsel %vm7148_vm7, %v7147_v41, %v7146_v60  ;;  %v1705_v1 = vsel %vm7149_vm8, %v7146_v60, %v7147_v41  ;;  %v1592_v27 = vmul.f32 %v7150_v35, %v1568_v26  ;;  %v6075_v8 = vpop.permute.xlu0 %2435  ;;  %v7157_v4 = vld [vmem:[#allocation3_spill] sm:$0xff]  ;;  %v7158_v60 = vld [vmem:[#allocation58_spill] sm:$0xff]  ;;  %v7160_v14 = vld [vmem:[#allocation189_spill] sm:$0xff] }
 0x3bd   : > { %v1593_v6 = vmul.f32 %v7150_v35, %v1569_v56  ;;  %v1779_v2 = vsel %vm7153_vm9, %v7152_v24, %v7151_v36  ;;  %v1783_v42 = vsel %vm7154_vm10, %v7151_v36, %v7152_v24  ;;  %v1724_v25 = vmul.f32 %v5259_v7, %v1701_v61  ;;  %v7159_v35 = vld [vmem:[#allocation197_spill] sm:$0xff] }
 0x3be   : > { %v1725_v31 = vmul.f32 %v7155_v18, %v1705_v1  ;;  %v1522_v9 = vadd.f32 %v1514_v44, %v1469_v20  ;;  %v1523_v63 = vadd.f32 %v1515_v5, %v1470_v15  ;;  %v1670_v26 = vmul.f32 %v7156_v22, %v1646_v23  ;;  %v7161_v5 = vld [vmem:[#allocation148_spill] sm:$0xff]  ;;  %v7162_v61 = vld [vmem:[#allocation9_spill] sm:$0xff]  ;;  %v7164_v18 = vld [vmem:[#allocation138_spill] sm:$0xff] }
 0x3bf   : > { %v1671_v56 = vmul.f32 %v7156_v22, %v1647_v19  ;;  %v1802_v39 = vmul.f32 %v7157_v4, %v1779_v2  ;;  %v1803_v41 = vmul.f32 %v7158_v60, %v1783_v42  ;;  %v1857_v36 = vsel %vm1854_vm1, %v7160_v14, %v7159_v35  ;;  %v7163_v1 = vld [vmem:[#allocation196_spill] sm:$0xff]  ;;  %v7165_v60 = vld [vmem:[#allocation75_spill] sm:$0xff] }
 0x3c0   : > { %v6059_v10 = vpop.permute.xlu1 %2390  ;;  %v1861_v7 = vsel %vm1854_vm1, %v7159_v35, %v7160_v14  ;;  %v1600_v15 = vadd.f32 %v1592_v27, %v1522_v9  ;;  %v1601_v44 = vadd.f32 %v1593_v6, %v1523_v63  ;;  %v1748_v23 = vmul.f32 %v7161_v5, %v1724_v25  ;;  %v6105_v63 = vpop.permute.xlu0 %2314  ;;  %v7166_v35 = vld [vmem:[#allocation44_spill] sm:$0xff] }
 0x3c1   : > { %v1749_v19 = vmul.f32 %v7161_v5, %v1725_v31  ;;  %v1935_v24 = vsel %vm1932_vm2, %v7163_v1, %v7162_v61  ;;  %v1939_v2 = vsel %vm1932_vm2, %v7162_v61, %v7163_v1  ;;  %v1880_v14 = vmul.f32 %v5380_v0, %v1857_v36  ;;  %v7170_v1 = vld [vmem:[#allocation172_spill] sm:$0xff] }
 0x3c2   : > { %v1881_v42 = vmul.f32 %v5383_v38, %v1861_v7  ;;  %v1678_v27 = vadd.f32 %v1670_v26, %v1600_v15  ;;  %v1679_v6 = vadd.f32 %v1671_v56, %v1601_v44  ;;  %v1826_v25 = vmul.f32 %v7164_v18, %v1802_v39  ;;  %v7167_v39 = vld [vmem:[#allocation171_spill] sm:$0xff]  ;;  %v7168_v7 = vld [vmem:[#allocation6_spill] sm:$0xff] }
 0x3c3   : > { %v1827_v31 = vmul.f32 %v7164_v18, %v1803_v41  ;;  %v1958_v22 = vmul.f32 %v5409_v34, %v1935_v24  ;;  %v1959_v4 = vmul.f32 %v5412_v28, %v1939_v2  ;;  %v2013_v0 = vsel %vm2010_vm5, %v7166_v35, %v7165_v60  ;;  %v7169_v34 = vld [vmem:[#allocation57_spill] sm:$0xff] }
 0x3c4   : > { %v6087_v20 = vpop.permute.xlu1 %2398  ;;  %v2017_v38 = vsel %vm2010_vm5, %v7165_v60, %v7166_v35  ;;  %v1756_v26 = vadd.f32 %v1748_v23, %v1678_v27  ;;  %v1757_v56 = vadd.f32 %v1749_v19, %v1679_v6  ;;  %v1904_v41 = vmul.f32 %v7167_v39, %v1880_v14  ;;  %v6135_v27 = vpop.permute.xlu0 %2394 }
 0x3c5   : > { %v1905_v36 = vmul.f32 %v7167_v39, %v1881_v42  ;;  %v2091_v28 = vsel %vm2088_vm14, %v7169_v34, %v7168_v7  ;;  %v2095_v15 = vsel %vm2088_vm14, %v7168_v7, %v7169_v34  ;;  %v2036_v44 = vmul.f32 %v5478_v53, %v2013_v0  ;;  %v7172_v0 = vld [vmem:[#allocation10_spill] sm:$0xff]  ;;  %v3084_v7 = vld [vmem:[%s6376_s3 + $0x30] ss:$8 sm:$0x3] }
 0x3c6   : > { %v2037_v5 = vmul.f32 %v5481_v3, %v2017_v38  ;;  %v1834_v19 = vadd.f32 %v1826_v25, %v1756_v26  ;;  %v1835_v61 = vadd.f32 %v1827_v31, %v1757_v56  ;;  %v1982_v24 = vmul.f32 %v7170_v1, %v1958_v22  ;;  %v7171_v25 = vld [vmem:[#allocation24_spill] sm:$0xff] }
 0x3c7   : > { %v1983_v2 = vmul.f32 %v7170_v1, %v1959_v4  ;;  %v2114_v14 = vmul.f32 %v5520_v55, %v2091_v28  ;;  %v2115_v42 = vmul.f32 %v5523_v21, %v2095_v15  ;;  %v2247_v53 = vsel %vm2244_vm15, %v5704_v12, %v5874_v37  ;;  %v7173_v15 = vld [vmem:[#allocation18_spill] sm:$0xff] }
 0x3c8   : > { %v6103_v9 = vpop.permute.xlu1 %2228  ;;  %v1912_v6 = vadd.f32 %v1904_v41, %v1834_v19  ;;  %v1913_v18 = vadd.f32 %v1905_v36, %v1835_v61  ;;  %v2251_v3 = vsel %vm2244_vm15, %v5874_v37, %v5704_v12  ;;  %v2060_v31 = vmul.f32 %v7171_v25, %v2036_v44 }
 0x3c9   : > { %v2061_v55 = vmul.f32 %v7171_v25, %v2037_v5  ;;  %v2325_v60 = vsel %vm2322_vm3, %v6011_v33, %v6041_v40  ;;  %v2329_v35 = vsel %vm2322_vm3, %v6041_v40, %v6011_v33  ;;  %v2138_v12 = vmul.f32 %v7172_v0, %v2114_v14  ;;  %v2472_v33 = vpop.permute.xlu0 %2471 }
 0x3ca   : > { %v1990_v21 = vadd.f32 %v1982_v24, %v1912_v6  ;;  %v1991_v4 = vadd.f32 %v1983_v2, %v1913_v18  ;;  %v2139_v37 = vmul.f32 %v7172_v0, %v2115_v42  ;;  %v2270_v38 = vmul.f32 %v5653_v46, %v2247_v53 }
 0x3cb   : > { %v2271_v26 = vmul.f32 %v5656_v11, %v2251_v3  ;;  %v2348_v41 = vmul.f32 %v5880_v47, %v2325_v60  ;;  %v2349_v36 = vmul.f32 %v5883_v29, %v2329_v35  ;;  %v6170_v19 = vrot.slane %v3084_v7, %v4513_v52 }
 0x3cc   : > { %v6129_v23 = vpop.permute.xlu1 %2236  ;;  %v2068_v56 = vadd.f32 %v2060_v31, %v1990_v21  ;;  %v2069_v39 = vadd.f32 %v2061_v55, %v1991_v4  ;;  %v2294_v44 = vmul.f32 %v7173_v15, %v2270_v38  ;;  %v6173_v61 = vrot.slane %v3084_v7, %v4515_v45 }
 0x3cd   : > { %v2295_v5 = vmul.f32 %v7173_v15, %v2271_v26  ;;  %v2372_v2 = vmul.f32 %v5923_v62, %v2348_v41  ;;  %v2373_v14 = vmul.f32 %v5923_v62, %v2349_v36  ;;  %v2404_v21 = vsel %vm2400_vm11, %v6059_v10, %v6087_v20 }
 0x3ce   : > { %v2146_v40 = vadd.f32 %v2138_v12, %v2068_v56  ;;  %v2147_v28 = vadd.f32 %v2139_v37, %v2069_v39  ;;  %v2408_v35 = vsel %vm2400_vm11, %v6087_v20, %v6059_v10  ;;  %v2428_v26 = vmul.f32 %v6170_v19, %v2404_v21 }
 0x3cf   : > { %v2245_v20 = vsel %vm2244_vm15, %v6103_v9, %v6129_v23  ;;  %vm3442_vm12 = vmmov 0   ;;  %vm2584_vm13 = vcmask 261120   ;;  %vm2678_vm14 = vcmask 31744  }
 0x3d0   : > { %v6147_v22 = vpop.permute.xlu1 %2316  ;;  %v2224_v1 = vadd.f32 %v5720_v50, %v2146_v40  ;;  %v2225_v24 = vadd.f32 %v5723_v30, %v2147_v28  ;;  %v2393_v50 = vpop.permute.xlu0 %2392  ;;  %v2266_v28 = vmul.f32 %v5653_v46, %v2245_v20 }
 0x3d1   : > { %v2328_v46 = vsel %vm2322_vm3, %v6147_v22, %v5935_v16 }
 0x3d2   : > { %v2302_v52 = vadd.f32 %v2294_v44, %v2224_v1  ;;  %v2303_v53 = vadd.f32 %v2295_v5, %v2225_v24 }
 0x3d4   : > { %v2389_v34 = vpop.permute.xlu1 %2388  ;;  %v2380_v25 = vadd.f32 %v2372_v2, %v2302_v52  ;;  %v2381_v30 = vadd.f32 %v2373_v14, %v2303_v53  ;;  %v2496_v0 = vpop.permute.xlu0 %2495 }
 0x3d8   : > { %v2397_v42 = vpop.permute.xlu1 %2396 }
 0x3d9   : > { %v2403_v6 = vsel %vm2400_vm11, %v2389_v34, %v2397_v42  ;;  %v2407_v18 = vsel %vm2400_vm11, %v2397_v42, %v2389_v34  ;;  %v2452_v34 = vmul.f32 %v6005_v59, %v2428_v26 }
 0x3da   : > { %v2426_v45 = vmul.f32 %v6170_v19, %v2403_v6  ;;  %v2427_v3 = vmul.f32 %v6173_v61, %v2407_v18  ;;  %v2347_v18 = vmul.f32 %v5883_v29, %v2328_v46 }
 0x3db   : > { %v2460_v44 = vadd.f32 %v2452_v34, %v5928_v48 }
 0x3dc   : > { %v2450_v31 = vmul.f32 %v6045_v54, %v2426_v45  ;;  %v2451_v62 = vmul.f32 %v6045_v54, %v2427_v3  ;;  %v2476_v55 = vpop.permute.xlu1 %2475  ;;  %v2429_v54 = vmul.f32 %v6173_v61, %v2408_v35  ;;  %v2371_v21 = vmul.f32 %v5905_v49, %v2347_v18 }
 0x3de   : > { %v2458_v4 = vadd.f32 %v2450_v31, %v2380_v25  ;;  %v2459_v60 = vadd.f32 %v2451_v62, %v2381_v30  ;;  %v2453_v10 = vmul.f32 %v6005_v59, %v2429_v54  ;;  %v7174_v54 = vld [vmem:[#allocation7_spill] sm:$0xff] }
 0x3e0   : > { %v2307_v12 = vpop.permute.xlu1 %2306  ;;  %v2482_v37 = vmul.f32 %v2472_v33, %v2458_v4  ;;  %v2483_v38 = vmul.f32 %v2472_v33, %v2459_v60  ;;  %v2249_v33 = vsel %vm2244_vm15, %v6129_v23, %v6103_v9  ;;  %v2461_v5 = vadd.f32 %v2453_v10, %v5931_v13 }
 0x3e1   : > { %v2267_v15 = vmul.f32 %v5656_v11, %v2249_v33  ;;  %v2323_v59 = vsel %vm2322_vm3, %v2307_v12, %v6105_v63  ;;  %v2327_v1 = vsel %vm2322_vm3, %v6105_v63, %v2307_v12  ;;  %v2324_v9 = vsel %vm2322_vm3, %v5935_v16, %v6147_v22 }
 0x3e2   : > { %v6197_v56 = vadd.f32 %v2496_v0, %v2482_v37  ;;  %v6199_v39 = vadd.f32 %v2496_v0, %v2483_v38  ;;  %v2484_v11 = vmul.f32 %v2476_v55, %v2460_v44  ;;  %v2485_v23 = vmul.f32 %v2476_v55, %v2461_v5 }
 0x3e3   : > { %v2344_v48 = vmul.f32 %v5880_v47, %v2323_v59  ;;  %v2290_v13 = vmul.f32 %v5859_v58, %v2266_v28  ;;  %v2291_v24 = vmul.f32 %v5859_v58, %v2267_v15  ;;  %v2345_v63 = vmul.f32 %v5883_v29, %v2327_v1 }
 0x3e4   : > { %v3089_v41 = vmul.f32 -1.442695, %v6197_v56  ;;  %v3090_v36 = vmul.f32 -1.442695, %v6199_v39  ;;  %v2387_v7 = vpop.permute.xlu1 %2386  ;;  %v2346_v6 = vmul.f32 %v5880_v47, %v2324_v9  ;;  %vm2691_vm15 = vcmask 1043456  }
 0x3e5   : > { %v2402_v16 = vsel %vm2400_vm11, %v2387_v7, %v6135_v27  ;;  %v2368_v22 = vmul.f32 %v5965_v32, %v2344_v48  ;;  %v2406_v58 = vsel %vm2400_vm11, %v6135_v27, %v2387_v7  ;;  %v2298_v45 = vadd.f32 %v2290_v13, %v5998_v17 }
 0x3e6   : > { %3314 = vpow2.f32 %v3089_v41  ;;  %v2299_v47 = vadd.f32 %v2291_v24, %v6001_v43  ;;  %v2369_v29 = vmul.f32 %v5965_v32, %v2345_v63  ;;  %v2424_v25 = vmul.f32 %v6170_v19, %v2402_v16 }
 0x3e7   : > { %3316 = vpow2.f32 %v3090_v36  ;;  %v2425_v62 = vmul.f32 %v6173_v61, %v2406_v58  ;;  %v2370_v32 = vmul.f32 %v5905_v49, %v2346_v6  ;;  %v2376_v60 = vadd.f32 %v2368_v22, %v2298_v45  ;;  %v2488_v36 = vpop.permute.xlu0 %2487 }
 0x3e8   : > { %v2432_v40 = vpop.permute.xlu1 %2431  ;;  %v2448_v37 = vmul.f32 %v6075_v8, %v2424_v25  ;;  %v2379_v41 = vadd.f32 %v2371_v21, %v7174_v54  ;;  %v7175_v21 = vmov 0.0   ;;  %v3377_v54 = vld [vmem:[%s6380_s7 + $0x10] sm:$0xff] }
 0x3e9   : > { %v2378_v26 = vadd.f32 %v2370_v32, %v6024_v51  ;;  %3128 = vmatprep.mubr.msk.f32.mxu1 %vm3442_vm12, %v7175_v21 }
 0x3eb   : > { %v2456_v10 = vadd.f32 %v2448_v37, %v2378_v26  ;;  %v3376_v26 = vld [vmem:[%s6380_s7 + $0x18] sm:$0xff] }
 0x3ee   : > { %v2500_v2 = vpop.permute.xlu1 %2499 }
 0x3ef   : > { %v6235_v14 = vadd.f32 %v2500_v2, %v2484_v11  ;;  %v6237_v42 = vadd.f32 %v2500_v2, %v2485_v23 }
 0x3f1   : > { %v3091_v52 = vmul.f32 -1.442695, %v6235_v14  ;;  %v3092_v53 = vmul.f32 -1.442695, %v6237_v42 }
 0x3f2   : > { %v2385_v3 = vpop.permute.xlu1 %2384 }
 0x3f3   : > { %3318 = vpow2.f32 %v3091_v52  ;;  %v2401_v30 = vsel %vm2400_vm11, %v2385_v3, %v2393_v50  ;;  %v2405_v27 = vsel %vm2400_vm11, %v2393_v50, %v2385_v3  ;;  %v3315_v31 = vpop.eup %3314  ;;  %v2377_v50 = vadd.f32 %v2369_v29, %v2299_v47 }
 0x3f4   : > { %3320 = vpow2.f32 %v3092_v53  ;;  %v2422_v17 = vmul.f32 %v6170_v19, %v2401_v30  ;;  %v2423_v43 = vmul.f32 %v6173_v61, %v2405_v27  ;;  %v3317_v55 = vpop.eup %3316  ;;  %v2538_v4 = vadd.f32 1.0, %v3315_v31 }
 0x3f5   : > { %v2539_v35 = vadd.f32 1.0, %v3317_v55  ;;  %v2449_v19 = vmul.f32 %v6075_v8, %v2425_v62 }
 0x3f6   : > { %v2446_v0 = vmul.f32 %v2432_v40, %v2422_v17  ;;  %v2447_v12 = vmul.f32 %v2432_v40, %v2423_v43  ;;  %v2468_v57 = vpop.permute.xlu1 %2467  ;;  %3322 = vrcp.f32 %v2538_v4  ;;  %v2566_v4 = vld [vmem:[%s6380_s7] sm:$0xf] }
 0x3f7   : > { %3324 = vrcp.f32 %v2539_v35  ;;  %v2457_v20 = vadd.f32 %v2449_v19, %v2379_v41  ;;  %v2480_v28 = vmul.f32 %v2468_v57, %v2456_v10  ;;  %v3378_v41 = vld [vmem:[%s6380_s7 + $0x8] sm:$0xff] }
 0x3f8   : > { %v2454_v38 = vadd.f32 %v2446_v0, %v2376_v60  ;;  %v2455_v61 = vadd.f32 %v2447_v12, %v2377_v50 }
 0x3f9   : > { %v2481_v15 = vmul.f32 %v2468_v57, %v2457_v20 }
 0x3fa   : > { %v2464_v49 = vpop.permute.xlu1 %2463 }
 0x3fb   : > { %v2478_v7 = vmul.f32 %v2464_v49, %v2454_v38  ;;  %v2479_v34 = vmul.f32 %v2464_v49, %v2455_v61  ;;  %v2583_v38 = vld [vmem:[%s6377_s4] sm:$0xf] }
 0x3fc   : > { %v2674_v61 = vld [vmem:[%s6378_s5] sm:$0xff] }
 0x3fd   : > { %v2502_v33 = vadd.f32 %v2488_v36, %v2478_v7  ;;  %v2503_v40 = vadd.f32 %v2488_v36, %v2479_v34  ;;  %v3379_v49 = vld [vmem:[%s6380_s7] sm:$0xff] }
 0x3ff   : > { %v3085_v59 = vmul.f32 -1.442695, %v2502_v33  ;;  %v3086_v44 = vmul.f32 -1.442695, %v2503_v40  ;;  %v2492_v5 = vpop.permute.xlu1 %2491 }
 0x400   : > { %v3319_v8 = vpop.eup %3318  ;;  %v2504_v1 = vadd.f32 %v2492_v5, %v2480_v28  ;;  %v2505_v9 = vadd.f32 %v2492_v5, %v2481_v15  ;;  %v2675_v5 = vld [vmem:[%s6378_s5 + $0x8] sm:$0xff] }
 0x401   : > { %v3321_v46 = vpop.eup %3320  ;;  %v2540_v51 = vadd.f32 1.0, %v3319_v8  ;;  %3326 = vpow2.f32 %v3085_v59  ;;  %v2676_v8 = vld [vmem:[%s6378_s5 + $0x10] sm:$0xff] }
 0x402   : > { %v2541_v11 = vadd.f32 1.0, %v3321_v46  ;;  %3328 = vpow2.f32 %v3086_v44  ;;  %v3087_v23 = vmul.f32 -1.442695, %v2504_v1  ;;  %v3088_v48 = vmul.f32 -1.442695, %v2505_v9 }
 0x403   : > { %3330 = vrcp.f32 %v2540_v51  ;;  %v3323_v13 = vpop.eup %3322 }
 0x404   : > { %3332 = vrcp.f32 %v2541_v11  ;;  %v3325_v24 = vpop.eup %3324  ;;  %v6268_v63 = vmul.f32 %v3323_v13, %v6197_v56 }
 0x405   : > { %3334 = vpow2.f32 %v3087_v23  ;;  %v6271_v2 = vmul.f32 %v3325_v24, %v6199_v39 }
 0x406   : > { %3336 = vpow2.f32 %v3088_v48 }
 0x407   : > { %v2573_v6 = vadd.f32 %v6271_v2, %v6268_v63 }
 0x409   : > { %2574 = vadd.xlane.f32.xlu0 %v2573_v6 }
 0x40e   : > { %v3327_v18 = vpop.eup %3326 }
 0x40f   : > { %v3329_v16 = vpop.eup %3328  ;;  %v2534_v22 = vadd.f32 1.0, %v3327_v18 }
 0x410   : > { %v3331_v58 = vpop.eup %3330  ;;  %v2535_v52 = vadd.f32 1.0, %v3329_v16 }
 0x411   : > { %v3333_v53 = vpop.eup %3332  ;;  %v6276_v45 = vmul.f32 %v3331_v58, %v6235_v14  ;;  %3338 = vrcp.f32 %v2534_v22 }
 0x412   : > { %v3335_v56 = vpop.eup %3334  ;;  %v6279_v47 = vmul.f32 %v3333_v53, %v6237_v42  ;;  %3340 = vrcp.f32 %v2535_v52 }
 0x413   : > { %v3337_v39 = vpop.eup %3336  ;;  %v2536_v29 = vadd.f32 1.0, %v3335_v56 }
 0x414   : > { %v2537_v3 = vadd.f32 1.0, %v3337_v39  ;;  %v2576_v25 = vadd.f32 %v6279_v47, %v6276_v45 }
 0x415   : > { %3342 = vrcp.f32 %v2536_v29 }
 0x416   : > { %3344 = vrcp.f32 %v2537_v3  ;;  %2577 = vadd.xlane.f32.xlu1 %v2576_v25 }
 0x41e   : > { %v3339_v30 = vpop.eup %3338 }
 0x41f   : > { %v3341_v27 = vpop.eup %3340  ;;  %v6283_v31 = vmul.f32 %v3339_v30, %v2502_v33 }
 0x420   : > { %v6285_v14 = vmul.f32 %v3341_v27, %v2503_v40 }
 0x422   : > { %v3343_v62 = vpop.eup %3342  ;;  %v2567_v42 = vadd.f32 %v6285_v14, %v6283_v31 }
 0x423   : > { %v3345_v17 = vpop.eup %3344  ;;  %v6289_v43 = vmul.f32 %v3343_v62, %v2504_v1  ;;  %v2677_v1 = vld [vmem:[%s6378_s5 + $0x18] sm:$0xff] }
 0x424   : > { %v6291_v55 = vmul.f32 %v3345_v17, %v2505_v9  ;;  %2568 = vadd.xlane.f32.xlu1 %v2567_v42 }
 0x426   : > { %v2570_v32 = vadd.f32 %v6291_v55, %v6289_v43 }
 0x428   : > { %2571 = vadd.xlane.f32.xlu0 %v2570_v32 }
 0x435   : > { %2663 = vrot.lane.b32.xlu1 %v2566_v4, %s3443_s21 }
 0x439   : > { %2786 = vrot.lane.b32.xlu1 %v3376_v26, %s3445_s22 }
 0x43d   : > { %2802 = vrot.lane.b32.xlu1 %v3376_v26, %s3446_s29  ;;  %v2865_v26 = vld [vmem:[%s6380_s7 + $0x8] sm:$0xff] }
 0x43e   : > { %2659 = vrot.lane.b32.xlu0 %v2566_v4, %s3444_s19 }
 0x441   : > { %2800 = vrot.lane.b32.xlu1 %v3377_v54, %s3446_s29 }
 0x442   : > { %2784 = vrot.lane.b32.xlu0 %v3377_v54, %s3445_s22  ;;  %v2864_v54 = vld [vmem:[%s6380_s7] sm:$0xff] }
 0x445   : > { %2798 = vrot.lane.b32.xlu1 %v3378_v41, %s3446_s29 }
 0x446   : > { %2782 = vrot.lane.b32.xlu0 %v3378_v41, %s3445_s22  ;;  %v7177_v41 = vmov 9  }
 0x44a   : > { %2780 = vrot.lane.b32.xlu0 %v3379_v49, %s3445_s22 }
 0x44e   : > { %2796 = vrot.lane.b32.xlu0 %v3379_v49, %s3446_s29 }
 0x492   : > { %v2575_v60 = vpop.xlane.xlu0 %2574 }
 0x493   : > { %v2581_v12 = vmul.f32 0.00390625, %v2575_v60 }
 0x49f   : > { %v2578_v35 = vpop.xlane.xlu1 %2577 }
 0x4a0   : > { %v2582_v0 = vmul.f32 0.00390625, %v2578_v35 }
 0x4a2   : > { %3121 = vmatpush3.msra.mxu1 %v2582_v0 }
 0x4a3   : > { %3122 = vmatprep.subr.mxu1 %v7175_v21 }
 0x4a4   : > { %3123 = vmatpush3.msra.mxu1 %v2581_v12 }
 0x4a5   : > { %3124 = vmatprep.subr.mxu1 %v7175_v21 }
 0x4ad   : > { %v2569_v57 = vpop.xlane.xlu1 %2568 }
 0x4ae   : > { %v2579_v19 = vmul.f32 0.00390625, %v2569_v57 }
 0x4b1   : > { %v2572_v50 = vpop.xlane.xlu0 %2571  ;;  %v2664_v34 = vpop.permute.xlu1 %2663 }
 0x4b2   : > { %v2580_v37 = vmul.f32 0.00390625, %v2572_v50 }
 0x4b4   : > { %3125 = vmatpush3.msra.mxu1 %v2580_v37 }
 0x4b5   : > { %3126 = vmatprep.subr.mxu1 %v7175_v21  ;;  %v2660_v36 = vpop.permute.xlu0 %2659  ;;  %v2787_v9 = vpop.permute.xlu1 %2786 }
 0x4b6   : > { %3127 = vmatpush3.msra.mxu1 %v2579_v19 }
 0x4b7   : > { %3129 = vmatmul.mubr.msk.f32.vlgmr.msra.gmra.mxu1 %vm2584_vm13, %v2583_v38  ;;  %v7176_v38 = vmov 8  }
 0x4b8   : > { %3133 = vmatprep.mubr.msk.f32.mxu1 %vm2678_vm14, %v2674_v61 }
 0x4b9   : > { %v2785_v46 = vpop.permute.xlu0 %2784  ;;  %v2803_v51 = vpop.permute.xlu1 %2802 }
 0x4bd   : > { %v2783_v11 = vpop.permute.xlu0 %2782  ;;  %v2801_v23 = vpop.permute.xlu1 %2800 }
 0x4c1   : > { %v2781_v48 = vpop.permute.xlu0 %2780  ;;  %v2799_v24 = vpop.permute.xlu1 %2798 }
 0x4c5   : > { %v2797_v52 = vpop.permute.xlu0 %2796 }
 0x577   : > { %v2654_v7 = vpop.f32.mrf.mxu1 }
 0x578   : > { %v2662_v10 = vmul.f32 %v2660_v36, %v2654_v7 }
 0x579   : > { %v3130_v20 = vpop.f32.mrf.mxu1 }
 0x57a   : > { %v2666_v33 = vadd.f32 %v2664_v34, %v2662_v10 }
 0x57c   : > { %v3094_v40 = vmul.f32 -1.442695, %v2666_v33 }
 0x57e   : > { %3346 = vpow2.f32 %v3094_v40 }
 0x58b   : > { %v3347_v28 = vpop.eup %3346 }
 0x58c   : > { %v2670_v15 = vadd.f32 1.0, %v3347_v28 }
 0x58e   : > { %3348 = vrcp.f32 %v2670_v15 }
 0x59b   : > { %v3349_v59 = vpop.eup %3348 }
 0x59c   : > { %v2673_v44 = vmul.f32 %v3349_v59, %v2666_v33 }
 0x59e   : > { %3131 = vmatprep.subr.msk.mxu1 %vm2691_vm15, %v2673_v44 }
 0x59f   : > { %3132 = vmatpush3.msk.msra.mxu1 %vm2691_vm15, %v2673_v44 }
 0x5a0   : > { %3134 = vmatmul.mubr.msk.f32.vlgmr.msra.gmra.mxu1 %vm2678_vm14, %v2675_v5 }
 0x5a1   : > { %3136 = vmatprep.mubr.msk.f32.mxu1 %vm2678_vm14, %v2676_v8 }
 0x5a4   : > { %3137 = vmatmul.mubr.msk.f32.gmra.mxu1 %vm2678_vm14, %v2677_v1 }
 0x660   : > { %v3135_v13 = vpop.f32.mrf.mxu1 }
 0x661   : > { %v2793_v6 = vmul.f32 %v3135_v13, %v2783_v11 }
 0x662   : > { %v2761_v18 = vpop.f32.mrf.mxu1 }
 0x663   : > { %v2792_v16 = vmul.f32 %v2781_v48, %v2761_v18  ;;  %v2809_v22 = vadd.f32 %v2799_v24, %v2793_v6  ;;  %v3381_v48 = vld [vmem:[%s3514_s12 + $0x8] sm:$0xff] }
 0x664   : > { %v3138_v58 = vpop.f32.mrf.mxu1 }
 0x665   : > { %v2795_v53 = vmul.f32 %v3138_v58, %v2787_v9  ;;  %v3101_v56 = vmul.f32 -1.442695, %v2809_v22  ;;  %v2808_v3 = vadd.f32 %v2797_v52, %v2792_v16  ;;  %v3382_v16 = vld [vmem:[%s3514_s12 + $0x10] sm:$0xff]  ;;  %v3383_v58 = vld [vmem:[%s3514_s12 + $0x18] sm:$0xff] }
 0x666   : > { %v2771_v39 = vpop.f32.mrf.mxu1 }
 0x667   : > { %v2811_v29 = vadd.f32 %v2803_v51, %v2795_v53  ;;  %v2794_v25 = vmul.f32 %v2785_v46, %v2771_v39  ;;  %3350 = vpow2.f32 %v3101_v56  ;;  %v3100_v62 = vmul.f32 -1.442695, %v2808_v3  ;;  %v3380_v51 = vld [vmem:[%s3514_s12] sm:$0xff] }
 0x669   : > { %v3103_v30 = vmul.f32 -1.442695, %v2811_v29  ;;  %v2810_v27 = vadd.f32 %v2801_v23, %v2794_v25 }
 0x66b   : > { %3352 = vpow2.f32 %v3103_v30  ;;  %v3102_v42 = vmul.f32 -1.442695, %v2810_v27 }
 0x66d   : > { %3354 = vpow2.f32 %v3102_v42 }
 0x66e   : > { %3356 = vpow2.f32 %v3100_v62 }
 0x674   : > { %v3351_v17 = vpop.eup %3350 }
 0x675   : > { %v2825_v35 = vadd.f32 1.0, %v3351_v17 }
 0x678   : > { %v3353_v32 = vpop.eup %3352 }
 0x679   : > { %v2827_v4 = vadd.f32 1.0, %v3353_v32 }
 0x67a   : > { %v3355_v60 = vpop.eup %3354 }
 0x67b   : > { %3358 = vrcp.f32 %v2827_v4  ;;  %v2826_v0 = vadd.f32 1.0, %v3355_v60  ;;  %v3357_v12 = vpop.eup %3356 }
 0x67c   : > { %v2824_v57 = vadd.f32 1.0, %v3357_v12 }
 0x67d   : > { %3360 = vrcp.f32 %v2826_v0 }
 0x67e   : > { %3362 = vrcp.f32 %v2825_v35 }
 0x67f   : > { %3364 = vrcp.f32 %v2824_v57 }
 0x688   : > { %v3359_v50 = vpop.eup %3358 }
 0x689   : > { %2853 = vperm.xlu1 %3276, %v3359_v50  }
 0x68a   : > { %v3361_v37 = vpop.eup %3360 }
 0x68b   : > { %2848 = vperm.xlu0 %3277, %v3361_v37   ;;  %v3363_v19 = vpop.eup %3362 }
 0x68c   : > { %v3365_v61 = vpop.eup %3364 }
 0x68d   : > { %2843 = vperm.xlu1 %3276, %v3363_v19  }
 0x68f   : > { %3278 = vset.pattern.permute.xlu0 %v7176_v38 }
 0x690   : > { %2953 = vperm.xlu0 %3278, %v2864_v54  }
 0x691   : > { %2838 = vperm.xlu1 %3276, %v3365_v61  }
 0x694   : > { %3281 = vset.pattern.permute.xlu0 %v7177_v41 }
 0x695   : > { %3279 = vset.pattern.permute.xlu1 %v7176_v38  ;;  %2970 = vperm.xlu0 %3281, %v2865_v26  }
 0x696   : > { %2958 = vperm.xlu1 %3279, %v2865_v26  }
 0x69a   : > { %3280 = vset.pattern.permute.xlu1 %v7177_v41 }
 0x69b   : > { %2966 = vperm.xlu1 %3280, %v2864_v54  }
 0x704   : > { %v2854_v49 = vpop.permute.xlu1 %2853 }
 0x705   : > { %v2862_v36 = vmul.f32 %v2854_v49, %v6276_v45  ;;  %v2863_v7 = vmul.f32 %v2854_v49, %v6279_v47 }
 0x706   : > { %v2849_v34 = vpop.permute.xlu0 %2848 }
 0x707   : > { %v2860_v10 = vmul.f32 %v2849_v34, %v6268_v63  ;;  %v2861_v20 = vmul.f32 %v2849_v34, %v6271_v2  ;;  %2898 = vmatprep.subr.mxu0 %v2863_v7  ;;  %v2866_v63 = vld [vmem:[%s6379_s6] sm:$0xff]  ;;  %v2867_v2 = vld [vmem:[%s6379_s6 + $0x8] sm:$0xff] }
 0x708   : > { %2899 = vmatpush1.msra.mxu0 %v2862_v36  ;;  %v2844_v33 = vpop.permute.xlu1 %2843 }
 0x709   : > { %v2858_v40 = vmul.f32 %v2844_v33, %v6289_v43  ;;  %v2859_v28 = vmul.f32 %v2844_v33, %v6291_v55  ;;  %2900 = vmatprep.subr.mxu0 %v2861_v20 }
 0x70a   : > { %2901 = vmatpush1.msra.mxu0 %v2860_v10 }
 0x70b   : > { %2902 = vmatprep.subr.mxu0 %v2859_v28 }
 0x70c   : > { %v2839_v15 = vpop.permute.xlu1 %2838  ;;  %2903 = vmatpush1.msra.mxu0 %v2858_v40 }
 0x70d   : > { %v2856_v45 = vmul.f32 %v2839_v15, %v6283_v31  ;;  %v2857_v47 = vmul.f32 %v2839_v15, %v6285_v14  ;;  %v2954_v14 = vpop.permute.xlu0 %2953 }
 0x70f   : > { %2904 = vmatprep.subr.mxu0 %v2857_v47 }
 0x710   : > { %2905 = vmatpush1.msra.mxu0 %v2856_v45 }
 0x711   : > { %3104 = vmatmul.mubr.msk.f32.vlgmr.msra.gmra.mxu0 %vm2584_vm13, %v2866_v63  ;;  %v2959_v31 = vpop.permute.xlu1 %2958  ;;  %v2971_v1 = vpop.permute.xlu0 %2970 }
 0x712   : > { %2944 = vmatprep.mubr.f32.mxu0 %v7175_v21 }
 0x715   : > { %3105 = vmatmul.mubr.msk.f32.gmra.mxu0 %vm2584_vm13, %v2867_v2 }
 0x716   : > { %v2967_v55 = vpop.permute.xlu1 %2966 }
 0x7d1   : > { %v2940_v43 = vpop.f32.mrf.mxu0 }
 0x7d2   : > { %v2961_v59 = vmul.f32 %v2954_v14, %v2940_v43 }
 0x7d3   : > { %v2942_v44 = vpop.f32.mrf.mxu0 }
 0x7d4   : > { %v2962_v5 = vmul.f32 %v2954_v14, %v2942_v44  ;;  %v2973_v8 = vadd.f32 %v2967_v55, %v2961_v59 }
 0x7d5   : > { %v2946_v21 = vpop.f32.mrf.mxu0 }
 0x7d6   : > { %v2963_v9 = vmul.f32 %v2959_v31, %v2946_v21  ;;  %v2974_v46 = vadd.f32 %v2967_v55, %v2962_v5  ;;  %v2977_v11 = vadd.f32 %v3380_v51, %v2973_v8 }
 0x7d7   : > { %v2948_v23 = vpop.f32.mrf.mxu0 }
 0x7d8   : > { %v2978_v13 = vadd.f32 %v3381_v48, %v2974_v46  ;;  %2981 = vst [vmem:[%s305_s10] sm:$0xff] %v2977_v11  ;;  %v2964_v24 = vmul.f32 %v2959_v31, %v2948_v23  ;;  %v2975_v6 = vadd.f32 %v2971_v1, %v2963_v9 }
 0x7da   : > { %2982 = vst [vmem:[%s305_s10 + $0x8] sm:$0xff] %v2978_v13  ;;  %v2976_v18 = vadd.f32 %v2971_v1, %v2964_v24  ;;  %v2979_v22 = vadd.f32 %v3382_v16, %v2975_v6 }
 0x7dc   : > { %v2980_v52 = vadd.f32 %v3383_v58, %v2976_v18  ;;  %2983 = vst [vmem:[%s305_s10 + $0x10] sm:$0xff] %v2979_v22 }
 0x7de   : > { %2984 = vst [vmem:[%s305_s10 + $0x18] sm:$0xff] %v2980_v52 }
 0x7df PF: > { %s18_s27 = sadd.s32 1, %s3390_s27  }
 0x7e0   : > { %p15_p4 = scmp.ge.s32.totalorder %s18_s27, 4  }
 0x7e2   :  { %17 = sbr.rel (!%p15_p4) target bundleno = 1 (0x1), region = 106 }

</bundles_post_ra>
